<compile_context>
chip_gen: v6e
topology: v6e:2x2x1
jax: 0.10.0
libtpu: 0.0.40
codegen_flags: <defaults>
</compile_context>

<pallas_src>
import functools

import jax
import jax.numpy as jnp
from jax import lax
from jax.experimental import pallas as pl
from jax.experimental.pallas import tpu as pltpu

BN_EPS_DEFAULT = 1e-5


def get_padding(kernel_size, stride, dilation=1):
    return (stride - 1 + dilation * (kernel_size - 1)) // 2


def _round_up(x, m):
    return ((x + m - 1) // m) * m


@functools.lru_cache(maxsize=None)
def _vmem_caps():
    """(working budget, vmem_limit_bytes), generation aware with safe fallback."""
    cap = 64 * 1024 * 1024  # conservative default (v7x per-core VMEM)
    try:
        info = pltpu.get_tpu_info()
        cap = int(getattr(info, "vmem_capacity_bytes", cap)) or cap
    except Exception:
        pass
    budget = min(int(cap * 0.55), 80 * 1024 * 1024)
    limit = min(int(cap * 0.75), 100 * 1024 * 1024)
    return budget, limit


# ---------------------------------------------------------------------------
# Kernel 1: pointwise (1x1) conv  ->  + bias  ->  hard_swish
# ---------------------------------------------------------------------------
def _pointwise_kernel(p_ref, w_ref, b_ref, o_ref):
    # p_ref: (tm, Cin) bf16, w_ref: (Cin, Cout) bf16 (BN scale pre-folded)
    # b_ref: (1, Cout) f32 folded BN bias, o_ref: (tm, Cout)
    y = jnp.dot(p_ref[...], w_ref[...], preferred_element_type=jnp.float32)
    y = y + b_ref[...]
    hs = jnp.clip(y + 3.0, 0.0, 6.0) * (1.0 / 6.0)
    o_ref[...] = (y * hs).astype(o_ref.dtype)


def _pointwise_call(patches, w_mat, bias2, out_dtype, tile_m):
    M, Cin = patches.shape
    Cout = w_mat.shape[1]
    budget, limit = _vmem_caps()
    osz = jnp.dtype(out_dtype).itemsize

    def fits(t):
        return (4 * t * Cin            # patches, double buffered, bf16
                + 2 * t * Cout * osz   # output, double buffered
                + 4 * Cin * Cout       # weight
                + 12 * t * Cout        # f32 epilogue temps
                + 2 * t * Cin) <= budget

    tm = min(tile_m, M)
    if tm < M:
        tm = max(128, (tm // 128) * 128)
        while tm > 128 and not fits(tm):
            tm = max(128, ((tm // 2) // 128) * 128)
    if tm >= M:
        tm = M  # single full block (legal for any M)

    grid = (pl.cdiv(M, tm),)
    out = pl.pallas_call(
        _pointwise_kernel,
        out_shape=jax.ShapeDtypeStruct((M, Cout), out_dtype),
        grid_spec=pltpu.PrefetchScalarGridSpec(
            num_scalar_prefetch=0,
            grid=grid,
            in_specs=[
                pl.BlockSpec((tm, Cin), lambda i: (i, 0)),
                pl.BlockSpec((Cin, Cout), lambda i: (0, 0)),   # fetched once
                pl.BlockSpec((1, Cout), lambda i: (0, 0)),
            ],
            out_specs=pl.BlockSpec((tm, Cout), lambda i: (i, 0)),
        ),
        compiler_params=pltpu.CompilerParams(
            dimension_semantics=("parallel",),
            vmem_limit_bytes=limit),
    )(patches, w_mat, bias2)
    return out


# ---------------------------------------------------------------------------
# Kernel 2: KxK conv as in-kernel accumulation of shifted 1x1 GEMM "taps"
# (input already conv-padded; stride folded away by space-to-depth)
# ---------------------------------------------------------------------------
def _taps_kernel(xm_ref, xh_ref, w_ref, b_ref, o_ref, xbuf, acc_ref, *, Kq, Wq):
    # xm_ref: (1, tho*Wq, Cq) bf16  rows of this tile
    # xh_ref: (1, (Kq-1)*Wq, Cq)    halo rows just below the tile
    # w_ref : (Kq*Kq, Cq, Cout) bf16 (BN scale pre-folded)
    # b_ref : (1, Cout) f32
    # o_ref : (1, tho*Wq, Cout)
    # xbuf  : VMEM (tho*Wq + (Kq-1)*Wq + tail, Cq) bf16
    # acc_ref: VMEM (tho*Wq, Cout) f32
    nb = o_ref.shape[1]
    hb = (Kq - 1) * Wq
    Cq = xbuf.shape[1]
    tail = xbuf.shape[0] - nb - hb

    xbuf[pl.ds(0, nb), :] = xm_ref[0]
    xbuf[pl.ds(nb, hb), :] = xh_ref[0]
    xbuf[pl.ds(nb + hb, tail), :] = jnp.zeros((tail, Cq), xbuf.dtype)

    first = True
    for dh in range(Kq):
        for dw in range(Kq):
            lhs = xbuf[pl.ds(dh * Wq + dw, nb), :]
            contrib = jnp.dot(lhs, w_ref[dh * Kq + dw],
                              preferred_element_type=jnp.float32)
            if first:
                acc_ref[...] = contrib
                first = False
            else:
                acc_ref[...] += contrib

    y = acc_ref[...] + b_ref[...]
    hs = jnp.clip(y + 3.0, 0.0, 6.0) * (1.0 / 6.0)
    o_ref[0] = (y * hs).astype(o_ref.dtype)


def _taps_call(xq, wq, bias2, Kq, Ho, Wo, out_dtype, tile_h):
    # xq: (N, Hq, Wq0, Cq) bf16 conv-padded (and space-to-depth'd for stride 2)
    N, Hq, Wq0, Cq = xq.shape
    Cout = wq.shape[-1]
    budget, limit = _vmem_caps()
    osz = jnp.dtype(out_dtype).itemsize

    Wq = _round_up(Wq0, 8)          # flattened row blocks stay 8-aligned
    align = Kq - 1                  # halo block granularity must divide tho

    def need(t):
        nb = t * Wq
        return (nb * (4 * Cq + 2 * Cout * osz + 2 * Cq + 4 * Cout + 4 * Cq)
                + 4 * Kq * Kq * Cq * Cout + 4 * align * Wq * Cq)

    tho = Ho if tile_h is None else max(1, min(tile_h, Ho))
    tho = max(align, _round_up(tho, align))
    while tho > align and need(tho) > budget:
        tho = max(align, _round_up(tho // 2, align))

    n_ht = pl.cdiv(Ho, tho)
    Hq_pad = max(Hq, n_ht * tho + Kq - 1)

    xq = jnp.pad(xq, ((0, 0), (0, Hq_pad - Hq), (0, Wq - Wq0), (0, 0)))
    xqf = xq.reshape(N, Hq_pad * Wq, Cq)

    nb = tho * Wq
    hb = align * Wq
    tail = _round_up(max(align, 8), 8)
    grid = (N, n_ht)

    kernel = functools.partial(_taps_kernel, Kq=Kq, Wq=Wq)
    out = pl.pallas_call(
        kernel,
        out_shape=jax.ShapeDtypeStruct((N, n_ht * tho * Wq, Cout), out_dtype),
        grid_spec=pltpu.PrefetchScalarGridSpec(
            num_scalar_prefetch=0,
            grid=grid,
            in_specs=[
                # main rows of this output tile
                pl.BlockSpec((1, nb, Cq), lambda n, i: (n, i, 0)),
                # (Kq-1)-row halo just below the tile (same array, tiny block)
                pl.BlockSpec((1, hb, Cq),
                             lambda n, i: (n, (i + 1) * (tho // align), 0)),
                pl.BlockSpec((Kq * Kq, Cq, Cout), lambda n, i: (0, 0, 0)),
                pl.BlockSpec((1, Cout), lambda n, i: (0, 0)),
            ],
            out_specs=pl.BlockSpec((1, nb, Cout), lambda n, i: (n, i, 0)),
            scratch_shapes=[
                pltpu.VMEM((nb + hb + tail, Cq), jnp.bfloat16),
                pltpu.VMEM((nb, Cout), jnp.float32),
            ],
        ),
        compiler_params=pltpu.CompilerParams(
            dimension_semantics=("parallel", "parallel"),
            vmem_limit_bytes=limit),
    )(xqf, xqf, wq, bias2)

    out = out.reshape(N, n_ht * tho, Wq, Cout)[:, :Ho, :Wo, :]
    return out


# ---------------------------------------------------------------------------
# Host-side glue
# ---------------------------------------------------------------------------
def _space_to_depth(xp, s):
    if s == 1:
        return xp
    N, Hp, Wp, C = xp.shape
    Hq, Wq = -(-Hp // s), -(-Wp // s)
    xp = jnp.pad(xp, ((0, 0), (0, s * Hq - Hp), (0, s * Wq - Wp), (0, 0)))
    xp = xp.reshape(N, Hq, s, Wq, s, C).transpose(0, 1, 3, 2, 4, 5)
    return xp.reshape(N, Hq, Wq, s * s * C)


def conv_bn_act_nhwc(x_nhwc, weight, gamma, beta, running_mean, running_var, *,
                     kernel_size, stride, eps=BN_EPS_DEFAULT, out_dtype=None,
                     tile_m=1024, tile_h=None):
    """ConvBnAct forward on an NHWC input; returns NHWC output."""
    N, H, W, Cin = x_nhwc.shape
    Cout, Cin_w, K, K2 = weight.shape
    assert K == kernel_size and K2 == kernel_size
    assert Cin_w == Cin, "grouped/depthwise conv not supported"  # TODO(synk)
    assert stride in (1, 2)
    s = stride
    p = get_padding(K, s)
    Ho = (H + 2 * p - K) // s + 1
    Wo = (W + 2 * p - K) // s + 1
    if out_dtype is None:
        out_dtype = x_nhwc.dtype

    xb = x_nhwc.astype(jnp.bfloat16)

    # Eval-mode BN folded: scale into the weight (f32 math, bf16 cast), bias kept.
    scale = gamma.astype(jnp.float32) / jnp.sqrt(
        running_var.astype(jnp.float32) + eps)                        # (Cout,)
    bias = beta.astype(jnp.float32) - running_mean.astype(jnp.float32) * scale
    bias2 = bias.reshape(1, Cout)
    w_f = weight.astype(jnp.float32) * scale[:, None, None, None]     # (O,I,K,K)

    if K == 1:
        # Pointwise fast path: no padding; stride handled by slicing.
        xs = xb[:, ::s, ::s, :]
        patches = xs.reshape(N * Ho * Wo, Cin)
        w_mat = jnp.transpose(w_f[:, :, 0, 0]).astype(jnp.bfloat16)   # (Cin,Cout)
        out = _pointwise_call(patches, w_mat, bias2, out_dtype, tile_m)
        return out.reshape(N, Ho, Wo, Cout)

    # K > 1: pad, fold the stride via space-to-depth, then run the in-kernel
    # tap-accumulation conv (stride-1, Kq x Kq taps over Cq = s*s*Cin channels).
    xp = jnp.pad(xb, ((0, 0), (p, p), (p, p), (0, 0)))
    Kq = -(-K // s)
    Cq = s * s * Cin
    xq = _space_to_depth(xp, s)                                       # (N,Hq,Wq0,Cq)

    taps = []
    for dh in range(Kq):
        for dw in range(Kq):
            subs = []
            for ph in range(s):
                for pw in range(s):
                    kh, kw = s * dh + ph, s * dw + pw
                    if kh < K and kw < K:
                        subs.append(jnp.transpose(w_f[:, :, kh, kw]))  # (Cin,Cout)
                    else:
                        subs.append(jnp.zeros((Cin, Cout), jnp.float32))
            taps.append(jnp.concatenate(subs, axis=0))                 # (Cq,Cout)
    wq = jnp.stack(taps, axis=0).astype(jnp.bfloat16)                  # (Kq^2,Cq,Cout)

    if Kq == 1:
        # K <= stride degenerates to a pointwise conv over the s2d input.
        patches = xq[:, :Ho, :Wo, :].reshape(N * Ho * Wo, Cq)
        out = _pointwise_call(patches, wq[0], bias2, out_dtype, tile_m)
        return out.reshape(N, Ho, Wo, Cout)

    return _taps_call(xq, wq, bias2, Kq, Ho, Wo, out_dtype, tile_h)


@functools.partial(
    jax.jit, static_argnames=("kernel_size", "stride", "eps", "tile_m", "tile_h"))
def conv_bn_act(x_nchw, weight, gamma, beta, running_mean, running_var, *,
                kernel_size, stride, eps=BN_EPS_DEFAULT, tile_m=1024, tile_h=None):
    """ConvBnAct forward. x: NCHW. weight: (Cout, Cin, K, K). Returns NCHW."""
    # bf16 cast BEFORE the layout transpose halves the glue bytes moved.
    x_nhwc = jnp.transpose(x_nchw.astype(jnp.bfloat16), (0, 2, 3, 1))
    out = conv_bn_act_nhwc(x_nhwc, weight, gamma, beta, running_mean,
                           running_var, kernel_size=kernel_size, stride=stride,
                           eps=eps, out_dtype=x_nchw.dtype,
                           tile_m=tile_m, tile_h=tile_h)
    return jnp.transpose(out, (0, 3, 1, 2))


# ---------------------------------------------------------------------------
# Reference (same bf16-operand / f32-accumulate precision path)
# ---------------------------------------------------------------------------
def conv_bn_act_ref(x, weight, gamma, beta, running_mean, running_var, *,
                    kernel_size, stride, eps=BN_EPS_DEFAULT):
    p = get_padding(kernel_size, stride)
    scale = gamma / jnp.sqrt(running_var + eps)
    bias = beta - running_mean * scale
    w_f = (weight * scale[:, None, None, None]).astype(jnp.bfloat16)
    y = lax.conv_general_dilated(
        x.astype(jnp.bfloat16), w_f,
        window_strides=(stride, stride),
        padding=[(p, p), (p, p)],
        dimension_numbers=("NCHW", "OIHW", "NCHW"),
        preferred_element_type=jnp.float32)
    y = y + bias.reshape(1, -1, 1, 1)
    hs = jnp.clip(y + 3.0, 0.0, 6.0) * (1.0 / 6.0)
    return y * hs


def _run_case(key, N, Cin, H, W, Cout, K, stride, tile_h=None, tile_m=1024):
    k_x, k_w, k_g, k_b, k_m, k_v = jax.random.split(key, 6)
    x = jax.random.normal(k_x, (N, Cin, H, W), dtype=jnp.float32)
    weight = jax.random.normal(k_w, (Cout, Cin, K, K), dtype=jnp.float32) * 0.1
    gamma = jax.random.normal(k_g, (Cout,), dtype=jnp.float32) * 0.1 + 1.0
    beta = jax.random.normal(k_b, (Cout,), dtype=jnp.float32) * 0.1
    running_mean = jax.random.normal(k_m, (Cout,), dtype=jnp.float32) * 0.1
    running_var = jax.random.uniform(k_v, (Cout,), dtype=jnp.float32,
                                     minval=0.5, maxval=1.5)

    out = conv_bn_act(x, weight, gamma, beta, running_mean, running_var,
                      kernel_size=K, stride=stride, tile_h=tile_h, tile_m=tile_m)
    out = jax.block_until_ready(out)

    ref = conv_bn_act_ref(x, weight, gamma, beta, running_mean, running_var,
                          kernel_size=K, stride=stride)
    p = get_padding(K, stride)
    Ho = (H + 2 * p - K) // stride + 1
    Wo = (W + 2 * p - K) // stride + 1
    assert out.shape == (N, Cout, Ho, Wo), out.shape
    err = float(jnp.max(jnp.abs(out - ref)))
    assert jnp.allclose(out, ref, atol=2e-3, rtol=2e-3), err


if __name__ == "__main__":
    key = jax.random.PRNGKey(0)
    ks = jax.random.split(key, 6)

    # 3x3 stride-1 conv (tap-accumulation path, whole-image H tile)
    _run_case(ks[0], N=2, Cin=4, H=16, W=16, Cout=8, K=3, stride=1)
    # 1x1 pointwise conv, stride 2 (fast path)
    _run_case(ks[1], N=2, Cin=4, H=16, W=16, Cout=16, K=1, stride=2)
    # 3x3 stride-2 conv (space-to-depth + tap accumulation), MobileNetV3 stem-like
    _run_case(ks[2], N=2, Cin=4, H=16, W=16, Cout=16, K=3, stride=2)
    # 3x3 stride-1 conv with forced H tiling (exercises the halo block path)
    _run_case(ks[3], N=2, Cin=4, H=16, W=16, Cout=8, K=3, stride=1, tile_h=8)
    # 1x1 stride-1 conv, wider channels
    _run_case(ks[4], N=2, Cin=32, H=8, W=8, Cout=64, K=1, stride=1)
    # 1x1 stride-1 conv with multiple M tiles
    _run_case(ks[5], N=2, Cin=8, H=32, W=32, Cout=16, K=1, stride=1, tile_m=512)

    print("KERNEL_OK")
</pallas_src>

<mosaic_0001>
module attributes {stable_mosaic.version = 11 : i64} {
  func.func @_taps_kernel(%arg0: i32, %arg1: i32, %arg2: memref<1x384x4xbf16, #tpu.memory_space<vmem>>, %arg3: memref<1x48x4xbf16, #tpu.memory_space<vmem>>, %arg4: memref<9x4x8xbf16, #tpu.memory_space<vmem>>, %arg5: memref<1x8xf32, #tpu.memory_space<vmem>>, %arg6: memref<1x384x8xf32, #tpu.memory_space<vmem>>, %arg7: memref<440x4xbf16, #tpu.memory_space<vmem>>, %arg8: memref<384x8xf32, #tpu.memory_space<vmem>>) attributes {dimension_semantics = [#tpu.dimension_semantics<parallel>, #tpu.dimension_semantics<parallel>], iteration_bounds = array<i64: 2, 1>, scalar_prefetch = 0 : i64, scratch_operands = 2 : i64, tpu.core_type = #tpu.core_type<tc>, window_params = [{transform_indices = @transform_0, window_bounds = array<i64: 1, 384, 4>}, {transform_indices = @transform_1, window_bounds = array<i64: 1, 48, 4>}, {pipeline_mode = #tpu.pipeline_mode<synchronous>, transform_indices = @transform_2, window_bounds = array<i64: 9, 4, 8>}, {pipeline_mode = #tpu.pipeline_mode<synchronous>, transform_indices = @transform_3, window_bounds = array<i64: 1, 8>}, {transform_indices = @transform_4, window_bounds = array<i64: 1, 384, 8>}]} {
    %c0 = arith.constant 0 : index
    %c0_0 = arith.constant 0 : index
    %c0_1 = arith.constant 0 : index
    %0 = vector.load %arg2[%c0, %c0_0, %c0_1] : memref<1x384x4xbf16, #tpu.memory_space<vmem>>, vector<1x384x4xbf16>
    %1 = vector.shape_cast %0 : vector<1x384x4xbf16> to vector<384x4xbf16>
    %c0_2 = arith.constant 0 : index
    %c0_3 = arith.constant 0 : index
    %2 = vector.load %arg7[%c0_2, %c0_3] : memref<440x4xbf16, #tpu.memory_space<vmem>>, vector<384x4xbf16>
    tpu.vector_store %arg7[%c0_2, %c0_3], %1 {strides = array<i32>} : memref<440x4xbf16, #tpu.memory_space<vmem>>, vector<384x4xbf16>,
    %c0_4 = arith.constant 0 : index
    %c0_5 = arith.constant 0 : index
    %c0_6 = arith.constant 0 : index
    %3 = vector.load %arg3[%c0_4, %c0_5, %c0_6] : memref<1x48x4xbf16, #tpu.memory_space<vmem>>, vector<1x48x4xbf16>
    %4 = vector.shape_cast %3 : vector<1x48x4xbf16> to vector<48x4xbf16>
    %c384 = arith.constant 384 : index
    %c0_7 = arith.constant 0 : index
    %5 = vector.load %arg7[%c384, %c0_7] : memref<440x4xbf16, #tpu.memory_space<vmem>>, vector<48x4xbf16>
    tpu.vector_store %arg7[%c384, %c0_7], %4 {strides = array<i32>} : memref<440x4xbf16, #tpu.memory_space<vmem>>, vector<48x4xbf16>,
    %cst = arith.constant 0.000000e+00 : bf16
    %6 = vector.broadcast %cst : bf16 to vector<8x4xbf16>
    %c432 = arith.constant 432 : index
    %c0_8 = arith.constant 0 : index
    %7 = vector.load %arg7[%c432, %c0_8] : memref<440x4xbf16, #tpu.memory_space<vmem>>, vector<8x4xbf16>
    tpu.vector_store %arg7[%c432, %c0_8], %6 {strides = array<i32>} : memref<440x4xbf16, #tpu.memory_space<vmem>>, vector<8x4xbf16>,
    %c0_9 = arith.constant 0 : index
    %c0_10 = arith.constant 0 : index
    %8 = vector.load %arg7[%c0_9, %c0_10] : memref<440x4xbf16, #tpu.memory_space<vmem>>, vector<384x4xbf16>
    %c0_11 = arith.constant 0 : index
    %c0_12 = arith.constant 0 : index
    %c0_13 = arith.constant 0 : index
    %9 = vector.load %arg4[%c0_11, %c0_12, %c0_13] : memref<9x4x8xbf16, #tpu.memory_space<vmem>>, vector<1x4x8xbf16>
    %10 = vector.shape_cast %9 : vector<1x4x8xbf16> to vector<4x8xbf16>
    %cst_14 = arith.constant dense<0.000000e+00> : vector<384x8xf32>
    %11 = tpu.matmul %8, %10, %cst_14 {dimension_numbers = #tpu.dot_dimension_numbers<[1], [0], [0], [1], [0, 0, 1, 1], [], []>} : vector<384x4xbf16>, vector<4x8xbf16>, vector<384x8xf32> -> vector<384x8xf32>
    %c0_15 = arith.constant 0 : index
    %c0_16 = arith.constant 0 : index
    %12 = vector.load %arg8[%c0_15, %c0_16] : memref<384x8xf32, #tpu.memory_space<vmem>>, vector<384x8xf32>
    tpu.vector_store %arg8[%c0_15, %c0_16], %11 {strides = array<i32>} : memref<384x8xf32, #tpu.memory_space<vmem>>, vector<384x8xf32>,
    %c1 = arith.constant 1 : index
    %c0_17 = arith.constant 0 : index
    %13 = vector.load %arg7[%c1, %c0_17] : memref<440x4xbf16, #tpu.memory_space<vmem>>, vector<384x4xbf16>
    %c1_18 = arith.constant 1 : index
    %c0_19 = arith.constant 0 : index
    %c0_20 = arith.constant 0 : index
    %14 = vector.load %arg4[%c1_18, %c0_19, %c0_20] : memref<9x4x8xbf16, #tpu.memory_space<vmem>>, vector<1x4x8xbf16>
    %15 = vector.shape_cast %14 : vector<1x4x8xbf16> to vector<4x8xbf16>
    %cst_21 = arith.constant dense<0.000000e+00> : vector<384x8xf32>
    %16 = tpu.matmul %13, %15, %cst_21 {dimension_numbers = #tpu.dot_dimension_numbers<[1], [0], [0], [1], [0, 0, 1, 1], [], []>} : vector<384x4xbf16>, vector<4x8xbf16>, vector<384x8xf32> -> vector<384x8xf32>
    %c0_22 = arith.constant 0 : index
    %c0_23 = arith.constant 0 : index
    %17 = vector.load %arg8[%c0_22, %c0_23] : memref<384x8xf32, #tpu.memory_space<vmem>>, vector<384x8xf32>
    %18 = arith.addf %17, %16 : vector<384x8xf32>
    %c0_24 = arith.constant 0 : index
    %c0_25 = arith.constant 0 : index
    %19 = vector.load %arg8[%c0_24, %c0_25] : memref<384x8xf32, #tpu.memory_space<vmem>>, vector<384x8xf32>
    tpu.vector_store %arg8[%c0_24, %c0_25], %18 {strides = array<i32>} : memref<384x8xf32, #tpu.memory_space<vmem>>, vector<384x8xf32>,
    %c2 = arith.constant 2 : index
    %c0_26 = arith.constant 0 : index
    %20 = vector.load %arg7[%c2, %c0_26] : memref<440x4xbf16, #tpu.memory_space<vmem>>, vector<384x4xbf16>
    %c2_27 = arith.constant 2 : index
    %c0_28 = arith.constant 0 : index
    %c0_29 = arith.constant 0 : index
    %21 = vector.load %arg4[%c2_27, %c0_28, %c0_29] : memref<9x4x8xbf16, #tpu.memory_space<vmem>>, vector<1x4x8xbf16>
    %22 = vector.shape_cast %21 : vector<1x4x8xbf16> to vector<4x8xbf16>
    %cst_30 = arith.constant dense<0.000000e+00> : vector<384x8xf32>
    %23 = tpu.matmul %20, %22, %cst_30 {dimension_numbers = #tpu.dot_dimension_numbers<[1], [0], [0], [1], [0, 0, 1, 1], [], []>} : vector<384x4xbf16>, vector<4x8xbf16>, vector<384x8xf32> -> vector<384x8xf32>
    %c0_31 = arith.constant 0 : index
    %c0_32 = arith.constant 0 : index
    %24 = vector.load %arg8[%c0_31, %c0_32] : memref<384x8xf32, #tpu.memory_space<vmem>>, vector<384x8xf32>
    %25 = arith.addf %24, %23 : vector<384x8xf32>
    %c0_33 = arith.constant 0 : index
    %c0_34 = arith.constant 0 : index
    %26 = vector.load %arg8[%c0_33, %c0_34] : memref<384x8xf32, #tpu.memory_space<vmem>>, vector<384x8xf32>
    tpu.vector_store %arg8[%c0_33, %c0_34], %25 {strides = array<i32>} : memref<384x8xf32, #tpu.memory_space<vmem>>, vector<384x8xf32>,
    %c24 = arith.constant 24 : index
    %c0_35 = arith.constant 0 : index
    %27 = vector.load %arg7[%c24, %c0_35] : memref<440x4xbf16, #tpu.memory_space<vmem>>, vector<384x4xbf16>
    %c3 = arith.constant 3 : index
    %c0_36 = arith.constant 0 : index
    %c0_37 = arith.constant 0 : index
    %28 = vector.load %arg4[%c3, %c0_36, %c0_37] : memref<9x4x8xbf16, #tpu.memory_space<vmem>>, vector<1x4x8xbf16>
    %29 = vector.shape_cast %28 : vector<1x4x8xbf16> to vector<4x8xbf16>
    %cst_38 = arith.constant dense<0.000000e+00> : vector<384x8xf32>
    %30 = tpu.matmul %27, %29, %cst_38 {dimension_numbers = #tpu.dot_dimension_numbers<[1], [0], [0], [1], [0, 0, 1, 1], [], []>} : vector<384x4xbf16>, vector<4x8xbf16>, vector<384x8xf32> -> vector<384x8xf32>
    %c0_39 = arith.constant 0 : index
    %c0_40 = arith.constant 0 : index
    %31 = vector.load %arg8[%c0_39, %c0_40] : memref<384x8xf32, #tpu.memory_space<vmem>>, vector<384x8xf32>
    %32 = arith.addf %31, %30 : vector<384x8xf32>
    %c0_41 = arith.constant 0 : index
    %c0_42 = arith.constant 0 : index
    %33 = vector.load %arg8[%c0_41, %c0_42] : memref<384x8xf32, #tpu.memory_space<vmem>>, vector<384x8xf32>
    tpu.vector_store %arg8[%c0_41, %c0_42], %32 {strides = array<i32>} : memref<384x8xf32, #tpu.memory_space<vmem>>, vector<384x8xf32>,
    %c25 = arith.constant 25 : index
    %c0_43 = arith.constant 0 : index
    %34 = vector.load %arg7[%c25, %c0_43] : memref<440x4xbf16, #tpu.memory_space<vmem>>, vector<384x4xbf16>
    %c4 = arith.constant 4 : index
    %c0_44 = arith.constant 0 : index
    %c0_45 = arith.constant 0 : index
    %35 = vector.load %arg4[%c4, %c0_44, %c0_45] : memref<9x4x8xbf16, #tpu.memory_space<vmem>>, vector<1x4x8xbf16>
    %36 = vector.shape_cast %35 : vector<1x4x8xbf16> to vector<4x8xbf16>
    %cst_46 = arith.constant dense<0.000000e+00> : vector<384x8xf32>
    %37 = tpu.matmul %34, %36, %cst_46 {dimension_numbers = #tpu.dot_dimension_numbers<[1], [0], [0], [1], [0, 0, 1, 1], [], []>} : vector<384x4xbf16>, vector<4x8xbf16>, vector<384x8xf32> -> vector<384x8xf32>
    %c0_47 = arith.constant 0 : index
    %c0_48 = arith.constant 0 : index
    %38 = vector.load %arg8[%c0_47, %c0_48] : memref<384x8xf32, #tpu.memory_space<vmem>>, vector<384x8xf32>
    %39 = arith.addf %38, %37 : vector<384x8xf32>
    %c0_49 = arith.constant 0 : index
    %c0_50 = arith.constant 0 : index
    %40 = vector.load %arg8[%c0_49, %c0_50] : memref<384x8xf32, #tpu.memory_space<vmem>>, vector<384x8xf32>
    tpu.vector_store %arg8[%c0_49, %c0_50], %39 {strides = array<i32>} : memref<384x8xf32, #tpu.memory_space<vmem>>, vector<384x8xf32>,
    %c26 = arith.constant 26 : index
    %c0_51 = arith.constant 0 : index
    %41 = vector.load %arg7[%c26, %c0_51] : memref<440x4xbf16, #tpu.memory_space<vmem>>, vector<384x4xbf16>
    %c5 = arith.constant 5 : index
    %c0_52 = arith.constant 0 : index
    %c0_53 = arith.constant 0 : index
    %42 = vector.load %arg4[%c5, %c0_52, %c0_53] : memref<9x4x8xbf16, #tpu.memory_space<vmem>>, vector<1x4x8xbf16>
    %43 = vector.shape_cast %42 : vector<1x4x8xbf16> to vector<4x8xbf16>
    %cst_54 = arith.constant dense<0.000000e+00> : vector<384x8xf32>
    %44 = tpu.matmul %41, %43, %cst_54 {dimension_numbers = #tpu.dot_dimension_numbers<[1], [0], [0], [1], [0, 0, 1, 1], [], []>} : vector<384x4xbf16>, vector<4x8xbf16>, vector<384x8xf32> -> vector<384x8xf32>
    %c0_55 = arith.constant 0 : index
    %c0_56 = arith.constant 0 : index
    %45 = vector.load %arg8[%c0_55, %c0_56] : memref<384x8xf32, #tpu.memory_space<vmem>>, vector<384x8xf32>
    %46 = arith.addf %45, %44 : vector<384x8xf32>
    %c0_57 = arith.constant 0 : index
    %c0_58 = arith.constant 0 : index
    %47 = vector.load %arg8[%c0_57, %c0_58] : memref<384x8xf32, #tpu.memory_space<vmem>>, vector<384x8xf32>
    tpu.vector_store %arg8[%c0_57, %c0_58], %46 {strides = array<i32>} : memref<384x8xf32, #tpu.memory_space<vmem>>, vector<384x8xf32>,
    %c48 = arith.constant 48 : index
    %c0_59 = arith.constant 0 : index
    %48 = vector.load %arg7[%c48, %c0_59] : memref<440x4xbf16, #tpu.memory_space<vmem>>, vector<384x4xbf16>
    %c6 = arith.constant 6 : index
    %c0_60 = arith.constant 0 : index
    %c0_61 = arith.constant 0 : index
    %49 = vector.load %arg4[%c6, %c0_60, %c0_61] : memref<9x4x8xbf16, #tpu.memory_space<vmem>>, vector<1x4x8xbf16>
    %50 = vector.shape_cast %49 : vector<1x4x8xbf16> to vector<4x8xbf16>
    %cst_62 = arith.constant dense<0.000000e+00> : vector<384x8xf32>
    %51 = tpu.matmul %48, %50, %cst_62 {dimension_numbers = #tpu.dot_dimension_numbers<[1], [0], [0], [1], [0, 0, 1, 1], [], []>} : vector<384x4xbf16>, vector<4x8xbf16>, vector<384x8xf32> -> vector<384x8xf32>
    %c0_63 = arith.constant 0 : index
    %c0_64 = arith.constant 0 : index
    %52 = vector.load %arg8[%c0_63, %c0_64] : memref<384x8xf32, #tpu.memory_space<vmem>>, vector<384x8xf32>
    %53 = arith.addf %52, %51 : vector<384x8xf32>
    %c0_65 = arith.constant 0 : index
    %c0_66 = arith.constant 0 : index
    %54 = vector.load %arg8[%c0_65, %c0_66] : memref<384x8xf32, #tpu.memory_space<vmem>>, vector<384x8xf32>
    tpu.vector_store %arg8[%c0_65, %c0_66], %53 {strides = array<i32>} : memref<384x8xf32, #tpu.memory_space<vmem>>, vector<384x8xf32>,
    %c49 = arith.constant 49 : index
    %c0_67 = arith.constant 0 : index
    %55 = vector.load %arg7[%c49, %c0_67] : memref<440x4xbf16, #tpu.memory_space<vmem>>, vector<384x4xbf16>
    %c7 = arith.constant 7 : index
    %c0_68 = arith.constant 0 : index
    %c0_69 = arith.constant 0 : index
    %56 = vector.load %arg4[%c7, %c0_68, %c0_69] : memref<9x4x8xbf16, #tpu.memory_space<vmem>>, vector<1x4x8xbf16>
    %57 = vector.shape_cast %56 : vector<1x4x8xbf16> to vector<4x8xbf16>
    %cst_70 = arith.constant dense<0.000000e+00> : vector<384x8xf32>
    %58 = tpu.matmul %55, %57, %cst_70 {dimension_numbers = #tpu.dot_dimension_numbers<[1], [0], [0], [1], [0, 0, 1, 1], [], []>} : vector<384x4xbf16>, vector<4x8xbf16>, vector<384x8xf32> -> vector<384x8xf32>
    %c0_71 = arith.constant 0 : index
    %c0_72 = arith.constant 0 : index
    %59 = vector.load %arg8[%c0_71, %c0_72] : memref<384x8xf32, #tpu.memory_space<vmem>>, vector<384x8xf32>
    %60 = arith.addf %59, %58 : vector<384x8xf32>
    %c0_73 = arith.constant 0 : index
    %c0_74 = arith.constant 0 : index
    %61 = vector.load %arg8[%c0_73, %c0_74] : memref<384x8xf32, #tpu.memory_space<vmem>>, vector<384x8xf32>
    tpu.vector_store %arg8[%c0_73, %c0_74], %60 {strides = array<i32>} : memref<384x8xf32, #tpu.memory_space<vmem>>, vector<384x8xf32>,
    %c50 = arith.constant 50 : index
    %c0_75 = arith.constant 0 : index
    %62 = vector.load %arg7[%c50, %c0_75] : memref<440x4xbf16, #tpu.memory_space<vmem>>, vector<384x4xbf16>
    %c8 = arith.constant 8 : index
    %c0_76 = arith.constant 0 : index
    %c0_77 = arith.constant 0 : index
    %63 = vector.load %arg4[%c8, %c0_76, %c0_77] : memref<9x4x8xbf16, #tpu.memory_space<vmem>>, vector<1x4x8xbf16>
    %64 = vector.shape_cast %63 : vector<1x4x8xbf16> to vector<4x8xbf16>
    %cst_78 = arith.constant dense<0.000000e+00> : vector<384x8xf32>
    %65 = tpu.matmul %62, %64, %cst_78 {dimension_numbers = #tpu.dot_dimension_numbers<[1], [0], [0], [1], [0, 0, 1, 1], [], []>} : vector<384x4xbf16>, vector<4x8xbf16>, vector<384x8xf32> -> vector<384x8xf32>
    %c0_79 = arith.constant 0 : index
    %c0_80 = arith.constant 0 : index
    %66 = vector.load %arg8[%c0_79, %c0_80] : memref<384x8xf32, #tpu.memory_space<vmem>>, vector<384x8xf32>
    %67 = arith.addf %66, %65 : vector<384x8xf32>
    %c0_81 = arith.constant 0 : index
    %c0_82 = arith.constant 0 : index
    %68 = vector.load %arg8[%c0_81, %c0_82] : memref<384x8xf32, #tpu.memory_space<vmem>>, vector<384x8xf32>
    tpu.vector_store %arg8[%c0_81, %c0_82], %67 {strides = array<i32>} : memref<384x8xf32, #tpu.memory_space<vmem>>, vector<384x8xf32>,
    %c0_83 = arith.constant 0 : index
    %c0_84 = arith.constant 0 : index
    %69 = vector.load %arg8[%c0_83, %c0_84] : memref<384x8xf32, #tpu.memory_space<vmem>>, vector<384x8xf32>
    %c0_85 = arith.constant 0 : index
    %c0_86 = arith.constant 0 : index
    %70 = vector.load %arg5[%c0_85, %c0_86] : memref<1x8xf32, #tpu.memory_space<vmem>>, vector<1x8xf32>
    %71 = vector.broadcast %70 : vector<1x8xf32> to vector<384x8xf32>
    %72 = arith.addf %69, %71 : vector<384x8xf32>
    %cst_87 = arith.constant 3.000000e+00 : f32
    %73 = vector.broadcast %cst_87 : f32 to vector<384x8xf32>
    %74 = arith.addf %72, %73 : vector<384x8xf32>
    %cst_88 = arith.constant 0.000000e+00 : f32
    %cst_89 = arith.constant 6.000000e+00 : f32
    %75 = vector.broadcast %cst_88 : f32 to vector<384x8xf32>
    %76 = arith.maximumf %75, %74 : vector<384x8xf32>
    %77 = vector.broadcast %cst_89 : f32 to vector<384x8xf32>
    %78 = arith.minimumf %77, %76 : vector<384x8xf32>
    %cst_90 = arith.constant 0.166666672 : f32
    %79 = vector.broadcast %cst_90 : f32 to vector<384x8xf32>
    %80 = arith.mulf %78, %79 : vector<384x8xf32>
    %81 = arith.mulf %72, %80 : vector<384x8xf32>
    %c0_91 = arith.constant 0 : index
    %c0_92 = arith.constant 0 : index
    %c0_93 = arith.constant 0 : index
    %82 = vector.load %arg6[%c0_91, %c0_92, %c0_93] : memref<1x384x8xf32, #tpu.memory_space<vmem>>, vector<1x384x8xf32>
    %83 = vector.shape_cast %82 : vector<1x384x8xf32> to vector<384x8xf32>
    %84 = vector.shape_cast %81 : vector<384x8xf32> to vector<1x384x8xf32>
    tpu.vector_store %arg6[%c0_91, %c0_92, %c0_93], %84 {strides = array<i32>} : memref<1x384x8xf32, #tpu.memory_space<vmem>>, vector<1x384x8xf32>,
    return
  }
  func.func @transform_0(%arg0: i32, %arg1: i32) -> (i32, i32, i32) {
    %c0_i32 = arith.constant 0 : i32
    %c0_i32_0 = arith.constant 0 : i32
    return %arg0, %arg1, %c0_i32 : i32, i32, i32
  }
  func.func @transform_1(%arg0: i32, %arg1: i32) -> (i32, i32, i32) {
    %c1_i32 = arith.constant 1 : i32
    %0 = arith.addi %arg1, %c1_i32 : i32
    %c8_i32 = arith.constant 8 : i32
    %1 = arith.muli %0, %c8_i32 : i32
    %c0_i32 = arith.constant 0 : i32
    %c0_i32_0 = arith.constant 0 : i32
    return %arg0, %1, %c0_i32 : i32, i32, i32
  }
  func.func @transform_2(%arg0: i32, %arg1: i32) -> (i32, i32, i32) {
    %c0_i32 = arith.constant 0 : i32
    %c0_i32_0 = arith.constant 0 : i32
    %c0_i32_1 = arith.constant 0 : i32
    %c0_i32_2 = arith.constant 0 : i32
    return %c0_i32, %c0_i32_0, %c0_i32_1 : i32, i32, i32
  }
  func.func @transform_3(%arg0: i32, %arg1: i32) -> (i32, i32) {
    %c0_i32 = arith.constant 0 : i32
    %c0_i32_0 = arith.constant 0 : i32
    %c0_i32_1 = arith.constant 0 : i32
    return %c0_i32, %c0_i32_0 : i32, i32
  }
  func.func @transform_4(%arg0: i32, %arg1: i32) -> (i32, i32, i32) {
    %c0_i32 = arith.constant 0 : i32
    %c0_i32_0 = arith.constant 0 : i32
    return %arg0, %arg1, %c0_i32 : i32, i32, i32
  }
}

</mosaic_0001>

<bundles_post_ra>
// kernel: conv_bn_act.1
= control target key start
LH: loop header
LB: loop body
LE: loop exit
PB: predicated region body
PF: predicated region fallthrough
CT: control target
= control target key end

     0   :  { %s8555_s15 = smov 0   ;;  %s8557_s16 = smov 0   ;;  %s10186_s0 = inlined_call_operand.vmem [shape: bf16[2,432,4], index: 0, kind: input, shape index: {}, may-alias: {0,1}]   ;;  %s10187_s1 = inlined_call_operand.vmem [shape: bf16[2,432,4], index: 1, kind: input, shape index: {}, may-alias: {0,1}]   ;;  %s10188_s2 = inlined_call_operand.vmem [shape: bf16[9,4,8], index: 2, kind: input, shape index: {}]   ;;  %s10189_s3 = inlined_call_operand.vmem [shape: f32[1,8], index: 3, kind: input, shape index: {}]   ;;  %s10190_s4 = inlined_call_operand.vmem [shape: f32[2,384,8], index: 4, kind: output, shape index: {}]  }
   0x1   :  { %s8559_s17 = smov 0  }
   0x2 LB: > { %s26_s18 = sadd.s32 1, %s8523_s16  ;;  %p7111_p0 = scmp.ge.s32.totalorder %s8527_s17, 1  ;;  %s8527_s17 = sphi %s8559_s17, %s14_s17   ;;  %s8523_s16 = sphi %s8557_s16, %s10192_s16   ;;  %s8519_s15 = sphi %s8555_s15, %s10191_s15  }
   0x3   : > { %p28_p1 = scmp.ge.s32.totalorder %s26_s18, 2  ;;  %p216_p2 = scmp.lt.s32.totalorder %s8527_s17, 3 }
   0x5   : > { %s10194_s18 = smov (%p28_p1, %s26_s18), 0  ;;  %p217_p3 = pnand %p7111_p0, %p216_p2 }
   0x6   : > { %p270_p4 = scmp.lt.s32.totalorder (!%p217_p3), %s8519_s15, 1 }
   0x7   : > { %220 = sbr.rel (%p217_p3) target bundleno = 703 (0x2bf), region = 36 }
   0xc   : > { %v466_v0 = vld [vmem:[%s10188_s2] sm:$0x3]  ;;  %vm660_vm0 = vcmask 1041408   ;;  %v8581_v2 = vld [vmem:[%s10188_s2 + $0x2] sm:$0x3]  ;;  %s10196_s15 = smov (!%p270_p4, %s8519_s15), 1 }
   0xd   : > { %8244 = vmatprep.subr.msk.bf16.mxu1 %vm660_vm0, %v466_v0  ;;  %v662_v1 = vsel %vm660_vm0, %v466_v0, 0  ;;  %8243 = vmatprep.subr.msk.bf16.mxu0 %vm660_vm0, %v466_v0  ;;  %v8587_v3 = vld [vmem:[%s10188_s2 + $0x4] sm:$0x3]  ;;  %s8253_s25 = smul.u32 216, %s10196_s15  ;;  %vm356_vm1 = vcmask 27648   ;;  %vm587_vm2 = vcmask 31744  }
   0xe   : > { %8242 = vmatpush3.bf16.msra.mxu1 %v662_v1  ;;  %7792 = vmatpush3.bf16.msra.mxu0 %v662_v1  ;;  %v8654_v29 = vld [vmem:[%s10188_s2 + $0x6] sm:$0x3]  ;;  %v1382_v31 = vsel %vm660_vm0, %v8581_v2, 0  ;;  %v8662_v33 = vld [vmem:[%s10188_s2 + $0x8] sm:$0x3]  ;;  %v2050_v35 = vsel %vm660_vm0, %v8587_v3, 0 }
   0xf   : > { %8245 = vmatprep.subr.msk.bf16.mxu1 %vm660_vm0, %v8581_v2  ;;  %8246 = vmatprep.subr.msk.bf16.mxu0 %vm660_vm0, %v8587_v3  ;;  %s8601_s28 = scalar_lea.vmem %s10186_s0, %s8253_s25  ;;  %vm1112_vm3 = vsmask.f32 7424  ;;  %vm1927_vm4 = vcmask 1046528   ;;  %s7565_s7 = sadd.s32 192, %s8253_s25  ;;  %vm889_vm5 = vcmask 64512  }
  0x10   : > { %v332_v4 = vld [vmem:[%s8601_s28 + $0x60] sm:$0xf]  ;;  %v333_v5 = vld [vmem:[%s8601_s28 + $0x64] sm:$0xf]  ;;  %v334_v6 = vld [vmem:[%s8601_s28 + $0x68] sm:$0xf]  ;;  %s8792_s10 = scalar_lea.vmem %s10187_s1, %s7565_s7 }
  0x11   : > { %381 = vst.msk [vmem:[#allocation2 + $0x60] sm:$0xf] %vm356_vm1, %v332_v4  ;;  %382 = vst.msk [vmem:[#allocation2 + $0x64] sm:$0xf] %vm356_vm1, %v333_v5  ;;  %v335_v7 = vld [vmem:[%s8601_s28 + $0x6c] sm:$0xf] }
  0x12   : > { %383 = vst.msk [vmem:[#allocation2 + $0x68] sm:$0xf] %vm356_vm1, %v334_v6  ;;  %v308_v8 = vld [vmem:[%s8601_s28] sm:$0xf]  ;;  %v309_v9 = vld [vmem:[%s8601_s28 + $0x4] sm:$0xf] }
  0x13   : > { %384 = vst.msk [vmem:[#allocation2 + $0x6c] sm:$0xf] %vm356_vm1, %v335_v7  ;;  %357 = vst.msk [vmem:[#allocation2] sm:$0xf] %vm356_vm1, %v308_v8  ;;  %v310_v10 = vld [vmem:[%s8601_s28 + $0x8] sm:$0xf] }
  0x14   : > { %358 = vst.msk [vmem:[#allocation2 + $0x4] sm:$0xf] %vm356_vm1, %v309_v9  ;;  %v311_v11 = vld [vmem:[%s8601_s28 + $0xc] sm:$0xf]  ;;  %v336_v12 = vld [vmem:[%s8601_s28 + $0x70] sm:$0xf] }
  0x15   : > { %359 = vst.msk [vmem:[#allocation2 + $0x8] sm:$0xf] %vm356_vm1, %v310_v10  ;;  %360 = vst.msk [vmem:[#allocation2 + $0xc] sm:$0xf] %vm356_vm1, %v311_v11  ;;  %v337_v13 = vld [vmem:[%s8601_s28 + $0x74] sm:$0xf] }
  0x16   : > { %385 = vst.msk [vmem:[#allocation2 + $0x70] sm:$0xf] %vm356_vm1, %v336_v12  ;;  %v338_v14 = vld [vmem:[%s8601_s28 + $0x78] sm:$0xf]  ;;  %v339_v15 = vld [vmem:[%s8601_s28 + $0x7c] sm:$0xf] }
  0x17   : > { %386 = vst.msk [vmem:[#allocation2 + $0x74] sm:$0xf] %vm356_vm1, %v337_v13  ;;  %387 = vst.msk [vmem:[#allocation2 + $0x78] sm:$0xf] %vm356_vm1, %v338_v14  ;;  %v312_v16 = vld [vmem:[%s8601_s28 + $0x10] sm:$0xf] }
  0x18   : > { %388 = vst.msk [vmem:[#allocation2 + $0x7c] sm:$0xf] %vm356_vm1, %v339_v15  ;;  %v313_v17 = vld [vmem:[%s8601_s28 + $0x14] sm:$0xf]  ;;  %v314_v18 = vld [vmem:[%s8601_s28 + $0x18] sm:$0xf] }
  0x19   : > { %361 = vst.msk [vmem:[#allocation2 + $0x10] sm:$0xf] %vm356_vm1, %v312_v16  ;;  %362 = vst.msk [vmem:[#allocation2 + $0x14] sm:$0xf] %vm356_vm1, %v313_v17  ;;  %v315_v19 = vld [vmem:[%s8601_s28 + $0x1c] sm:$0xf] }
  0x1a   : > { %363 = vst.msk [vmem:[#allocation2 + $0x18] sm:$0xf] %vm356_vm1, %v314_v18  ;;  %v340_v20 = vld [vmem:[%s8601_s28 + $0x80] sm:$0xf]  ;;  %v341_v21 = vld [vmem:[%s8601_s28 + $0x84] sm:$0xf] }
  0x1b   : > { %364 = vst.msk [vmem:[#allocation2 + $0x1c] sm:$0xf] %vm356_vm1, %v315_v19  ;;  %389 = vst.msk [vmem:[#allocation2 + $0x80] sm:$0xf] %vm356_vm1, %v340_v20  ;;  %v342_v22 = vld [vmem:[%s8601_s28 + $0x88] sm:$0xf] }
  0x1c   : > { %390 = vst.msk [vmem:[#allocation2 + $0x84] sm:$0xf] %vm356_vm1, %v341_v21  ;;  %v343_v23 = vld [vmem:[%s8601_s28 + $0x8c] sm:$0xf]  ;;  %v316_v24 = vld [vmem:[%s8601_s28 + $0x20] sm:$0xf] }
  0x1d   : > { %391 = vst.msk [vmem:[#allocation2 + $0x88] sm:$0xf] %vm356_vm1, %v342_v22  ;;  %392 = vst.msk [vmem:[#allocation2 + $0x8c] sm:$0xf] %vm356_vm1, %v343_v23  ;;  %v317_v25 = vld [vmem:[%s8601_s28 + $0x24] sm:$0xf] }
  0x1e   : > { %365 = vst.msk [vmem:[#allocation2 + $0x20] sm:$0xf] %vm356_vm1, %v316_v24  ;;  %v318_v26 = vld [vmem:[%s8601_s28 + $0x28] sm:$0xf]  ;;  %v319_v27 = vld [vmem:[%s8601_s28 + $0x2c] sm:$0xf] }
  0x1f   : > { %v8282_v28 = vld [vmem:[#allocation2 + $0x60] sm:$0xff]   ;;  %366 = vst.msk [vmem:[#allocation2 + $0x24] sm:$0xf] %vm356_vm1, %v317_v25  ;;  %367 = vst.msk [vmem:[#allocation2 + $0x28] sm:$0xf] %vm356_vm1, %v318_v26  ;;  %v8283_v30 = vld [vmem:[#allocation2 + $0x68] sm:$0xff]  }
  0x20   : > { %368 = vst.msk [vmem:[#allocation2 + $0x2c] sm:$0xf] %vm356_vm1, %v319_v27  ;;  %7817 = vmatprep.mubr.msk.bf16.mxu1 %vm587_vm2, %v8282_v28  ;;  %v8284_v32 = vld [vmem:[#allocation2] sm:$0xff]   ;;  %v8285_v34 = vld [vmem:[#allocation2 + $0x8] sm:$0xff]   ;;  %v8286_v36 = vld [vmem:[#allocation2 + $0x70] sm:$0xff]   ;;  %s8255_s25 = smul.u32 384, %s10196_s15 }
  0x21   : > { %7818 = vmatmul.mubr.msk.bf16.vlgmr.msra.gmra.mxu1 %vm587_vm2, %v8283_v30  ;;  %7793 = vmatprep.mubr.msk.bf16.mxu0 %vm587_vm2, %v8284_v32  ;;  %v8288_v37 = vld [vmem:[#allocation2 + $0x10] sm:$0xff]   ;;  %v8287_v38 = vld [vmem:[#allocation2 + $0x78] sm:$0xff]   ;;  %v348_v51 = vld [vmem:[%s8601_s28 + $0xa0] sm:$0xf] }
  0x22   : > { %7842 = vmatpush3.bf16.msra.mxu1 %v1382_v31  ;;  %7794 = vmatmul.mubr.msk.bf16.vlgmr.msra.gmra.mxu0 %vm587_vm2, %v8285_v34  ;;  %v8289_v40 = vld [vmem:[#allocation2 + $0x18] sm:$0xff]   ;;  %v344_v42 = vld [vmem:[%s8601_s28 + $0x90] sm:$0xf]  ;;  %v345_v43 = vld [vmem:[%s8601_s28 + $0x94] sm:$0xf]  ;;  %s9770_s27 = scalar_lea.vmem %s10190_s4, %s8255_s25 }
  0x23   : > { %8247 = vmatprep.subr.msk.bf16.mxu1 %vm660_vm0, %v8654_v29  ;;  %7821 = vmatprep.mubr.msk.bf16.mxu1 %vm587_vm2, %v8286_v36  ;;  %v8290_v39 = vld [vmem:[#allocation2 + $0x80] sm:$0xff]   ;;  %v346_v44 = vld [vmem:[%s8601_s28 + $0x98] sm:$0xf]  ;;  %393 = vst.msk [vmem:[#allocation2 + $0x90] sm:$0xf] %vm356_vm1, %v344_v42  ;;  %v8307_v15 = vld [vmem:[#allocation2 + $0x8] sm:$0xff]  }
  0x24   : > { %7892 = vmatpush3.bf16.msra.mxu0 %v2050_v35  ;;  %7797 = vmatprep.mubr.msk.bf16.mxu0 %vm587_vm2, %v8288_v37  ;;  %v8291_v45 = vld [vmem:[#allocation2 + $0x88] sm:$0xff]   ;;  %394 = vst.msk [vmem:[#allocation2 + $0x94] sm:$0xf] %vm356_vm1, %v345_v43  ;;  %v347_v46 = vld [vmem:[%s8601_s28 + $0x9c] sm:$0xf]  ;;  %v8306_v14 = vld [vmem:[#allocation2] sm:$0xff]  }
  0x25   : > { %8248 = vmatprep.subr.msk.bf16.mxu0 %vm660_vm0, %v8662_v33  ;;  %395 = vst.msk [vmem:[#allocation2 + $0x98] sm:$0xf] %vm356_vm1, %v346_v44  ;;  %v320_v47 = vld [vmem:[%s8601_s28 + $0x30] sm:$0xf]  ;;  %v321_v48 = vld [vmem:[%s8601_s28 + $0x34] sm:$0xf] }
  0x26   : > { %v8292_v41 = vld [vmem:[#allocation2 + $0x20] sm:$0xff]   ;;  %396 = vst.msk [vmem:[#allocation2 + $0x9c] sm:$0xf] %vm356_vm1, %v347_v46  ;;  %369 = vst.msk [vmem:[#allocation2 + $0x30] sm:$0xf] %vm356_vm1, %v320_v47  ;;  %v8308_v16 = vld [vmem:[#allocation2 + $0x10] sm:$0xff]  }
  0x27   : > { %370 = vst.msk [vmem:[#allocation2 + $0x34] sm:$0xf] %vm356_vm1, %v321_v48  ;;  %v322_v49 = vld [vmem:[%s8601_s28 + $0x38] sm:$0xf]  ;;  %v323_v50 = vld [vmem:[%s8601_s28 + $0x3c] sm:$0xf] }
  0x28   : > { %v8293_v52 = vld [vmem:[#allocation2 + $0x28] sm:$0xff]   ;;  %371 = vst.msk [vmem:[#allocation2 + $0x38] sm:$0xf] %vm356_vm1, %v322_v49  ;;  %372 = vst.msk [vmem:[#allocation2 + $0x3c] sm:$0xf] %vm356_vm1, %v323_v50  ;;  %v1114_v17 = vshrl.u32 %v8306_v14, 16 }
  0x29   : > { %7822 = vmatmul.mubr.msk.bf16.gmra.mxu1 %vm587_vm2, %v8287_v38  ;;  %v349_v53 = vld [vmem:[%s8601_s28 + $0xa4] sm:$0xf]  ;;  %397 = vst.msk [vmem:[#allocation2 + $0xa0] sm:$0xf] %vm356_vm1, %v348_v51  ;;  %v350_v54 = vld [vmem:[%s8601_s28 + $0xa8] sm:$0xf] }
  0x2a   : > { %7825 = vmatprep.mubr.msk.bf16.mxu1 %vm587_vm2, %v8290_v39  ;;  %7798 = vmatmul.mubr.msk.bf16.gmra.mxu0 %vm587_vm2, %v8289_v40  ;;  %v351_v55 = vld [vmem:[%s8601_s28 + $0xac] sm:$0xf]  ;;  %398 = vst.msk [vmem:[#allocation2 + $0xa4] sm:$0xf] %vm356_vm1, %v349_v53  ;;  %399 = vst.msk [vmem:[#allocation2 + $0xa8] sm:$0xf] %vm356_vm1, %v350_v54 }
  0x2b   : > { %7801 = vmatprep.mubr.msk.bf16.mxu0 %vm587_vm2, %v8292_v41  ;;  %400 = vst.msk [vmem:[#allocation2 + $0xac] sm:$0xf] %vm356_vm1, %v351_v55  ;;  %v324_v56 = vld [vmem:[%s8601_s28 + $0x40] sm:$0xf]  ;;  %v325_v57 = vld [vmem:[%s8601_s28 + $0x44] sm:$0xf] }
  0x2c   : > { %v326_v58 = vld [vmem:[%s8601_s28 + $0x48] sm:$0xf]  ;;  %373 = vst.msk [vmem:[#allocation2 + $0x40] sm:$0xf] %vm356_vm1, %v324_v56  ;;  %374 = vst.msk [vmem:[#allocation2 + $0x44] sm:$0xf] %vm356_vm1, %v325_v57 }
  0x2d   : > { %v327_v59 = vld [vmem:[%s8601_s28 + $0x4c] sm:$0xf]  ;;  %375 = vst.msk [vmem:[#allocation2 + $0x48] sm:$0xf] %vm356_vm1, %v326_v58  ;;  %v352_v60 = vld [vmem:[%s8601_s28 + $0xb0] sm:$0xf] }
  0x2e   : > { %v353_v61 = vld [vmem:[%s8601_s28 + $0xb4] sm:$0xf]  ;;  %376 = vst.msk [vmem:[#allocation2 + $0x4c] sm:$0xf] %vm356_vm1, %v327_v59  ;;  %401 = vst.msk [vmem:[#allocation2 + $0xb0] sm:$0xf] %vm356_vm1, %v352_v60 }
  0x2f   : > { %402 = vst.msk [vmem:[#allocation2 + $0xb4] sm:$0xf] %vm356_vm1, %v353_v61  ;;  %v354_v62 = vld [vmem:[%s8601_s28 + $0xb8] sm:$0xf]  ;;  %v355_v63 = vld [vmem:[%s8601_s28 + $0xbc] sm:$0xf] }
  0x30   : > { %v328_v0 = vld [vmem:[%s8601_s28 + $0x50] sm:$0xf]  ;;  %403 = vst.msk [vmem:[#allocation2 + $0xb8] sm:$0xf] %vm356_vm1, %v354_v62  ;;  %404 = vst.msk [vmem:[#allocation2 + $0xbc] sm:$0xf] %vm356_vm1, %v355_v63 }
  0x31   : > { %7826 = vmatmul.mubr.msk.bf16.gmra.mxu1 %vm587_vm2, %v8291_v45  ;;  %v329_v1 = vld [vmem:[%s8601_s28 + $0x54] sm:$0xf]  ;;  %377 = vst.msk [vmem:[#allocation2 + $0x50] sm:$0xf] %vm356_vm1, %v328_v0  ;;  %v330_v2 = vld [vmem:[%s8601_s28 + $0x58] sm:$0xf] }
  0x32   : > { %v331_v3 = vld [vmem:[%s8601_s28 + $0x5c] sm:$0xf]  ;;  %v8294_v4 = vld [vmem:[#allocation2 + $0x90] sm:$0xff]   ;;  %378 = vst.msk [vmem:[#allocation2 + $0x54] sm:$0xf] %vm356_vm1, %v329_v1  ;;  %7802 = vmatmul.mubr.msk.bf16.gmra.mxu0 %vm587_vm2, %v8293_v52  ;;  %v8298_v7 = vld [vmem:[#allocation2 + $0xa0] sm:$0xff]  }
  0x33   : > { %379 = vst.msk [vmem:[#allocation2 + $0x58] sm:$0xf] %vm356_vm1, %v330_v2  ;;  %380 = vst.msk [vmem:[#allocation2 + $0x5c] sm:$0xf] %vm356_vm1, %v331_v3  ;;  %7829 = vmatprep.mubr.msk.bf16.mxu1 %vm587_vm2, %v8294_v4  ;;  %v8296_v5 = vld [vmem:[#allocation2 + $0x30] sm:$0xff]   ;;  %v8295_v6 = vld [vmem:[#allocation2 + $0x98] sm:$0xff]  }
  0x34   : > { %7805 = vmatprep.mubr.msk.bf16.mxu0 %vm587_vm2, %v8296_v5  ;;  %v8297_v8 = vld [vmem:[#allocation2 + $0x38] sm:$0xff]   ;;  %v8300_v9 = vld [vmem:[#allocation2 + $0x40] sm:$0xff]   ;;  %v8299_v10 = vld [vmem:[#allocation2 + $0xa8] sm:$0xff]   ;;  %v1116_v18 = vshll.u32 %v8306_v14, 16  ;;  %v1121_v19 = vshll.u32 %v8307_v15, 16  ;;  %v1129_v25 = vshll.u32 %v8308_v16, 16 }
  0x35   : > { %v8301_v11 = vld [vmem:[#allocation2 + $0x48] sm:$0xff]   ;;  %v8309_v23 = vld [vmem:[#allocation2] sm:$0xfe]   ;;  %v1125_v30 = vshrl.u32 %v8307_v15, 16  ;;  %v8312_v31 = vld [vmem:[#allocation2 + $0x18] sm:$0xff]   ;;  %v1133_v35 = vshrl.u32 %v8308_v16, 16 }
  0x36   : > { %v8302_v12 = vld [vmem:[#allocation2 + $0xb0] sm:$0xff]   ;;  %v8310_v20 = vld [vmem:[#allocation2 + $0x8] sm:$0xff]   ;;  %v1118_v21 = vrot.slane %v1116_v18, 1  ;;  %v1123_v22 = vrot.slane %v1121_v19, 1  ;;  %v1928_v27 = vrot.slane %v8309_v23, 1  ;;  %v1137_v37 = vshll.u32 %v8312_v31, 16 }
  0x37   : > { %v8303_v24 = vld [vmem:[#allocation2 + $0xb8] sm:$0xff]   ;;  %v1929_v28 = vrot.slane %v8310_v20, 1  ;;  %v8311_v36 = vld [vmem:[#allocation2 + $0x10] sm:$0xff]   ;;  %v8313_v38 = vld [vmem:[#allocation2 + $0x20] sm:$0xff]   ;;  %v1131_v39 = vrot.slane %v1129_v25, 1  ;;  %v2664_v50 = vsel %vm660_vm0, %v8654_v29, 0 }
  0x38   : > { %v1119_v26 = vor.u32 %v1118_v21, %v1114_v17  ;;  %v8314_v41 = vld [vmem:[#allocation2 + $0x18] sm:$0xff]   ;;  %v1127_v42 = vor.u32 %v1125_v30, %v1123_v22  ;;  %v1139_v44 = vrot.slane %v1137_v37, 1  ;;  %v8316_v45 = vld [vmem:[#allocation2 + $0x28] sm:$0xff]   ;;  %v1931_v46 = vrot.slane %v8311_v36, 1  ;;  %v8315_v57 = vld [vmem:[#allocation2 + $0x20] sm:$0xff]  }
  0x39   : > { %7830 = vmatmul.mubr.msk.bf16.gmra.mxu1 %vm587_vm2, %v8295_v6  ;;  %v8304_v13 = vld [vmem:[#allocation2 + $0x50] sm:$0xff]   ;;  %v1930_v40 = vsel %vm1927_vm4, %v1928_v27, %v1929_v28  ;;  %v1135_v43 = vor.u32 %v1133_v35, %v1131_v39  ;;  %v1145_v47 = vshll.u32 %v8313_v38, 16  ;;  %v1933_v48 = vrot.slane %v8314_v41, 1  ;;  %v8318_v61 = vld [vmem:[#allocation2 + $0x28] sm:$0xff]   ;;  %v8320_v0 = vld [vmem:[#allocation2 + $0x38] sm:$0xff]  }
  0x3a   : > { %7833 = vmatprep.mubr.msk.bf16.mxu1 %vm587_vm2, %v8298_v7  ;;  %7806 = vmatmul.mubr.msk.bf16.gmra.mxu0 %vm587_vm2, %v8297_v8  ;;  %v8305_v32 = vld [vmem:[#allocation2 + $0x58] sm:$0xff]   ;;  %v1124_v34 = vsel %vm1112_vm3, %v1119_v26, %v1123_v22  ;;  %v1132_v49 = vsel %vm1112_vm3, %v1127_v42, %v1131_v39  ;;  %v1141_v51 = vshrl.u32 %v8312_v31, 16  ;;  %v1149_v53 = vshrl.u32 %v8313_v38, 16  ;;  %v8317_v58 = vld [vmem:[#allocation2 + $0x30] sm:$0xff]   ;;  %v8324_v17 = vld [vmem:[#allocation2 + $0x48] sm:$0xff]  }
  0x3b   : > { %7809 = vmatprep.mubr.msk.bf16.mxu0 %vm587_vm2, %v8300_v9  ;;  %v1140_v52 = vsel %vm1112_vm3, %v1135_v43, %v1139_v44  ;;  %v1153_v54 = vshll.u32 %v8316_v45, 16  ;;  %v1932_v55 = vsel %vm1927_vm4, %v1929_v28, %v1931_v46  ;;  %v3478_v56 = vsel %vm660_vm0, %v8662_v33, 0  ;;  %v8319_v9 = vld [vmem:[#allocation2 + $0x30] sm:$0xff]   ;;  %v8323_v23 = vld [vmem:[#allocation2 + $0x40] sm:$0xff]   ;;  %v8328_v37 = vld [vmem:[#allocation2 + $0x58] sm:$0xff]  }
  0x3c   : > { %v1147_v59 = vrot.slane %v1145_v47, 1  ;;  %v1934_v60 = vsel %vm1927_vm4, %v1931_v46, %v1933_v48  ;;  %v1143_v29 = vor.u32 %v1141_v51, %v1139_v44  ;;  %v1935_v33 = vrot.slane %v8315_v57, 1  ;;  %v8325_v28 = vld [vmem:[#allocation2 + $0x50] sm:$0xff]   ;;  %v8330_v51 = vld [vmem:[#allocation2 + $0x58] sm:$0xff]  }
  0x3d   : > { %v1155_v63 = vrot.slane %v1153_v54, 1  ;;  %v1161_v1 = vshll.u32 %v8317_v58, 16  ;;  %v1937_v2 = vrot.slane %v8318_v61, 1  ;;  %v1157_v4 = vshrl.u32 %v8316_v45, 16  ;;  %v8327_v43 = vld [vmem:[#allocation2 + $0x50] sm:$0xff]  }
  0x3e   : > { %v1151_v62 = vor.u32 %v1149_v53, %v1147_v59  ;;  %v1148_v3 = vsel %vm1112_vm3, %v1143_v29, %v1147_v59  ;;  %v1165_v6 = vshrl.u32 %v8317_v58, 16  ;;  %v1169_v7 = vshll.u32 %v8320_v0, 16 }
  0x3f   : > { %v1936_v8 = vsel %vm1927_vm4, %v1933_v48, %v1935_v33  ;;  %v1159_v14 = vor.u32 %v1157_v4, %v1155_v63  ;;  %v1939_v18 = vrot.slane %v8319_v9, 1  ;;  %v1173_v22 = vshrl.u32 %v8320_v0, 16  ;;  %v8331_v0 = vld [vmem:[#allocation2 + $0x60] sm:$0xff]  }
  0x40   : > { %v1156_v5 = vsel %vm1112_vm3, %v1151_v62, %v1155_v63  ;;  %v1171_v16 = vrot.slane %v1169_v7, 1  ;;  %v1185_v26 = vshll.u32 %v8324_v17, 16  ;;  %v1943_v38 = vrot.slane %v8323_v23, 1  ;;  %v8338_v23 = vld [vmem:[#allocation2 + $0x78] sm:$0xff]  }
  0x41   : > { %7834 = vmatmul.mubr.msk.bf16.gmra.mxu1 %vm587_vm2, %v8299_v10  ;;  %v1163_v10 = vrot.slane %v1161_v1, 1  ;;  %v1940_v27 = vsel %vm1927_vm4, %v1937_v2, %v1939_v18  ;;  %v1193_v39 = vshll.u32 %v8325_v28, 16  ;;  %v1189_v42 = vshrl.u32 %v8324_v17, 16 }
  0x42   : > { %7837 = vmatprep.mubr.msk.bf16.mxu1 %vm587_vm2, %v8302_v12  ;;  %7810 = vmatmul.mubr.msk.bf16.gmra.mxu0 %vm587_vm2, %v8301_v11  ;;  %v1938_v11 = vsel %vm1927_vm4, %v1935_v33, %v1937_v2  ;;  %v8321_v12 = vld [vmem:[#allocation2 + $0x40] sm:$0xff]   ;;  %v1187_v36 = vrot.slane %v1185_v26, 1  ;;  %v1197_v45 = vshrl.u32 %v8325_v28, 16  ;;  %v1201_v46 = vshll.u32 %v8328_v37, 16  ;;  %v8333_v33 = vld [vmem:[#allocation2 + $0x70] sm:$0xff]  }
  0x43   : > { %7813 = vmatprep.mubr.msk.bf16.mxu0 %vm587_vm2, %v8304_v13  ;;  %v8322_v13 = vld [vmem:[#allocation2 + $0x38] sm:$0xff]   ;;  %v1167_v15 = vor.u32 %v1165_v6, %v1163_v10  ;;  %v1177_v19 = vshll.u32 %v8321_v12, 16  ;;  %v1164_v21 = vsel %vm1112_vm3, %v1159_v14, %v1163_v10  ;;  %v1181_v25 = vshrl.u32 %v8321_v12, 16  ;;  %v8335_v14 = vld [vmem:[#allocation2 + $0x70] sm:$0xff]  }
  0x44   : > { %v1941_v20 = vrot.slane %v8322_v13, 1  ;;  %v1195_v48 = vrot.slane %v1193_v39, 1  ;;  %v1203_v54 = vrot.slane %v1201_v46, 1  ;;  %v1949_v58 = vrot.slane %v8330_v51, 1 }
  0x45   : > { %v1179_v30 = vrot.slane %v1177_v19, 1  ;;  %v1225_v9 = vshll.u32 %v8333_v33, 16  ;;  %v1955_v28 = vrot.slane %v8335_v14, 1  ;;  %v8350_v14 = vld [vmem:[#allocation2 + $0xa8] sm:$0xff]  }
  0x46   : > { %v1942_v31 = vsel %vm1927_vm4, %v1939_v18, %v1941_v20  ;;  %v1944_v47 = vsel %vm1927_vm4, %v1941_v20, %v1943_v38  ;;  %v1199_v53 = vor.u32 %v1197_v45, %v1195_v48  ;;  %v8803_v18 = vld [vmem:[%s10188_s2 + $0xa] sm:$0x3]  ;;  %v8337_v20 = vld [vmem:[#allocation2 + $0x80] sm:$0xff]  }
  0x47   : > { %v1183_v35 = vor.u32 %v1181_v25, %v1179_v30  ;;  %v8340_v25 = vld [vmem:[#allocation2 + $0x88] sm:$0xff]  }
  0x48   : > { %v1204_v61 = vsel %vm1112_vm3, %v1199_v53, %v1203_v54  ;;  %v1253_v53 = vshrl.u32 %v8340_v25, 16 }
  0x49   : > { %7838 = vmatmul.mubr.msk.bf16.gmra.mxu1 %vm587_vm2, %v8303_v24  ;;  %v1172_v24 = vsel %vm1112_vm3, %v1167_v15, %v1171_v16  ;;  %v1188_v44 = vsel %vm1112_vm3, %v1183_v35, %v1187_v36  ;;  %v1229_v15 = vshrl.u32 %v8333_v33, 16  ;;  %v1249_v35 = vshll.u32 %v8340_v25, 16  ;;  %v8348_v33 = vld [vmem:[#allocation2 + $0xa8] sm:$0xff]   ;;  %v8351_v25 = vld [vmem:[#allocation2 + $0xb0] sm:$0xff]  }
  0x4a   : > { %7843 = vmatprep.mubr.msk.bf16.mxu1 %vm587_vm2, %v1124_v34  ;;  %7814 = vmatmul.mubr.msk.bf16.gmra.mxu0 %vm587_vm2, %v8305_v32  ;;  %v8326_v32 = vld [vmem:[#allocation2 + $0x48] sm:$0xff]   ;;  %v1175_v34 = vor.u32 %v1173_v22, %v1171_v16 }
  0x4b   : > { %7893 = vmatprep.mubr.msk.bf16.mxu0 %vm587_vm2, %v1930_v40  ;;  %v1945_v40 = vrot.slane %v8326_v32, 1  ;;  %v1251_v46 = vrot.slane %v1249_v35, 1 }
  0x4c   : > { %v1180_v41 = vsel %vm1112_vm3, %v1175_v34, %v1179_v30  ;;  %v1241_v30 = vshll.u32 %v8337_v20, 16 }
  0x51   : > { %7844 = vmatmul.mubr.msk.bf16.vlgmr.msra.gmra.mxu1 %vm587_vm2, %v1132_v49  ;;  %v1946_v49 = vsel %vm1927_vm4, %v1943_v38, %v1945_v40  ;;  %v1245_v38 = vshrl.u32 %v8337_v20, 16 }
  0x52   : > { %7942 = vmatpush3.bf16.msra.mxu1 %v2664_v50  ;;  %7847 = vmatprep.mubr.msk.bf16.mxu1 %vm587_vm2, %v1140_v52  ;;  %v8329_v50 = vld [vmem:[#allocation2 + $0x60] sm:$0xff]   ;;  %v1191_v52 = vor.u32 %v1189_v42, %v1187_v36 }
  0x53   : > { %7894 = vmatmul.mubr.msk.bf16.vlgmr.msra.gmra.mxu0 %vm587_vm2, %v1932_v55  ;;  %v8332_v55 = vld [vmem:[#allocation2 + $0x68] sm:$0xff]   ;;  %v1209_v57 = vshll.u32 %v8329_v50, 16  ;;  %v1213_v29 = vshrl.u32 %v8329_v50, 16  ;;  %8249 = vmatprep.subr.msk.bf16.mxu1 %vm660_vm0, %v8803_v18 }
  0x54   : > { %7992 = vmatpush3.bf16.msra.mxu0 %v3478_v56  ;;  %7897 = vmatprep.mubr.msk.bf16.mxu0 %vm587_vm2, %v1934_v60  ;;  %v1947_v56 = vrot.slane %v8327_v43, 1  ;;  %v1196_v59 = vsel %vm1112_vm3, %v1191_v52, %v1195_v48  ;;  %v1205_v60 = vshrl.u32 %v8328_v37, 16  ;;  %v1217_v62 = vshll.u32 %v8332_v55, 16  ;;  %v8339_v37 = vld [vmem:[#allocation2 + $0x80] sm:$0xff]   ;;  %v8342_v43 = vld [vmem:[#allocation2 + $0x88] sm:$0xff]  }
  0x55   : > { %v1211_v1 = vrot.slane %v1209_v57, 1  ;;  %v1221_v13 = vshrl.u32 %v8332_v55, 16  ;;  %v1961_v51 = vrot.slane %v8342_v43, 1  ;;  %v8359_v43 = vld [vmem:[#allocation2 + $0x14] sm:$0xff]  }
  0x56   : > { %v1948_v63 = vsel %vm1927_vm4, %v1945_v40, %v1947_v56  ;;  %v1950_v2 = vsel %vm1927_vm4, %v1947_v56, %v1949_v58  ;;  %v1207_v4 = vor.u32 %v1205_v60, %v1203_v54  ;;  %v1219_v7 = vrot.slane %v1217_v62, 1  ;;  %v8341_v40 = vld [vmem:[#allocation2 + $0x90] sm:$0xff]  }
  0x57   : > { %v1215_v6 = vor.u32 %v1213_v29, %v1211_v1  ;;  %v1257_v50 = vshll.u32 %v8341_v40, 16  ;;  %v1261_v55 = vshrl.u32 %v8341_v40, 16  ;;  %v8346_v29 = vld [vmem:[#allocation2 + $0x98] sm:$0xff]   ;;  %v1255_v62 = vor.u32 %v1253_v53, %v1251_v46 }
  0x58   : > { %v1212_v12 = vsel %vm1112_vm3, %v1207_v4, %v1211_v1 }
  0x59   : > { %7848 = vmatmul.mubr.msk.bf16.gmra.mxu1 %vm587_vm2, %v1148_v3  ;;  %v8334_v3 = vld [vmem:[#allocation2 + $0x68] sm:$0xff]   ;;  %v1220_v17 = vsel %vm1112_vm3, %v1215_v6, %v1219_v7  ;;  %v8347_v6 = vld [vmem:[#allocation2 + $0xa0] sm:$0xff]  }
  0x5a   : > { %7851 = vmatprep.mubr.msk.bf16.mxu1 %vm587_vm2, %v1156_v5  ;;  %v8336_v5 = vld [vmem:[#allocation2 + $0x78] sm:$0xff]   ;;  %v1953_v10 = vrot.slane %v8334_v3, 1  ;;  %v1965_v3 = vrot.slane %v8346_v29, 1  ;;  %v1967_v20 = vrot.slane %v8347_v6, 1 }
  0x5b   : > { %7898 = vmatmul.mubr.msk.bf16.gmra.mxu0 %vm587_vm2, %v1936_v8  ;;  %v1951_v8 = vrot.slane %v8331_v0, 1  ;;  %v1233_v16 = vshll.u32 %v8336_v5, 16  ;;  %v1237_v34 = vshrl.u32 %v8336_v5, 16 }
  0x5c   : > { %7901 = vmatprep.mubr.msk.bf16.mxu0 %vm587_vm2, %v1938_v11  ;;  %v405_v11 = vld [vmem:[%s8792_s10] sm:$0xf]  ;;  %v1956_v39 = vsel %vm1927_vm4, %v1953_v10, %v1955_v28 }
  0x5d   : > { %411 = vst.msk [vmem:[#allocation2 + $0xc0] sm:$0xf] %vm356_vm1, %v405_v11  ;;  %v1952_v19 = vsel %vm1927_vm4, %v1949_v58, %v1951_v8  ;;  %v1954_v22 = vsel %vm1927_vm4, %v1951_v8, %v1953_v10  ;;  %v8343_v58 = vld [vmem:[#allocation2 + $0x90] sm:$0xff]  }
  0x5e   : > { %v1963_v1 = vrot.slane %v8343_v58, 1  ;;  %v8349_v11 = vld [vmem:[#allocation2 + $0xb0] sm:$0xff]  }
  0x60   : > { %v1964_v10 = vsel %vm1927_vm4, %v1961_v51, %v1963_v1 }
  0x61   : > { %7852 = vmatmul.mubr.msk.bf16.gmra.mxu1 %vm587_vm2, %v1164_v21  ;;  %v1227_v21 = vrot.slane %v1225_v9, 1  ;;  %v1281_v9 = vshll.u32 %v8348_v33, 16 }
  0x62   : > { %7855 = vmatprep.mubr.msk.bf16.mxu1 %vm587_vm2, %v1172_v24  ;;  %v1223_v24 = vor.u32 %v1221_v13, %v1219_v7  ;;  %v1966_v13 = vsel %vm1927_vm4, %v1963_v1, %v1965_v3 }
  0x63   : > { %7902 = vmatmul.mubr.msk.bf16.gmra.mxu0 %vm587_vm2, %v1940_v27  ;;  %v1231_v26 = vor.u32 %v1229_v15, %v1227_v21  ;;  %v1235_v27 = vrot.slane %v1233_v16, 1 }
  0x64   : > { %7905 = vmatprep.mubr.msk.bf16.mxu0 %vm587_vm2, %v1942_v31  ;;  %v1957_v31 = vrot.slane %v8338_v23, 1  ;;  %v1228_v32 = vsel %vm1112_vm3, %v1223_v24, %v1227_v21  ;;  %v1289_v21 = vshll.u32 %v8349_v11, 16  ;;  %v1285_v24 = vshrl.u32 %v8348_v33, 16 }
  0x65   : > { %v1236_v36 = vsel %vm1112_vm3, %v1231_v26, %v1235_v27  ;;  %v1239_v45 = vor.u32 %v1237_v34, %v1235_v27  ;;  %v1293_v27 = vshrl.u32 %v8349_v11, 16  ;;  %v3221_v33 = vshrl.u32 %v8359_v43, 16  ;;  %v406_v11 = vld [vmem:[%s8792_s10 + $0x4] sm:$0xf] }
  0x66   : > { %v1958_v42 = vsel %vm1927_vm4, %v1955_v28, %v1957_v31  ;;  %v1291_v34 = vrot.slane %v1289_v21, 1  ;;  %412 = vst.msk [vmem:[#allocation2 + $0xc4] sm:$0xf] %vm356_vm1, %v406_v11 }
  0x69   : > { %7856 = vmatmul.mubr.msk.bf16.gmra.mxu1 %vm587_vm2, %v1180_v41  ;;  %v1243_v41 = vrot.slane %v1241_v30, 1  ;;  %v1968_v30 = vsel %vm1927_vm4, %v1965_v3, %v1967_v20 }
  0x6a   : > { %7859 = vmatprep.mubr.msk.bf16.mxu1 %vm587_vm2, %v1188_v44  ;;  %v8821_v44 = vld [vmem:[%s10188_s2 + $0xc] sm:$0x3] }
  0x6b   : > { %7906 = vmatmul.mubr.msk.bf16.gmra.mxu0 %vm587_vm2, %v1944_v47  ;;  %v8344_v47 = vld [vmem:[#allocation2 + $0x98] sm:$0xff]   ;;  %8250 = vmatprep.subr.msk.bf16.mxu0 %vm660_vm0, %v8821_v44  ;;  %v1247_v48 = vor.u32 %v1245_v38, %v1243_v41  ;;  %v1244_v52 = vsel %vm1112_vm3, %v1239_v45, %v1243_v41  ;;  %v1971_v38 = vrot.slane %v8351_v25, 1  ;;  %v4759_v21 = vsel %vm660_vm0, %v8821_v44, 0 }
  0x6c   : > { %7909 = vmatprep.mubr.msk.bf16.mxu0 %vm587_vm2, %v1946_v49  ;;  %v1959_v49 = vrot.slane %v8339_v37, 1  ;;  %v1265_v56 = vshll.u32 %v8344_v47, 16  ;;  %v1269_v5 = vshrl.u32 %v8344_v47, 16 }
  0x6d   : > { %v1252_v54 = vsel %vm1112_vm3, %v1247_v48, %v1251_v46  ;;  %v8355_v48 = vld [vmem:[#allocation2 + $0xc0] ss:$0 sps:$4 sm:$0x11]  }
  0x6e   : > { %v1960_v57 = vsel %vm1927_vm4, %v1957_v31, %v1959_v49  ;;  %v1962_v60 = vsel %vm1927_vm4, %v1959_v49, %v1961_v51  ;;  %v1267_v0 = vrot.slane %v1265_v56, 1  ;;  %v8353_v31 = vld [vmem:[#allocation2 + $0xc0] ss:$0 sps:$4 sm:$0x11]   ;;  %v1975_v58 = vrot.slane %v8355_v48, 1 }
  0x6f   : > { %v1305_v47 = vshll.u32 %v8353_v31, 16  ;;  %v8365_v31 = vld [vmem:[#allocation2 + $0x2c] sm:$0xff]   ;;  %v8369_v48 = vld [vmem:[#allocation2 + $0x3c] sm:$0xff]  }
  0x70   : > { %v1271_v15 = vor.u32 %v1269_v5, %v1267_v0  ;;  %v8364_v5 = vld [vmem:[#allocation2 + $0x2c] sm:$0xff]  }
  0x71   : > { %7860 = vmatmul.mubr.msk.bf16.gmra.mxu1 %vm587_vm2, %v1196_v59  ;;  %v1259_v59 = vrot.slane %v1257_v50, 1  ;;  %v1307_v56 = vrot.slane %v1305_v47, 1  ;;  %v8375_v47 = vld [vmem:[#allocation2 + $0x54] sm:$0xff]  }
  0x72   : > { %7863 = vmatprep.mubr.msk.bf16.mxu1 %vm587_vm2, %v1204_v61  ;;  %v8345_v61 = vld [vmem:[#allocation2 + $0xa0] sm:$0xff]  }
  0x73   : > { %7910 = vmatmul.mubr.msk.bf16.gmra.mxu0 %vm587_vm2, %v1948_v63  ;;  %v1263_v63 = vor.u32 %v1261_v55, %v1259_v59  ;;  %v1260_v4 = vsel %vm1112_vm3, %v1255_v62, %v1259_v59  ;;  %v1277_v8 = vshrl.u32 %v8345_v61, 16  ;;  %v8356_v62 = vld [vmem:[#allocation2 + $0xc] sm:$0xff]  }
  0x74   : > { %7913 = vmatprep.mubr.msk.bf16.mxu0 %vm587_vm2, %v1950_v2  ;;  %v1273_v2 = vshll.u32 %v8345_v61, 16  ;;  %v8363_v61 = vld [vmem:[#allocation2 + $0x24] sm:$0xff]  }
  0x75   : > { %v1268_v7 = vsel %vm1112_vm3, %v1263_v63, %v1267_v0  ;;  %v3233_v3 = vshll.u32 %v8363_v61, 16 }
  0x79   : > { %7864 = vmatmul.mubr.msk.bf16.gmra.mxu1 %vm587_vm2, %v1212_v12  ;;  %v1275_v12 = vrot.slane %v1273_v2, 1 }
  0x7a   : > { %7867 = vmatprep.mubr.msk.bf16.mxu1 %vm587_vm2, %v1220_v17  ;;  %v1283_v17 = vrot.slane %v1281_v9, 1 }
  0x7b   : > { %7914 = vmatmul.mubr.msk.bf16.gmra.mxu0 %vm587_vm2, %v1952_v19  ;;  %v1279_v16 = vor.u32 %v1277_v8, %v1275_v12  ;;  %v8352_v19 = vld [vmem:[#allocation2 + $0xb8] sm:$0xff]   ;;  %v1276_v23 = vsel %vm1112_vm3, %v1271_v15, %v1275_v12  ;;  %v4145_v15 = vsel %vm660_vm0, %v8803_v18, 0  ;;  %v8883_v18 = vld [vmem:[%s10188_s2 + $0xe] sm:$0x3] }
  0x7c   : > { %7917 = vmatprep.mubr.msk.bf16.mxu0 %vm587_vm2, %v1954_v22  ;;  %v1969_v22 = vrot.slane %v8350_v14, 1  ;;  %v1297_v28 = vshll.u32 %v8352_v19, 16  ;;  %v1287_v37 = vor.u32 %v1285_v24, %v1283_v17  ;;  %v1301_v41 = vshrl.u32 %v8352_v19, 16  ;;  %v8357_v8 = vld [vmem:[#allocation2 + $0x14] sm:$0xff]   ;;  %v8361_v12 = vld [vmem:[#allocation2 + $0x1c] sm:$0xff]   ;;  %v8362_v24 = vld [vmem:[#allocation2 + $0x24] sm:$0xff]  }
  0x7d   : > { %v1284_v26 = vsel %vm1112_vm3, %v1279_v16, %v1283_v17  ;;  %v408_v14 = vld [vmem:[%s8792_s10 + $0xc] sm:$0xf]  ;;  %v3241_v16 = vshll.u32 %v8364_v5, 16  ;;  %v3237_v19 = vshrl.u32 %v8363_v61, 16  ;;  %v8379_v61 = vld [vmem:[#allocation2 + $0x64] sm:$0xff]  }
  0x7e   : > { %v1970_v35 = vsel %vm1927_vm4, %v1967_v20, %v1969_v22  ;;  %v1299_v40 = vrot.slane %v1297_v28, 1  ;;  %v1292_v46 = vsel %vm1112_vm3, %v1287_v37, %v1291_v34  ;;  %v1972_v50 = vsel %vm1927_vm4, %v1969_v22, %v1971_v38  ;;  %414 = vst.msk [vmem:[#allocation2 + $0xcc] sm:$0xf] %vm356_vm1, %v408_v14  ;;  %v8371_v28 = vld [vmem:[#allocation2 + $0x44] sm:$0xff]  }
  0x7f   : > { %v3243_v25 = vrot.slane %v3241_v16, 1 }
  0x80   : > { %v1303_v55 = vor.u32 %v1301_v41, %v1299_v40  ;;  %v8372_v41 = vld [vmem:[#allocation2 + $0x4c] sm:$0xff]  }
  0x81   : > { %7868 = vmatmul.mubr.msk.bf16.gmra.mxu1 %vm587_vm2, %v1228_v32  ;;  %v8354_v32 = vld [vmem:[#allocation2 + $0xb8] sm:$0xff]  }
  0x82   : > { %7871 = vmatprep.mubr.msk.bf16.mxu1 %vm587_vm2, %v1236_v36  ;;  %v8358_v36 = vld [vmem:[#allocation2 + $0xc] sm:$0xff]   ;;  %v1308_v29 = vsel %vm1112_vm3, %v1303_v55, %v1307_v56  ;;  %v8376_v56 = vld [vmem:[#allocation2 + $0x5c] sm:$0xff]  }
  0x83   : > { %7918 = vmatmul.mubr.msk.bf16.gmra.mxu0 %vm587_vm2, %v1956_v39  ;;  %v1295_v39 = vor.u32 %v1293_v27, %v1291_v34  ;;  %v3212_v45 = vshll.u32 %v8358_v36, 16  ;;  %v3210_v51 = vshrl.u32 %v8358_v36, 16 }
  0x84   : > { %7921 = vmatprep.mubr.msk.bf16.mxu0 %vm587_vm2, %v1958_v42  ;;  %v1973_v42 = vrot.slane %v8354_v32, 1 }
  0x85   : > { %v1300_v49 = vsel %vm1112_vm3, %v1295_v39, %v1299_v40  ;;  %v3214_v53 = vrot.slane %v3212_v45, 1  ;;  %v8896_v39 = vld [vmem:[%s10188_s2 + $0x10] sm:$0x3] }
  0x86   : > { %v1976_v0 = vsel %vm1927_vm4, %v1973_v42, %v1975_v58 }
  0x87   : > { %v3215_v59 = vor.u32 %v3214_v53, %v3210_v51  ;;  %v3269_v51 = vshrl.u32 %v8371_v28, 16  ;;  %v3277_v53 = vshrl.u32 %v8372_v41, 16 }
  0x89   : > { %7872 = vmatmul.mubr.msk.bf16.gmra.mxu1 %vm587_vm2, %v1244_v52  ;;  %v1974_v52 = vsel %vm1927_vm4, %v1971_v38, %v1973_v42  ;;  %v3265_v38 = vshll.u32 %v8371_v28, 16  ;;  %v8366_v42 = vld [vmem:[#allocation2 + $0x34] sm:$0xff]  }
  0x8a   : > { %7875 = vmatprep.mubr.msk.bf16.mxu1 %vm587_vm2, %v1252_v54  ;;  %v3217_v54 = vshll.u32 %v8359_v43, 16 }
  0x8b   : > { %7922 = vmatmul.mubr.msk.bf16.gmra.mxu0 %vm587_vm2, %v1960_v57  ;;  %v8360_v57 = vld [vmem:[#allocation2 + $0x1c] sm:$0xff]  }
  0x8c   : > { %7925 = vmatprep.mubr.msk.bf16.mxu0 %vm587_vm2, %v1962_v60  ;;  %v3219_v60 = vrot.slane %v3217_v54, 1  ;;  %v3225_v63 = vshll.u32 %v8360_v57, 16  ;;  %v3229_v2 = vshrl.u32 %v8360_v57, 16  ;;  %v3281_v54 = vshll.u32 %v8375_v47, 16  ;;  %v8370_v57 = vld [vmem:[#allocation2 + $0x44] sm:$0xff]  }
  0x8e   : > { %v3220_v1 = vsel %vm1112_vm3, %v3215_v59, %v3219_v60  ;;  %v3223_v6 = vor.u32 %v3221_v33, %v3219_v60  ;;  %v3283_v60 = vrot.slane %v3281_v54, 1  ;;  %v409_v54 = vld [vmem:[%s8792_s10 + $0x10] sm:$0xf] }
  0x8f   : > { %415 = vst.msk [vmem:[#allocation2 + $0xd0] sm:$0xf] %vm356_vm1, %v409_v54 }
  0x91   : > { %7876 = vmatmul.mubr.msk.bf16.gmra.mxu1 %vm587_vm2, %v1260_v4  ;;  %v3227_v4 = vrot.slane %v3225_v63, 1 }
  0x92   : > { %7879 = vmatprep.mubr.msk.bf16.mxu1 %vm587_vm2, %v1268_v7  ;;  %v8367_v7 = vld [vmem:[#allocation2 + $0x34] sm:$0xff]  }
  0x93   : > { %7926 = vmatmul.mubr.msk.bf16.gmra.mxu0 %vm587_vm2, %v1964_v10  ;;  %v3231_v9 = vor.u32 %v3229_v2, %v3227_v4  ;;  %v3235_v10 = vrot.slane %v3233_v3, 1  ;;  %v3228_v17 = vsel %vm1112_vm3, %v3223_v6, %v3227_v4  ;;  %v3249_v20 = vshll.u32 %v8367_v7, 16  ;;  %v8380_v4 = vld [vmem:[#allocation2 + $0x6c] sm:$0xff]  }
  0x94   : > { %7929 = vmatprep.mubr.msk.bf16.mxu0 %vm587_vm2, %v1966_v13  ;;  %v407_v13 = vld [vmem:[%s8792_s10 + $0x8] sm:$0xf]  ;;  %v3297_v2 = vshll.u32 %v8379_v61, 16  ;;  %v3305_v11 = vshll.u32 %v8380_v4, 16 }
  0x95   : > { %413 = vst.msk [vmem:[#allocation2 + $0xc8] sm:$0xf] %vm356_vm1, %v407_v13  ;;  %v3236_v22 = vsel %vm1112_vm3, %v3231_v9, %v3235_v10  ;;  %v3239_v44 = vor.u32 %v3237_v19, %v3235_v10  ;;  %v3251_v27 = vrot.slane %v3249_v20, 1  ;;  %v8383_v9 = vld [vmem:[#allocation2 + $0x74] sm:$0xff]   ;;  %v8377_v10 = vld [vmem:[#allocation2 + $0x5c] sm:$0xff]   ;;  %v3301_v13 = vshrl.u32 %v8379_v61, 16 }
  0x96   : > { %v3313_v16 = vshll.u32 %v8383_v9, 16  ;;  %v8384_v19 = vld [vmem:[#allocation2 + $0x7c] sm:$0xff]   ;;  %v8378_v20 = vld [vmem:[#allocation2 + $0x64] sm:$0xff]  }
  0x97   : > { %v3244_v34 = vsel %vm1112_vm3, %v3239_v44, %v3243_v25 }
  0x99   : > { %7880 = vmatmul.mubr.msk.bf16.gmra.mxu1 %vm587_vm2, %v1276_v23  ;;  %v3245_v23 = vshrl.u32 %v8364_v5, 16  ;;  %v8374_v5 = vld [vmem:[#allocation2 + $0x54] sm:$0xff]  }
  0x9a   : > { %7883 = vmatprep.mubr.msk.bf16.mxu1 %vm587_vm2, %v1284_v26  ;;  %v8368_v26 = vld [vmem:[#allocation2 + $0x3c] sm:$0xff]  }
  0x9b   : > { %7930 = vmatmul.mubr.msk.bf16.gmra.mxu0 %vm587_vm2, %v1968_v30  ;;  %v3247_v30 = vor.u32 %v3245_v23, %v3243_v25  ;;  %v3257_v32 = vshll.u32 %v8368_v26, 16  ;;  %v3261_v37 = vshrl.u32 %v8368_v26, 16  ;;  %v3315_v23 = vrot.slane %v3313_v16, 1  ;;  %v8381_v25 = vld [vmem:[#allocation2 + $0x6c] sm:$0xff]  }
  0x9c   : > { %7933 = vmatprep.mubr.msk.bf16.mxu0 %vm587_vm2, %v1970_v35  ;;  %v3253_v35 = vshrl.u32 %v8367_v7, 16  ;;  %v3321_v26 = vshll.u32 %v8384_v19, 16 }
  0x9d   : > { %v3252_v36 = vsel %vm1112_vm3, %v3247_v30, %v3251_v27  ;;  %v3259_v40 = vrot.slane %v3257_v32, 1  ;;  %v3325_v30 = vshrl.u32 %v8384_v19, 16  ;;  %v8399_v19 = vld [vmem:[#allocation2 + $0xb4] sm:$0xff]  }
  0x9e   : > { %v3255_v43 = vor.u32 %v3253_v35, %v3251_v27  ;;  %v3317_v27 = vshrl.u32 %v8383_v9, 16  ;;  %v3323_v32 = vrot.slane %v3321_v26, 1 }
  0x9f   : > { %v3263_v45 = vor.u32 %v3261_v37, %v3259_v40  ;;  %v8382_v37 = vld [vmem:[#allocation2 + $0x74] sm:$0xff]  }
  0xa0   : > { %v3319_v35 = vor.u32 %v3317_v27, %v3315_v23 }
  0xa1   : > { %7884 = vmatmul.mubr.msk.bf16.gmra.mxu1 %vm587_vm2, %v1292_v46  ;;  %v3267_v46 = vrot.slane %v3265_v38, 1  ;;  %v3327_v38 = vor.u32 %v3325_v30, %v3323_v32  ;;  %v3377_v30 = vshll.u32 %v8399_v19, 16 }
  0xa2   : > { %7887 = vmatprep.mubr.msk.bf16.mxu1 %vm587_vm2, %v1300_v49  ;;  %v3273_v49 = vshll.u32 %v8372_v41, 16  ;;  %v8385_v41 = vld [vmem:[#allocation2 + $0x7c] sm:$0xff]  }
  0xa3   : > { %7934 = vmatmul.mubr.msk.bf16.gmra.mxu0 %vm587_vm2, %v1972_v50  ;;  %v3260_v50 = vsel %vm1112_vm3, %v3255_v43, %v3259_v40  ;;  %v3271_v58 = vor.u32 %v3269_v51, %v3267_v46 }
  0xa4   : > { %7937 = vmatprep.mubr.msk.bf16.mxu0 %vm587_vm2, %v1974_v52  ;;  %v3268_v52 = vsel %vm1112_vm3, %v3263_v45, %v3267_v46  ;;  %v3275_v55 = vrot.slane %v3273_v49, 1  ;;  %v3324_v45 = vsel %vm1112_vm3, %v3319_v35, %v3323_v32  ;;  %v8400_v35 = vld [vmem:[#allocation2 + $0xbc] sm:$0xff]  }
  0xa5   : > { %v3389_v54 = vshrl.u32 %v8400_v35, 16 }
  0xa6   : > { %v3279_v59 = vor.u32 %v3277_v53, %v3275_v55  ;;  %v3276_v63 = vsel %vm1112_vm3, %v3271_v58, %v3275_v55  ;;  %v8392_v53 = vld [vmem:[#allocation2 + $0x9c] sm:$0xff]   ;;  %v8386_v55 = vld [vmem:[#allocation2 + $0x84] sm:$0xff]  }
  0xa8   : > { %v3284_v33 = vsel %vm1112_vm3, %v3279_v59, %v3283_v60 }
  0xa9   : > { %7888 = vmatmul.mubr.msk.bf16.gmra.mxu1 %vm587_vm2, %v1308_v29  ;;  %v8373_v29 = vld [vmem:[#allocation2 + $0x4c] sm:$0xff]  }
  0xaa   : > { %7943 = vmatprep.mubr.msk.bf16.mxu1 %vm587_vm2, %v8356_v62  ;;  %v3289_v62 = vshll.u32 %v8376_v56, 16 }
  0xab   : > { %7938 = vmatmul.mubr.msk.bf16.gmra.mxu0 %vm587_vm2, %v1976_v0  ;;  %v3285_v0 = vshrl.u32 %v8375_v47, 16 }
  0xac   : > { %7993 = vmatprep.mubr.msk.bf16.mxu0 %vm587_vm2, %v3220_v1  ;;  %v3293_v1 = vshrl.u32 %v8376_v56, 16  ;;  %v3291_v3 = vrot.slane %v3289_v62, 1  ;;  %v8389_v62 = vld [vmem:[#allocation2 + $0x8c] sm:$0xff]  }
  0xad   : > { %v3287_v6 = vor.u32 %v3285_v0, %v3283_v60 }
  0xae   : > { %v3295_v7 = vor.u32 %v3293_v1, %v3291_v3 }
  0xb1   : > { %7944 = vmatmul.mubr.msk.bf16.vlgmr.msra.gmra.mxu1 %vm587_vm2, %v8357_v8  ;;  %v3299_v8 = vrot.slane %v3297_v2, 1 }
  0xb2   : > { %8042 = vmatpush3.bf16.msra.mxu1 %v4145_v15  ;;  %7947 = vmatprep.mubr.msk.bf16.mxu1 %vm587_vm2, %v8361_v12  ;;  %v3292_v12 = vsel %vm1112_vm3, %v3287_v6, %v3291_v3  ;;  %v3309_v15 = vshrl.u32 %v8380_v4, 16  ;;  %v3357_v6 = vshrl.u32 %v8392_v53, 16 }
  0xb3   : > { %7994 = vmatmul.mubr.msk.bf16.vlgmr.msra.gmra.mxu0 %vm587_vm2, %v3228_v17  ;;  %8251 = vmatprep.subr.msk.bf16.mxu1 %vm660_vm0, %v8883_v18  ;;  %v3300_v14 = vsel %vm1112_vm3, %v3295_v7, %v3299_v8  ;;  %v3307_v17 = vrot.slane %v3305_v11, 1  ;;  %v8396_v11 = vld [vmem:[#allocation2 + $0xac] sm:$0xff]  }
  0xb4   : > { %8092 = vmatpush3.bf16.msra.mxu0 %v4759_v21  ;;  %7997 = vmatprep.mubr.msk.bf16.mxu0 %vm587_vm2, %v3236_v22  ;;  %v3303_v21 = vor.u32 %v3301_v13, %v3299_v8 }
  0xb5   : > { %8252 = vmatprep.subr.msk.bf16.mxu0 %vm660_vm0, %v8896_v39  ;;  %v3311_v22 = vor.u32 %v3309_v15, %v3307_v17  ;;  %v8390_v15 = vld [vmem:[#allocation2 + $0x94] sm:$0xff]  }
  0xb6   : > { %v3308_v44 = vsel %vm1112_vm3, %v3303_v21, %v3307_v17 }
  0xb7   : > { %v3316_v28 = vsel %vm1112_vm3, %v3311_v22, %v3315_v23  ;;  %v3369_v23 = vshll.u32 %v8396_v11, 16 }
  0xb9   : > { %7948 = vmatmul.mubr.msk.bf16.gmra.mxu1 %vm587_vm2, %v8362_v24  ;;  %v8387_v24 = vld [vmem:[#allocation2 + $0x84] sm:$0xff]  }
  0xba   : > { %7951 = vmatprep.mubr.msk.bf16.mxu1 %vm587_vm2, %v8365_v31  ;;  %v3329_v31 = vshll.u32 %v8387_v24, 16 }
  0xbb   : > { %7998 = vmatmul.mubr.msk.bf16.gmra.mxu0 %vm587_vm2, %v3244_v34  ;;  %v8388_v34 = vld [vmem:[#allocation2 + $0x8c] sm:$0xff]  }
  0xbc   : > { %8001 = vmatprep.mubr.msk.bf16.mxu0 %vm587_vm2, %v3252_v36  ;;  %v8927_v36 = vld [vmem:[#allocation2 + $0x94] sm:$0xff]   ;;  %v3331_v40 = vrot.slane %v3329_v31, 1  ;;  %v3337_v43 = vshll.u32 %v8388_v34, 16  ;;  %v3341_v46 = vshrl.u32 %v8388_v34, 16  ;;  %v3371_v34 = vrot.slane %v3369_v23, 1 }
  0xbd   : > { %v3345_v47 = vshll.u32 %v8927_v36, 16  ;;  %v3349_v2 = vshrl.u32 %v8927_v36, 16  ;;  %v8394_v36 = vld [vmem:[#allocation2 + $0xa4] sm:$0xff]  }
  0xbe   : > { %v3332_v49 = vsel %vm1112_vm3, %v3327_v38, %v3331_v40 }
  0xbf   : > { %v3347_v61 = vrot.slane %v3345_v47, 1 }
  0xc1   : > { %7952 = vmatmul.mubr.msk.bf16.gmra.mxu1 %vm587_vm2, %v8366_v42  ;;  %v3333_v42 = vshrl.u32 %v8387_v24, 16 }
  0xc2   : > { %7955 = vmatprep.mubr.msk.bf16.mxu1 %vm587_vm2, %v8369_v48 }
  0xc3   : > { %8002 = vmatmul.mubr.msk.bf16.gmra.mxu0 %vm587_vm2, %v3260_v50  ;;  %v3335_v56 = vor.u32 %v3333_v42, %v3331_v40 }
  0xc4   : > { %8005 = vmatprep.mubr.msk.bf16.mxu0 %vm587_vm2, %v3268_v52  ;;  %v3339_v52 = vrot.slane %v3337_v43, 1  ;;  %v3379_v43 = vrot.slane %v3377_v30, 1 }
  0xc6   : > { %v3343_v60 = vor.u32 %v3341_v46, %v3339_v52  ;;  %v3340_v1 = vsel %vm1112_vm3, %v3335_v56, %v3339_v52 }
  0xc9   : > { %7956 = vmatmul.mubr.msk.bf16.gmra.mxu1 %vm587_vm2, %v8370_v57  ;;  %v410_v57 = vld [vmem:[%s8792_s10 + $0x14] sm:$0xf] }
  0xca   : > { %7959 = vmatprep.mubr.msk.bf16.mxu1 %vm587_vm2, %v8373_v29  ;;  %v8942_v29 = vld [vmem:[#allocation2 + $0xa4] sm:$0xff]   ;;  %416 = vst.msk [vmem:[#allocation2 + $0xd4] sm:$0xf] %vm356_vm1, %v410_v57 }
  0xcb   : > { %8006 = vmatmul.mubr.msk.bf16.gmra.mxu0 %vm587_vm2, %v3276_v63  ;;  %v3361_v7 = vshll.u32 %v8942_v29, 16 }
  0xcc   : > { %8009 = vmatprep.mubr.msk.bf16.mxu0 %vm587_vm2, %v3284_v33  ;;  %v3353_v33 = vshll.u32 %v8392_v53, 16 }
  0xcd   : > { %v3363_v17 = vrot.slane %v3361_v7, 1 }
  0xd1   : > { %7960 = vmatmul.mubr.msk.bf16.gmra.mxu1 %vm587_vm2, %v8374_v5  ;;  %v3348_v5 = vsel %vm1112_vm3, %v3343_v60, %v3347_v61  ;;  %v8404_v60 = vld [vmem:[#allocation2 + $0xcc] ss:$0 sps:$4 sm:$0x11]  }
  0xd2   : > { %7963 = vmatprep.mubr.msk.bf16.mxu1 %vm587_vm2, %v8377_v10  ;;  %v3355_v10 = vrot.slane %v3353_v33, 1  ;;  %v8401_v33 = vld [vmem:[#allocation2 + $0xbc] sm:$0xff]   ;;  %v3401_v7 = vshll.u32 %v8404_v60, 16 }
  0xd3   : > { %8010 = vmatmul.mubr.msk.bf16.gmra.mxu0 %vm587_vm2, %v3292_v12  ;;  %v3351_v12 = vor.u32 %v3349_v2, %v3347_v61  ;;  %v8415_v60 = vld [vmem:[#allocation2 + $0x3c] sm:$0xff]  }
  0xd4   : > { %8013 = vmatprep.mubr.msk.bf16.mxu0 %vm587_vm2, %v3300_v14  ;;  %v3359_v16 = vor.u32 %v3357_v6, %v3355_v10 }
  0xd5   : > { %v3356_v24 = vsel %vm1112_vm3, %v3351_v12, %v3355_v10 }
  0xd6   : > { %v3364_v27 = vsel %vm1112_vm3, %v3359_v16, %v3363_v17  ;;  %v3403_v16 = vrot.slane %v3401_v7, 1 }
  0xd9   : > { %7964 = vmatmul.mubr.msk.bf16.gmra.mxu1 %vm587_vm2, %v8378_v20  ;;  %v8393_v20 = vld [vmem:[#allocation2 + $0x9c] sm:$0xff]  }
  0xda   : > { %7967 = vmatprep.mubr.msk.bf16.mxu1 %vm587_vm2, %v8381_v25  ;;  %v3365_v25 = vshrl.u32 %v8942_v29, 16 }
  0xdb   : > { %8014 = vmatmul.mubr.msk.bf16.gmra.mxu0 %vm587_vm2, %v3308_v44 }
  0xdc   : > { %8017 = vmatprep.mubr.msk.bf16.mxu0 %vm587_vm2, %v3316_v28  ;;  %v3373_v28 = vshrl.u32 %v8396_v11, 16 }
  0xde   : > { %v3375_v42 = vor.u32 %v3373_v28, %v3371_v34 }
  0xe0   : > { %v3380_v53 = vsel %vm1112_vm3, %v3375_v42, %v3379_v43  ;;  %v5573_v42 = vsel %vm660_vm0, %v8883_v18, 0 }
  0xe1   : > { %v7819_v48 = vpop.f32.mrf.mxu1  ;;  %7968 = vmatmul.mubr.msk.bf16.gmra.mxu1 %vm587_vm2, %v8382_v37  ;;  %v3367_v37 = vor.u32 %v3365_v25, %v3363_v17  ;;  %v8410_v25 = vld [vmem:[#allocation2 + $0x24] sm:$0xff]  }
  0xe2   : > { %916 = vst.msk [vmem:[#allocation3 + $0xd0] sm:$0xff] %vm889_vm5, %v7819_v48  ;;  %7971 = vmatprep.mubr.msk.bf16.mxu1 %vm587_vm2, %v8385_v41  ;;  %v7795_v51 = vpop.f32.mrf.mxu0  ;;  %v8397_v41 = vld [vmem:[#allocation2 + $0xac] sm:$0xff]   ;;  %v3385_v48 = vshll.u32 %v8400_v35, 16 }
  0xe3   : > { %v794_v50 = vpop.f32.mrf.mxu1  ;;  %8018 = vmatmul.mubr.msk.bf16.gmra.mxu0 %vm587_vm2, %v3324_v45  ;;  %892 = vst.msk [vmem:[#allocation3 + $0x10] sm:$0xff] %vm889_vm5, %v7795_v51  ;;  %v8403_v45 = vld [vmem:[#allocation2 + $0xc4] sm:$0xff]  }
  0xe4   : > { %914 = vst.msk [vmem:[#allocation3 + $0xc0] sm:$0xff] %vm889_vm5, %v794_v50  ;;  %8021 = vmatprep.mubr.msk.bf16.mxu0 %vm587_vm2, %v3332_v49  ;;  %v698_v59 = vpop.f32.mrf.mxu0  ;;  %v3372_v49 = vsel %vm1112_vm3, %v3367_v37, %v3371_v34  ;;  %v3381_v50 = vshrl.u32 %v8399_v19, 16  ;;  %v3397_v6 = vshrl.u32 %v8403_v45, 16  ;;  %v4028_v34 = vrot.slane %v8410_v25, 1 }
  0xe5   : > { %v7820_v58 = vpop.f32.mrf.mxu1  ;;  %890 = vst.msk [vmem:[#allocation3] sm:$0xff] %vm889_vm5, %v698_v59 }
  0xe6   : > { %917 = vst.msk [vmem:[#allocation3 + $0xd8] sm:$0xff] %vm889_vm5, %v7820_v58  ;;  %v7796_v0 = vpop.f32.mrf.mxu0  ;;  %v3387_v58 = vrot.slane %v3385_v48, 1  ;;  %v3383_v59 = vor.u32 %v3381_v50, %v3379_v43  ;;  %v8409_v43 = vld [vmem:[#allocation2 + $0x20] sm:$0xff]  }
  0xe7   : > { %v797_v63 = vpop.f32.mrf.mxu1  ;;  %893 = vst.msk [vmem:[#allocation3 + $0x18] sm:$0xff] %vm889_vm5, %v7796_v0 }
  0xe8   : > { %915 = vst.msk [vmem:[#allocation3 + $0xc8] sm:$0xff] %vm889_vm5, %v797_v63  ;;  %v701_v4 = vpop.f32.mrf.mxu0  ;;  %v3391_v63 = vor.u32 %v3389_v54, %v3387_v58 }
  0xe9   : > { %v7823_v3 = vpop.f32.mrf.mxu1  ;;  %7972 = vmatmul.mubr.msk.bf16.gmra.mxu1 %vm587_vm2, %v8386_v55  ;;  %891 = vst.msk [vmem:[#allocation3 + $0x8] sm:$0xff] %vm889_vm5, %v701_v4  ;;  %v3393_v55 = vshll.u32 %v8403_v45, 16  ;;  %v8406_v4 = vld [vmem:[#allocation2 + $0x14] sm:$0xff]  }
  0xea   : > { %920 = vst.msk [vmem:[#allocation3 + $0xf0] sm:$0xff] %vm889_vm5, %v7823_v3  ;;  %7975 = vmatprep.mubr.msk.bf16.mxu1 %vm587_vm2, %v8389_v62  ;;  %v7799_v9 = vpop.f32.mrf.mxu0  ;;  %v8398_v62 = vld [vmem:[#allocation2 + $0xb4] sm:$0xff]   ;;  %v8405_v3 = vld [vmem:[#allocation2 + $0xc] sm:$0xfe]  }
  0xeb   : > { %v810_v8 = vpop.f32.mrf.mxu1  ;;  %8022 = vmatmul.mubr.msk.bf16.gmra.mxu0 %vm587_vm2, %v3340_v1  ;;  %896 = vst.msk [vmem:[#allocation3 + $0x30] sm:$0xff] %vm889_vm5, %v7799_v9  ;;  %v3395_v0 = vrot.slane %v3393_v55, 1 }
  0xec   : > { %918 = vst.msk [vmem:[#allocation3 + $0xe0] sm:$0xff] %vm889_vm5, %v810_v8  ;;  %8025 = vmatprep.mubr.msk.bf16.mxu0 %vm587_vm2, %v3348_v5  ;;  %v714_v14 = vpop.f32.mrf.mxu0  ;;  %v3388_v5 = vsel %vm1112_vm3, %v3383_v59, %v3387_v58  ;;  %v1609_v54 = vld [vmem:[#allocation3] sm:$0xff] }
  0xed   : > { %v7824_v13 = vpop.f32.mrf.mxu1  ;;  %894 = vst.msk [vmem:[#allocation3 + $0x20] sm:$0xff] %vm889_vm5, %v714_v14  ;;  %v3396_v10 = vsel %vm1112_vm3, %v3391_v63, %v3395_v0  ;;  %v4024_v14 = vrot.slane %v8406_v4, 1  ;;  %v8416_v4 = vld [vmem:[#allocation2 + $0x38] sm:$0xff]  }
  0xee   : > { %921 = vst.msk [vmem:[#allocation3 + $0xf8] sm:$0xff] %vm889_vm5, %v7824_v13  ;;  %v7800_v22 = vpop.f32.mrf.mxu0  ;;  %v4023_v13 = vrot.slane %v8405_v3, 1  ;;  %v1612_v58 = vld [vmem:[#allocation3 + $0x18] sm:$0xff] }
  0xef   : > { %v813_v21 = vpop.f32.mrf.mxu1  ;;  %897 = vst.msk [vmem:[#allocation3 + $0x38] sm:$0xff] %vm889_vm5, %v7800_v22 }
  0xf0   : > { %919 = vst.msk [vmem:[#allocation3 + $0xe8] sm:$0xff] %vm889_vm5, %v813_v21  ;;  %v717_v44 = vpop.f32.mrf.mxu0  ;;  %v8407_v21 = vld [vmem:[#allocation2 + $0x1c] sm:$0xff]   ;;  %v1610_v63 = vld [vmem:[#allocation3 + $0x8] sm:$0xff] }
  0xf1   : > { %v7827_v26 = vpop.f32.mrf.mxu1  ;;  %7976 = vmatmul.mubr.msk.bf16.gmra.mxu1 %vm587_vm2, %v8390_v15  ;;  %895 = vst.msk [vmem:[#allocation3 + $0x28] sm:$0xff] %vm889_vm5, %v717_v44  ;;  %v3399_v15 = vor.u32 %v3397_v6, %v3395_v0  ;;  %v8408_v44 = vld [vmem:[#allocation2 + $0x18] sm:$0xff]   ;;  %v4026_v30 = vrot.slane %v8407_v21, 1 }
  0xf2   : > { %924 = vst.msk [vmem:[#allocation3 + $0x110] sm:$0xff] %vm889_vm5, %v7827_v26  ;;  %7979 = vmatprep.mubr.msk.bf16.mxu1 %vm587_vm2, %v8393_v20  ;;  %v7803_v32 = vpop.f32.mrf.mxu0  ;;  %v8402_v20 = vld [vmem:[#allocation2 + $0xc4] sm:$0xff]   ;;  %v1615_v6 = vld [vmem:[#allocation3 + $0x30] sm:$0xff] }
  0xf3   : > { %v826_v31 = vpop.f32.mrf.mxu1  ;;  %8026 = vmatmul.mubr.msk.bf16.gmra.mxu0 %vm587_vm2, %v3356_v24  ;;  %900 = vst.msk [vmem:[#allocation3 + $0x50] sm:$0xff] %vm889_vm5, %v7803_v32  ;;  %v4025_v24 = vsel %vm1927_vm4, %v4023_v13, %v4024_v14  ;;  %v3404_v26 = vsel %vm1112_vm3, %v3399_v15, %v3403_v16  ;;  %v4027_v37 = vsel %vm1927_vm4, %v4024_v14, %v4026_v30 }
  0xf4   : > { %922 = vst.msk [vmem:[#allocation3 + $0x100] sm:$0xff] %vm889_vm5, %v826_v31  ;;  %8029 = vmatprep.mubr.msk.bf16.mxu0 %vm587_vm2, %v3364_v27  ;;  %v730_v40 = vpop.f32.mrf.mxu0  ;;  %v4029_v45 = vsel %vm1927_vm4, %v4026_v30, %v4028_v34 }
  0xf5   : > { %v7828_v38 = vpop.f32.mrf.mxu1  ;;  %898 = vst.msk [vmem:[#allocation3 + $0x40] sm:$0xff] %vm889_vm5, %v730_v40 }
  0xf6   : > { %925 = vst.msk [vmem:[#allocation3 + $0x118] sm:$0xff] %vm889_vm5, %v7828_v38  ;;  %v7804_v47 = vpop.f32.mrf.mxu0  ;;  %v8411_v38 = vld [vmem:[#allocation2 + $0x2c] sm:$0xff]   ;;  %v1616_v21 = vld [vmem:[#allocation3 + $0x38] sm:$0xff] }
  0xf7   : > { %v829_v46 = vpop.f32.mrf.mxu1  ;;  %901 = vst.msk [vmem:[#allocation3 + $0x58] sm:$0xff] %vm889_vm5, %v7804_v47  ;;  %v8412_v47 = vld [vmem:[#allocation2 + $0x28] sm:$0xff]   ;;  %v4030_v18 = vrot.slane %v8411_v38, 1 }
  0xf8   : > { %923 = vst.msk [vmem:[#allocation3 + $0x108] sm:$0xff] %vm889_vm5, %v829_v46  ;;  %v733_v52 = vpop.f32.mrf.mxu0  ;;  %v9024_v46 = vld [vmem:[#allocation2 + $0x34] sm:$0xff]   ;;  %v1614_v30 = vld [vmem:[#allocation3 + $0x28] sm:$0xff] }
  0xf9   : > { %v7831_v51 = vpop.f32.mrf.mxu1  ;;  %7980 = vmatmul.mubr.msk.bf16.gmra.mxu1 %vm587_vm2, %v8394_v36  ;;  %899 = vst.msk [vmem:[#allocation3 + $0x48] sm:$0xff] %vm889_vm5, %v733_v52 }
  0xfa   : > { %928 = vst.msk [vmem:[#allocation3 + $0x130] sm:$0xff] %vm889_vm5, %v7831_v51  ;;  %7983 = vmatprep.mubr.msk.bf16.mxu1 %vm587_vm2, %v8397_v41  ;;  %v7807_v57 = vpop.f32.mrf.mxu0  ;;  %v6240_v51 = vsel %vm660_vm0, %v8896_v39, 0 }
  0xfb   : > { %v842_v56 = vpop.f32.mrf.mxu1  ;;  %8030 = vmatmul.mubr.msk.bf16.gmra.mxu0 %vm587_vm2, %v3372_v49  ;;  %904 = vst.msk [vmem:[#allocation3 + $0x70] sm:$0xff] %vm889_vm5, %v7807_v57  ;;  %v1611_v49 = vld [vmem:[#allocation3 + $0x10] sm:$0xff] }
  0xfc   : > { %926 = vst.msk [vmem:[#allocation3 + $0x120] sm:$0xff] %vm889_vm5, %v842_v56  ;;  %8033 = vmatprep.mubr.msk.bf16.mxu0 %vm587_vm2, %v3380_v53  ;;  %v746_v29 = vpop.f32.mrf.mxu0  ;;  %v4032_v56 = vrot.slane %v9024_v46, 1 }
  0xfd   : > { %v7832_v61 = vpop.f32.mrf.mxu1  ;;  %902 = vst.msk [vmem:[#allocation3 + $0x60] sm:$0xff] %vm889_vm5, %v746_v29  ;;  %v4031_v29 = vsel %vm1927_vm4, %v4028_v34, %v4030_v18 }
  0xfe   : > { %929 = vst.msk [vmem:[#allocation3 + $0x138] sm:$0xff] %vm889_vm5, %v7832_v61  ;;  %v7808_v2 = vpop.f32.mrf.mxu0 }
  0xff   : > { %v845_v1 = vpop.f32.mrf.mxu1  ;;  %905 = vst.msk [vmem:[#allocation3 + $0x78] sm:$0xff] %vm889_vm5, %v7808_v2  ;;  %v9040_v2 = vld [vmem:[#allocation2 + $0x44] sm:$0xff]  }
 0x100   : > { %927 = vst.msk [vmem:[#allocation3 + $0x128] sm:$0xff] %vm889_vm5, %v845_v1  ;;  %v749_v9 = vpop.f32.mrf.mxu0  ;;  %v4033_v1 = vsel %vm1927_vm4, %v4030_v18, %v4032_v56  ;;  %v4036_v14 = vrot.slane %v9040_v2, 1  ;;  %v8423_v18 = vld [vmem:[#allocation2 + $0x5c] sm:$0xff]  }
 0x101   : > { %v7835_v8 = vpop.f32.mrf.mxu1  ;;  %7984 = vmatmul.mubr.msk.bf16.gmra.mxu1 %vm587_vm2, %v8398_v62  ;;  %903 = vst.msk [vmem:[#allocation3 + $0x68] sm:$0xff] %vm889_vm5, %v749_v9  ;;  %v1613_v9 = vld [vmem:[#allocation3 + $0x20] sm:$0xff] }
 0x102   : > { %932 = vst.msk [vmem:[#allocation3 + $0x150] sm:$0xff] %vm889_vm5, %v7835_v8  ;;  %7987 = vmatprep.mubr.msk.bf16.mxu1 %vm587_vm2, %v8401_v33  ;;  %v7811_v12 = vpop.f32.mrf.mxu0  ;;  %v8413_v33 = vld [vmem:[#allocation2 + $0x30] sm:$0xff]   ;;  %v8424_v2 = vld [vmem:[#allocation2 + $0x58] sm:$0xff]  }
 0x103   : > { %v858_v11 = vpop.f32.mrf.mxu1  ;;  %8034 = vmatmul.mubr.msk.bf16.gmra.mxu0 %vm587_vm2, %v3388_v5  ;;  %908 = vst.msk [vmem:[#allocation3 + $0x90] sm:$0xff] %vm889_vm5, %v7811_v12 }
 0x104   : > { %930 = vst.msk [vmem:[#allocation3 + $0x140] sm:$0xff] %vm889_vm5, %v858_v11  ;;  %8037 = vmatprep.mubr.msk.bf16.mxu0 %vm587_vm2, %v3396_v10  ;;  %v762_v19 = vpop.f32.mrf.mxu0  ;;  %v4034_v10 = vrot.slane %v8415_v60, 1 }
 0x105   : > { %v7836_v17 = vpop.f32.mrf.mxu1  ;;  %906 = vst.msk [vmem:[#allocation3 + $0x80] sm:$0xff] %vm889_vm5, %v762_v19 }
 0x106   : > { %933 = vst.msk [vmem:[#allocation3 + $0x158] sm:$0xff] %vm889_vm5, %v7836_v17  ;;  %v7812_v23 = vpop.f32.mrf.mxu0  ;;  %v8419_v17 = vld [vmem:[#allocation2 + $0x4c] sm:$0xff]  }
 0x107   : > { %v861_v22 = vpop.f32.mrf.mxu1  ;;  %909 = vst.msk [vmem:[#allocation3 + $0x98] sm:$0xff] %vm889_vm5, %v7812_v23  ;;  %v8417_v23 = vld [vmem:[#allocation2 + $0x40] sm:$0xff]   ;;  %v4038_v46 = vrot.slane %v8419_v17, 1  ;;  %v8427_v17 = vld [vmem:[#allocation2 + $0x6c] sm:$0xff]  }
 0x108   : > { %931 = vst.msk [vmem:[#allocation3 + $0x148] sm:$0xff] %vm889_vm5, %v861_v22  ;;  %v765_v28 = vpop.f32.mrf.mxu0 }
 0x109   : > { %v7839_v27 = vpop.f32.mrf.mxu1  ;;  %7988 = vmatmul.mubr.msk.bf16.gmra.mxu1 %vm587_vm2, %v8402_v20  ;;  %907 = vst.msk [vmem:[#allocation3 + $0x88] sm:$0xff] %vm889_vm5, %v765_v28 }
 0x10a   : > { %936 = vst.msk [vmem:[#allocation3 + $0x170] sm:$0xff] %vm889_vm5, %v7839_v27  ;;  %8043 = vmatprep.mubr.msk.bf16.mxu1 %vm587_vm2, %v4025_v24  ;;  %v7815_v32 = vpop.f32.mrf.mxu0  ;;  %v9050_v24 = vld [vmem:[#allocation2 + $0x54] sm:$0xff]  }
 0x10b   : > { %v874_v31 = vpop.f32.mrf.mxu1  ;;  %8038 = vmatmul.mubr.msk.bf16.gmra.mxu0 %vm587_vm2, %v3404_v26  ;;  %912 = vst.msk [vmem:[#allocation3 + $0xb0] sm:$0xff] %vm889_vm5, %v7815_v32  ;;  %v4037_v32 = vsel %vm1927_vm4, %v4034_v10, %v4036_v14 }
 0x10c   : > { %934 = vst.msk [vmem:[#allocation3 + $0x160] sm:$0xff] %vm889_vm5, %v874_v31  ;;  %8093 = vmatprep.mubr.msk.bf16.mxu0 %vm587_vm2, %v8408_v44  ;;  %v778_v36 = vpop.f32.mrf.mxu0  ;;  %v4035_v44 = vsel %vm1927_vm4, %v4032_v56, %v4034_v10 }
 0x10d   : > { %v7840_v35 = vpop.f32.mrf.mxu1  ;;  %910 = vst.msk [vmem:[#allocation3 + $0xa0] sm:$0xff] %vm889_vm5, %v778_v36  ;;  %v1619_v36 = vld [vmem:[#allocation3 + $0x50] sm:$0xff] }
 0x10e   : > { %937 = vst.msk [vmem:[#allocation3 + $0x178] sm:$0xff] %vm889_vm5, %v7840_v35  ;;  %v7816_v41 = vpop.f32.mrf.mxu0 }
 0x10f   : > { %v877_v40 = vpop.f32.mrf.mxu1  ;;  %913 = vst.msk [vmem:[#allocation3 + $0xb8] sm:$0xff] %vm889_vm5, %v7816_v41 }
 0x110   : > { %935 = vst.msk [vmem:[#allocation3 + $0x168] sm:$0xff] %vm889_vm5, %v877_v40  ;;  %v781_v50 = vpop.f32.mrf.mxu0 }
 0x111   : > { %v7845_v48 = vpop.f32.mrf.mxu1  ;;  %8044 = vmatmul.mubr.msk.bf16.vlgmr.msra.gmra.mxu1 %vm587_vm2, %v4027_v37  ;;  %911 = vst.msk [vmem:[#allocation3 + $0xa8] sm:$0xff] %vm889_vm5, %v781_v50  ;;  %v8420_v37 = vld [vmem:[#allocation2 + $0x48] sm:$0xff]   ;;  %v4040_v50 = vrot.slane %v9050_v24, 1 }
 0x112   : > { %v1659_v52 = vadd.f32 %v7845_v48, %v1611_v49  ;;  %8142 = vmatpush3.bf16.msra.mxu1 %v5573_v42  ;;  %8047 = vmatprep.mubr.msk.bf16.mxu1 %vm587_vm2, %v4029_v45  ;;  %v1617_v45 = vld [vmem:[#allocation3 + $0x40] sm:$0xff] }
 0x113   : > { %v1418_v53 = vpop.f32.mrf.mxu1  ;;  %v7895_v55 = vpop.f32.mrf.mxu0  ;;  %8094 = vmatmul.mubr.msk.bf16.vlgmr.msra.gmra.mxu0 %vm587_vm2, %v8409_v43 }
 0x114   : > { %1707 = vst.msk [vmem:[#allocation3 + $0x10] sm:$0xff] %vm889_vm5, %v1659_v52  ;;  %v1657_v57 = vadd.f32 %v1609_v54, %v1418_v53  ;;  %8192 = vmatpush3.bf16.msra.mxu0 %v6240_v51  ;;  %8097 = vmatprep.mubr.msk.bf16.mxu0 %vm587_vm2, %v8412_v47 }
 0x115   : > { %v7846_v39 = vpop.f32.mrf.mxu1  ;;  %v2086_v59 = vpop.f32.mrf.mxu0 }
 0x116   : > { %1705 = vst.msk [vmem:[#allocation3] sm:$0xff] %vm889_vm5, %v1657_v57  ;;  %v1660_v61 = vadd.f32 %v7846_v39, %v1612_v58  ;;  %v8421_v57 = vld [vmem:[#allocation2 + $0x50] sm:$0xff]  }
 0x117   : > { %v1421_v62 = vpop.f32.mrf.mxu1  ;;  %v7896_v0 = vpop.f32.mrf.mxu0 }
 0x118   : > { %1708 = vst.msk [vmem:[#allocation3 + $0x18] sm:$0xff] %vm889_vm5, %v1660_v61  ;;  %v1658_v3 = vadd.f32 %v1610_v63, %v1421_v62  ;;  %v4041_v63 = vsel %vm1927_vm4, %v4038_v46, %v4040_v50 }
 0x119   : > { %v7849_v5 = vpop.f32.mrf.mxu1  ;;  %8048 = vmatmul.mubr.msk.bf16.gmra.mxu1 %vm587_vm2, %v4031_v29  ;;  %v2089_v7 = vpop.f32.mrf.mxu0  ;;  %v1618_v29 = vld [vmem:[#allocation3 + $0x48] sm:$0xff] }
 0x11a   : > { %1706 = vst.msk [vmem:[#allocation3 + $0x8] sm:$0xff] %vm889_vm5, %v1658_v3  ;;  %v1663_v8 = vadd.f32 %v7849_v5, %v1615_v6  ;;  %8051 = vmatprep.mubr.msk.bf16.mxu1 %vm587_vm2, %v4033_v1  ;;  %v1623_v5 = vld [vmem:[#allocation3 + $0x70] sm:$0xff] }
 0x11b   : > { %v2279_v11 = vld [vmem:[#allocation3 + $0x10] sm:$0xff]  ;;  %v1434_v12 = vpop.f32.mrf.mxu1  ;;  %v7899_v13 = vpop.f32.mrf.mxu0  ;;  %8098 = vmatmul.mubr.msk.bf16.gmra.mxu0 %vm587_vm2, %v8413_v33 }
 0x11c   : > { %v2327_v15 = vadd.f32 %v7895_v55, %v2279_v11  ;;  %1711 = vst.msk [vmem:[#allocation3 + $0x30] sm:$0xff] %vm889_vm5, %v1663_v8  ;;  %v1661_v16 = vadd.f32 %v1613_v9, %v1434_v12  ;;  %8101 = vmatprep.mubr.msk.bf16.mxu0 %vm587_vm2, %v8416_v4  ;;  %v1620_v55 = vld [vmem:[#allocation3 + $0x58] sm:$0xff]  ;;  %v4042_v9 = vrot.slane %v8423_v18, 1  ;;  %v1621_v12 = vld [vmem:[#allocation3 + $0x60] sm:$0xff] }
 0x11d   : > { %v2277_v19 = vld [vmem:[#allocation3] sm:$0xff]  ;;  %v7850_v20 = vpop.f32.mrf.mxu1  ;;  %v2102_v22 = vpop.f32.mrf.mxu0 }
 0x11e   : > { %2375 = vst.msk [vmem:[#allocation3 + $0x10] sm:$0xff] %vm889_vm5, %v2327_v15  ;;  %v2325_v25 = vadd.f32 %v2277_v19, %v2086_v59  ;;  %1709 = vst.msk [vmem:[#allocation3 + $0x20] sm:$0xff] %vm889_vm5, %v1661_v16  ;;  %v1664_v26 = vadd.f32 %v7850_v20, %v1616_v21  ;;  %v4039_v59 = vsel %vm1927_vm4, %v4036_v14, %v4038_v46  ;;  %v1624_v21 = vld [vmem:[#allocation3 + $0x78] sm:$0xff] }
 0x11f   : > { %v2280_v27 = vld [vmem:[#allocation3 + $0x18] sm:$0xff]  ;;  %v1437_v28 = vpop.f32.mrf.mxu1  ;;  %v7900_v31 = vpop.f32.mrf.mxu0 }
 0x120   : > { %2373 = vst.msk [vmem:[#allocation3] sm:$0xff] %vm889_vm5, %v2325_v25  ;;  %v2328_v34 = vadd.f32 %v7896_v0, %v2280_v27  ;;  %1712 = vst.msk [vmem:[#allocation3 + $0x38] sm:$0xff] %vm889_vm5, %v1664_v26  ;;  %v1662_v35 = vadd.f32 %v1614_v30, %v1437_v28  ;;  %v9071_v0 = vld [vmem:[#allocation2 + $0x64] sm:$0xff]   ;;  %v4043_v26 = vsel %vm1927_vm4, %v4040_v50, %v4042_v9 }
 0x121   : > { %v2278_v38 = vld [vmem:[#allocation3 + $0x8] sm:$0xff]  ;;  %v7853_v40 = vpop.f32.mrf.mxu1  ;;  %8052 = vmatmul.mubr.msk.bf16.gmra.mxu1 %vm587_vm2, %v4035_v44  ;;  %v2105_v41 = vpop.f32.mrf.mxu0  ;;  %v4044_v14 = vrot.slane %v9071_v0, 1 }
 0x122   : > { %2376 = vst.msk [vmem:[#allocation3 + $0x18] sm:$0xff] %vm889_vm5, %v2328_v34  ;;  %v2326_v42 = vadd.f32 %v2278_v38, %v2089_v7  ;;  %1710 = vst.msk [vmem:[#allocation3 + $0x28] sm:$0xff] %vm889_vm5, %v1662_v35  ;;  %v1667_v43 = vadd.f32 %v7853_v40, %v1619_v36  ;;  %8055 = vmatprep.mubr.msk.bf16.mxu1 %vm587_vm2, %v4037_v32  ;;  %v1622_v28 = vld [vmem:[#allocation3 + $0x68] sm:$0xff]  ;;  %v9088_v32 = vld [vmem:[#allocation2 + $0x74] sm:$0xff]  }
 0x123   : > { %v2283_v47 = vld [vmem:[#allocation3 + $0x30] sm:$0xff]  ;;  %v1450_v48 = vpop.f32.mrf.mxu1  ;;  %v7903_v49 = vpop.f32.mrf.mxu0  ;;  %8102 = vmatmul.mubr.msk.bf16.gmra.mxu0 %vm587_vm2, %v8417_v23  ;;  %v8425_v23 = vld [vmem:[#allocation2 + $0x60] sm:$0xff]   ;;  %v4048_v50 = vrot.slane %v9088_v32, 1 }
 0x124   : > { %2374 = vst.msk [vmem:[#allocation3 + $0x8] sm:$0xff] %vm889_vm5, %v2326_v42  ;;  %v2331_v51 = vadd.f32 %v7899_v13, %v2283_v47  ;;  %1715 = vst.msk [vmem:[#allocation3 + $0x50] sm:$0xff] %vm889_vm5, %v1667_v43  ;;  %v1665_v52 = vadd.f32 %v1617_v45, %v1450_v48  ;;  %8105 = vmatprep.mubr.msk.bf16.mxu0 %vm587_vm2, %v8420_v37  ;;  %v8428_v36 = vld [vmem:[#allocation2 + $0x68] sm:$0xff]   ;;  %v4046_v45 = vrot.slane %v8427_v17, 1  ;;  %v1625_v48 = vld [vmem:[#allocation3 + $0x80] sm:$0xff]  ;;  %v8529_v17 = vmov 0  }
 0x125   : > { %v2281_v53 = vld [vmem:[#allocation3 + $0x20] sm:$0xff]  ;;  %v7854_v54 = vpop.f32.mrf.mxu1  ;;  %v2118_v56 = vpop.f32.mrf.mxu0  ;;  %v1627_v40 = vld [vmem:[#allocation3 + $0x90] sm:$0xff]  ;;  %v9105_v0 = vld [vmem:[#allocation2 + $0x84] sm:$0xff]   ;;  %417 = vst.msk [vmem:[#allocation2 + $0xd8] sm:$0xf] %vm356_vm1, %v8529_v17 }
 0x126   : > { %2379 = vst.msk [vmem:[#allocation3 + $0x30] sm:$0xff] %vm889_vm5, %v2331_v51  ;;  %v2329_v39 = vadd.f32 %v2281_v53, %v2102_v22  ;;  %1713 = vst.msk [vmem:[#allocation3 + $0x40] sm:$0xff] %vm889_vm5, %v1665_v52  ;;  %v1668_v58 = vadd.f32 %v7854_v54, %v1620_v55  ;;  %v1628_v54 = vld [vmem:[#allocation3 + $0x98] sm:$0xff] }
 0x127   : > { %v2284_v60 = vld [vmem:[#allocation3 + $0x38] sm:$0xff]  ;;  %v1453_v61 = vpop.f32.mrf.mxu1  ;;  %v7904_v62 = vpop.f32.mrf.mxu0 }
 0x128   : > { %2377 = vst.msk [vmem:[#allocation3 + $0x20] sm:$0xff] %vm889_vm5, %v2329_v39  ;;  %v2332_v33 = vadd.f32 %v7900_v31, %v2284_v60  ;;  %1716 = vst.msk [vmem:[#allocation3 + $0x58] sm:$0xff] %vm889_vm5, %v1668_v58  ;;  %v1666_v1 = vadd.f32 %v1618_v29, %v1453_v61  ;;  %v4045_v31 = vsel %vm1927_vm4, %v4042_v9, %v4044_v14  ;;  %v8429_v58 = vld [vmem:[#allocation2 + $0x70] sm:$0xff]   ;;  %v1626_v29 = vld [vmem:[#allocation3 + $0x88] sm:$0xff] }
 0x129   : > { %v2282_v3 = vld [vmem:[#allocation3 + $0x28] sm:$0xff]  ;;  %v7857_v4 = vpop.f32.mrf.mxu1  ;;  %8056 = vmatmul.mubr.msk.bf16.gmra.mxu1 %vm587_vm2, %v4039_v59  ;;  %v2121_v6 = vpop.f32.mrf.mxu0  ;;  %v4047_v39 = vsel %vm1927_vm4, %v4044_v14, %v4046_v45  ;;  %v8431_v59 = vld [vmem:[#allocation2 + $0x7c] sm:$0xff]   ;;  %v4052_v14 = vrot.slane %v9105_v0, 1 }
 0x12a   : > { %2380 = vst.msk [vmem:[#allocation3 + $0x38] sm:$0xff] %vm889_vm5, %v2332_v33  ;;  %v2330_v7 = vadd.f32 %v2282_v3, %v2105_v41  ;;  %1714 = vst.msk [vmem:[#allocation3 + $0x48] sm:$0xff] %vm889_vm5, %v1666_v1  ;;  %v1671_v8 = vadd.f32 %v7857_v4, %v1623_v5  ;;  %8059 = vmatprep.mubr.msk.bf16.mxu1 %vm587_vm2, %v4041_v63  ;;  %v4049_v63 = vsel %vm1927_vm4, %v4046_v45, %v4048_v50  ;;  %v1631_v5 = vld [vmem:[#allocation3 + $0xb0] sm:$0xff] }
 0x12b   : > { %v2287_v10 = vld [vmem:[#allocation3 + $0x50] sm:$0xff]  ;;  %v1466_v11 = vpop.f32.mrf.mxu1  ;;  %v7907_v13 = vpop.f32.mrf.mxu0  ;;  %8106 = vmatmul.mubr.msk.bf16.gmra.mxu0 %vm587_vm2, %v8421_v57  ;;  %v4050_v9 = vrot.slane %v8431_v59, 1 }
 0x12c   : > { %2378 = vst.msk [vmem:[#allocation3 + $0x28] sm:$0xff] %vm889_vm5, %v2330_v7  ;;  %v2335_v15 = vadd.f32 %v7903_v49, %v2287_v10  ;;  %1719 = vst.msk [vmem:[#allocation3 + $0x70] sm:$0xff] %vm889_vm5, %v1671_v8  ;;  %v1669_v16 = vadd.f32 %v1621_v12, %v1466_v11  ;;  %8109 = vmatprep.mubr.msk.bf16.mxu0 %vm587_vm2, %v8424_v2  ;;  %v8432_v2 = vld [vmem:[#allocation2 + $0x78] sm:$0xff]   ;;  %v8437_v59 = vld [vmem:[#allocation2 + $0x90] sm:$0xff]  }
 0x12d   : > { %v2285_v19 = vld [vmem:[#allocation3 + $0x40] sm:$0xff]  ;;  %v7858_v20 = vpop.f32.mrf.mxu1  ;;  %v2134_v22 = vpop.f32.mrf.mxu0  ;;  %v4053_v32 = vsel %vm1927_vm4, %v4050_v9, %v4052_v14 }
 0x12e   : > { %2383 = vst.msk [vmem:[#allocation3 + $0x50] sm:$0xff] %vm889_vm5, %v2335_v15  ;;  %v2333_v24 = vadd.f32 %v2285_v19, %v2118_v56  ;;  %1717 = vst.msk [vmem:[#allocation3 + $0x60] sm:$0xff] %vm889_vm5, %v1669_v16  ;;  %v1672_v25 = vadd.f32 %v7858_v20, %v1624_v21  ;;  %v1629_v12 = vld [vmem:[#allocation3 + $0xa0] sm:$0xff]  ;;  %v1632_v21 = vld [vmem:[#allocation3 + $0xb8] sm:$0xff] }
 0x12f   : > { %v2288_v44 = vld [vmem:[#allocation3 + $0x58] sm:$0xff]  ;;  %v1469_v27 = vpop.f32.mrf.mxu1  ;;  %v7908_v30 = vpop.f32.mrf.mxu0 }
 0x130   : > { %2381 = vst.msk [vmem:[#allocation3 + $0x40] sm:$0xff] %vm889_vm5, %v2333_v24  ;;  %v2336_v34 = vadd.f32 %v7904_v62, %v2288_v44  ;;  %1720 = vst.msk [vmem:[#allocation3 + $0x78] sm:$0xff] %vm889_vm5, %v1672_v25  ;;  %v1670_v35 = vadd.f32 %v1622_v28, %v1469_v27  ;;  %v4051_v25 = vsel %vm1927_vm4, %v4048_v50, %v4050_v9  ;;  %v8435_v44 = vld [vmem:[#allocation2 + $0x8c] sm:$0xff]  }
 0x131   : > { %v2286_v37 = vld [vmem:[#allocation3 + $0x48] sm:$0xff]  ;;  %v7861_v38 = vpop.f32.mrf.mxu1  ;;  %8060 = vmatmul.mubr.msk.bf16.gmra.mxu1 %vm587_vm2, %v4043_v26  ;;  %v2137_v41 = vpop.f32.mrf.mxu0 }
 0x132   : > { %2384 = vst.msk [vmem:[#allocation3 + $0x58] sm:$0xff] %vm889_vm5, %v2336_v34  ;;  %v2334_v42 = vadd.f32 %v2286_v37, %v2121_v6  ;;  %1718 = vst.msk [vmem:[#allocation3 + $0x68] sm:$0xff] %vm889_vm5, %v1670_v35  ;;  %v1675_v43 = vadd.f32 %v7861_v38, %v1627_v40  ;;  %8063 = vmatprep.mubr.msk.bf16.mxu1 %vm587_vm2, %v4045_v31  ;;  %v8433_v26 = vld [vmem:[#allocation2 + $0x80] sm:$0xff]   ;;  %v9123_v34 = vld [vmem:[#allocation2 + $0x94] sm:$0xff]  }
 0x133   : > { %v2291_v46 = vld [vmem:[#allocation3 + $0x70] sm:$0xff]  ;;  %v1482_v47 = vpop.f32.mrf.mxu1  ;;  %v7911_v49 = vpop.f32.mrf.mxu0  ;;  %8110 = vmatmul.mubr.msk.bf16.gmra.mxu0 %vm587_vm2, %v8425_v23 }
 0x134   : > { %2382 = vst.msk [vmem:[#allocation3 + $0x48] sm:$0xff] %vm889_vm5, %v2334_v42  ;;  %v2339_v51 = vadd.f32 %v7907_v13, %v2291_v46  ;;  %1723 = vst.msk [vmem:[#allocation3 + $0x90] sm:$0xff] %vm889_vm5, %v1675_v43  ;;  %v1673_v52 = vadd.f32 %v1625_v48, %v1482_v47  ;;  %8113 = vmatprep.mubr.msk.bf16.mxu0 %vm587_vm2, %v8428_v36  ;;  %v8436_v37 = vld [vmem:[#allocation2 + $0x88] sm:$0xff]   ;;  %v4054_v46 = vrot.slane %v8435_v44, 1 }
 0x135   : > { %v2289_v18 = vld [vmem:[#allocation3 + $0x60] sm:$0xff]  ;;  %v7862_v53 = vpop.f32.mrf.mxu1  ;;  %v2150_v55 = vpop.f32.mrf.mxu0  ;;  %v8443_v44 = vld [vmem:[#allocation2 + $0xac] sm:$0xff]  }
 0x136   : > { %2387 = vst.msk [vmem:[#allocation3 + $0x70] sm:$0xff] %vm889_vm5, %v2339_v51  ;;  %v2337_v56 = vadd.f32 %v2289_v18, %v2134_v22  ;;  %1721 = vst.msk [vmem:[#allocation3 + $0x80] sm:$0xff] %vm889_vm5, %v1673_v52  ;;  %v1676_v57 = vadd.f32 %v7862_v53, %v1628_v54  ;;  %v4056_v51 = vrot.slane %v9123_v34, 1  ;;  %v9157_v34 = vld [vmem:[#allocation2 + $0xb4] sm:$0xff]  }
 0x137   : > { %v2292_v60 = vld [vmem:[#allocation3 + $0x78] sm:$0xff]  ;;  %v1485_v61 = vpop.f32.mrf.mxu1  ;;  %v7912_v62 = vpop.f32.mrf.mxu0 }
 0x138   : > { %2385 = vst.msk [vmem:[#allocation3 + $0x60] sm:$0xff] %vm889_vm5, %v2337_v56  ;;  %v2340_v33 = vadd.f32 %v7908_v30, %v2292_v60  ;;  %1724 = vst.msk [vmem:[#allocation3 + $0x98] sm:$0xff] %vm889_vm5, %v1676_v57  ;;  %v1674_v1 = vadd.f32 %v1626_v29, %v1485_v61  ;;  %v1630_v30 = vld [vmem:[#allocation3 + $0xa8] sm:$0xff]  ;;  %v8439_v60 = vld [vmem:[#allocation2 + $0x9c] sm:$0xff]   ;;  %v4057_v0 = vsel %vm1927_vm4, %v4054_v46, %v4056_v51 }
 0x139   : > { %v2290_v3 = vld [vmem:[#allocation3 + $0x68] sm:$0xff]  ;;  %v7865_v4 = vpop.f32.mrf.mxu1  ;;  %8064 = vmatmul.mubr.msk.bf16.gmra.mxu1 %vm587_vm2, %v4047_v39  ;;  %v2153_v6 = vpop.f32.mrf.mxu0 }
 0x13a   : > { %2388 = vst.msk [vmem:[#allocation3 + $0x78] sm:$0xff] %vm889_vm5, %v2340_v33  ;;  %v2338_v7 = vadd.f32 %v2290_v3, %v2137_v41  ;;  %1722 = vst.msk [vmem:[#allocation3 + $0x88] sm:$0xff] %vm889_vm5, %v1674_v1  ;;  %v1679_v8 = vadd.f32 %v7865_v4, %v1631_v5  ;;  %8067 = vmatprep.mubr.msk.bf16.mxu1 %vm587_vm2, %v4049_v63  ;;  %v1635_v41 = vld [vmem:[#allocation3 + $0xd0] sm:$0xff]  ;;  %v9140_v33 = vld [vmem:[#allocation2 + $0xa4] sm:$0xff]  }
 0x13b   : > { %v2295_v10 = vld [vmem:[#allocation3 + $0x90] sm:$0xff]  ;;  %v1498_v11 = vpop.f32.mrf.mxu1  ;;  %v7915_v13 = vpop.f32.mrf.mxu0  ;;  %8114 = vmatmul.mubr.msk.bf16.gmra.mxu0 %vm587_vm2, %v8429_v58  ;;  %v4055_v58 = vsel %vm1927_vm4, %v4052_v14, %v4054_v46  ;;  %v8440_v3 = vld [vmem:[#allocation2 + $0x98] sm:$0xff]   ;;  %v4062_v46 = vrot.slane %v8443_v44, 1 }
 0x13c   : > { %2386 = vst.msk [vmem:[#allocation3 + $0x68] sm:$0xff] %vm889_vm5, %v2338_v7  ;;  %v2343_v15 = vadd.f32 %v7911_v49, %v2295_v10  ;;  %1727 = vst.msk [vmem:[#allocation3 + $0xb0] sm:$0xff] %vm889_vm5, %v1679_v8  ;;  %v1677_v16 = vadd.f32 %v1629_v12, %v1498_v11  ;;  %8117 = vmatprep.mubr.msk.bf16.mxu0 %vm587_vm2, %v8432_v2  ;;  %v1633_v49 = vld [vmem:[#allocation3 + $0xc0] sm:$0xff]  ;;  %v4058_v10 = vrot.slane %v8439_v60, 1 }
 0x13d   : > { %v2293_v19 = vld [vmem:[#allocation3 + $0x80] sm:$0xff]  ;;  %v7866_v20 = vpop.f32.mrf.mxu1  ;;  %v2166_v22 = vpop.f32.mrf.mxu0 }
 0x13e   : > { %2391 = vst.msk [vmem:[#allocation3 + $0x90] sm:$0xff] %vm889_vm5, %v2343_v15  ;;  %v2341_v23 = vadd.f32 %v2293_v19, %v2150_v55  ;;  %1725 = vst.msk [vmem:[#allocation3 + $0xa0] sm:$0xff] %vm889_vm5, %v1677_v16  ;;  %v1680_v24 = vadd.f32 %v7866_v20, %v1632_v21  ;;  %v1636_v55 = vld [vmem:[#allocation3 + $0xd8] sm:$0xff]  ;;  %v4060_v15 = vrot.slane %v9140_v33, 1  ;;  %v8447_v60 = vld [vmem:[#allocation2 + $0xbc] sm:$0xff]  }
 0x13f   : > { %v2296_v27 = vld [vmem:[#allocation3 + $0x98] sm:$0xff]  ;;  %v1501_v28 = vpop.f32.mrf.mxu1  ;;  %v7916_v31 = vpop.f32.mrf.mxu0 }
 0x140   : > { %2389 = vst.msk [vmem:[#allocation3 + $0x80] sm:$0xff] %vm889_vm5, %v2341_v23  ;;  %v2344_v35 = vadd.f32 %v7912_v62, %v2296_v27  ;;  %1728 = vst.msk [vmem:[#allocation3 + $0xb8] sm:$0xff] %vm889_vm5, %v1680_v24  ;;  %v1678_v36 = vadd.f32 %v1630_v30, %v1501_v28  ;;  %v1634_v62 = vld [vmem:[#allocation3 + $0xc8] sm:$0xff]  ;;  %v1640_v21 = vld [vmem:[#allocation3 + $0xf8] sm:$0xff] }
 0x141   : > { %v2294_v38 = vld [vmem:[#allocation3 + $0x88] sm:$0xff]  ;;  %v7869_v40 = vpop.f32.mrf.mxu1  ;;  %8068 = vmatmul.mubr.msk.bf16.gmra.mxu1 %vm587_vm2, %v4051_v25  ;;  %v2169_v42 = vpop.f32.mrf.mxu0  ;;  %v4059_v25 = vsel %vm1927_vm4, %v4056_v51, %v4058_v10  ;;  %v4064_v51 = vrot.slane %v9157_v34, 1 }
 0x142   : > { %2392 = vst.msk [vmem:[#allocation3 + $0x98] sm:$0xff] %vm889_vm5, %v2344_v35  ;;  %v2342_v43 = vadd.f32 %v2294_v38, %v2153_v6  ;;  %1726 = vst.msk [vmem:[#allocation3 + $0xa8] sm:$0xff] %vm889_vm5, %v1678_v36  ;;  %v1683_v45 = vadd.f32 %v7869_v40, %v1635_v41  ;;  %8071 = vmatprep.mubr.msk.bf16.mxu1 %vm587_vm2, %v4053_v32  ;;  %v1639_v6 = vld [vmem:[#allocation3 + $0xf0] sm:$0xff]  ;;  %v1638_v30 = vld [vmem:[#allocation3 + $0xe8] sm:$0xff]  ;;  %v4061_v32 = vsel %vm1927_vm4, %v4058_v10, %v4060_v15 }
 0x143   : > { %v2299_v47 = vld [vmem:[#allocation3 + $0xb0] sm:$0xff]  ;;  %v1514_v48 = vpop.f32.mrf.mxu1  ;;  %v7919_v50 = vpop.f32.mrf.mxu0  ;;  %8118 = vmatmul.mubr.msk.bf16.gmra.mxu0 %vm587_vm2, %v8433_v26  ;;  %v8441_v26 = vld [vmem:[#allocation2 + $0xa0] sm:$0xff]   ;;  %v4065_v33 = vsel %vm1927_vm4, %v4062_v46, %v4064_v51 }
 0x144   : > { %2390 = vst.msk [vmem:[#allocation3 + $0x88] sm:$0xff] %vm889_vm5, %v2342_v43  ;;  %v2347_v52 = vadd.f32 %v7915_v13, %v2299_v47  ;;  %1731 = vst.msk [vmem:[#allocation3 + $0xd0] sm:$0xff] %vm889_vm5, %v1683_v45  ;;  %v1681_v18 = vadd.f32 %v1633_v49, %v1514_v48  ;;  %8121 = vmatprep.mubr.msk.bf16.mxu0 %vm587_vm2, %v8436_v37  ;;  %v1637_v13 = vld [vmem:[#allocation3 + $0xe0] sm:$0xff]  ;;  %v8444_v37 = vld [vmem:[#allocation2 + $0xa8] sm:$0xff]  }
 0x145   : > { %v2297_v53 = vld [vmem:[#allocation3 + $0xa0] sm:$0xff]  ;;  %v7870_v54 = vpop.f32.mrf.mxu1  ;;  %v2182_v56 = vpop.f32.mrf.mxu0  ;;  %v1643_v41 = vld [vmem:[#allocation3 + $0x110] sm:$0xff] }
 0x146   : > { %2395 = vst.msk [vmem:[#allocation3 + $0xb0] sm:$0xff] %vm889_vm5, %v2347_v52  ;;  %v2345_v57 = vadd.f32 %v2297_v53, %v2166_v22  ;;  %1729 = vst.msk [vmem:[#allocation3 + $0xc0] sm:$0xff] %vm889_vm5, %v1681_v18  ;;  %v1684_v39 = vadd.f32 %v7870_v54, %v1636_v55  ;;  %v1641_v49 = vld [vmem:[#allocation3 + $0x100] sm:$0xff]  ;;  %v1644_v55 = vld [vmem:[#allocation3 + $0x118] sm:$0xff] }
 0x147   : > { %v2300_v61 = vld [vmem:[#allocation3 + $0xb8] sm:$0xff]  ;;  %v1517_v29 = vpop.f32.mrf.mxu1  ;;  %v7920_v63 = vpop.f32.mrf.mxu0 }
 0x148   : > { %2393 = vst.msk [vmem:[#allocation3 + $0xa0] sm:$0xff] %vm889_vm5, %v2345_v57  ;;  %v2348_v1 = vadd.f32 %v7916_v31, %v2300_v61  ;;  %1732 = vst.msk [vmem:[#allocation3 + $0xd8] sm:$0xff] %vm889_vm5, %v1684_v39  ;;  %v1682_v2 = vadd.f32 %v1634_v62, %v1517_v29  ;;  %v9173_v61 = vld [vmem:[#allocation2 + $0xc4] sm:$0xff]  }
 0x149   : > { %v2298_v4 = vld [vmem:[#allocation3 + $0xa8] sm:$0xff]  ;;  %v7873_v5 = vpop.f32.mrf.mxu1  ;;  %8072 = vmatmul.mubr.msk.bf16.gmra.mxu1 %vm587_vm2, %v4055_v58  ;;  %v2185_v7 = vpop.f32.mrf.mxu0  ;;  %v4063_v58 = vsel %vm1927_vm4, %v4060_v15, %v4062_v46  ;;  %v8457_v46 = vld [vmem:[#allocation2 + $0x18] sm:$0xfe]  }
 0x14a   : > { %2396 = vst.msk [vmem:[#allocation3 + $0xb8] sm:$0xff] %vm889_vm5, %v2348_v1  ;;  %v2346_v8 = vadd.f32 %v2298_v4, %v2169_v42  ;;  %1730 = vst.msk [vmem:[#allocation3 + $0xc8] sm:$0xff] %vm889_vm5, %v1682_v2  ;;  %v1687_v9 = vadd.f32 %v7873_v5, %v1639_v6  ;;  %8075 = vmatprep.mubr.msk.bf16.mxu1 %vm587_vm2, %v4057_v0  ;;  %v9176_v1 = vld [vmem:[#allocation2 + $0x18] sm:$0xff]  }
 0x14b   : > { %v2303_v11 = vld [vmem:[#allocation3 + $0xd0] sm:$0xff]  ;;  %v1530_v12 = vpop.f32.mrf.mxu1  ;;  %v7923_v14 = vpop.f32.mrf.mxu0  ;;  %8122 = vmatmul.mubr.msk.bf16.gmra.mxu0 %vm587_vm2, %v8437_v59  ;;  %v8448_v4 = vld [vmem:[#allocation2 + $0xb8] sm:$0xff]  }
 0x14c   : > { %2394 = vst.msk [vmem:[#allocation3 + $0xa8] sm:$0xff] %vm889_vm5, %v2346_v8  ;;  %v2351_v16 = vadd.f32 %v7919_v50, %v2303_v11  ;;  %1735 = vst.msk [vmem:[#allocation3 + $0xf0] sm:$0xff] %vm889_vm5, %v1687_v9  ;;  %v1685_v17 = vadd.f32 %v1637_v13, %v1530_v12  ;;  %8125 = vmatprep.mubr.msk.bf16.mxu0 %vm587_vm2, %v8440_v3  ;;  %v8445_v59 = vld [vmem:[#allocation2 + $0xb0] sm:$0xff]   ;;  %v4066_v11 = vrot.slane %v8447_v60, 1 }
 0x14d   : > { %v2301_v19 = vld [vmem:[#allocation3 + $0xc0] sm:$0xff]  ;;  %v7874_v20 = vpop.f32.mrf.mxu1  ;;  %v2198_v22 = vpop.f32.mrf.mxu0 }
 0x14e   : > { %2399 = vst.msk [vmem:[#allocation3 + $0xd0] sm:$0xff] %vm889_vm5, %v2351_v16  ;;  %v2349_v23 = vadd.f32 %v2301_v19, %v2182_v56  ;;  %1733 = vst.msk [vmem:[#allocation3 + $0xe0] sm:$0xff] %vm889_vm5, %v1685_v17  ;;  %v1688_v24 = vadd.f32 %v7874_v20, %v1640_v21  ;;  %v4068_v16 = vrot.slane %v9173_v61, 1  ;;  %v9186_v17 = vld [vmem:[#allocation2 + $0x20] sm:$0xff]   ;;  %v5307_v19 = vshll.u32 %v9176_v1, 16 }
 0x14f   : > { %v2304_v27 = vld [vmem:[#allocation3 + $0xd8] sm:$0xff]  ;;  %v1533_v28 = vpop.f32.mrf.mxu1  ;;  %v7924_v31 = vpop.f32.mrf.mxu0 }
 0x150   : > { %2397 = vst.msk [vmem:[#allocation3 + $0xc0] sm:$0xff] %vm889_vm5, %v2349_v23  ;;  %v2352_v35 = vadd.f32 %v7920_v63, %v2304_v27  ;;  %1736 = vst.msk [vmem:[#allocation3 + $0xf8] sm:$0xff] %vm889_vm5, %v1688_v24  ;;  %v1686_v36 = vadd.f32 %v1638_v30, %v1533_v28  ;;  %v1642_v63 = vld [vmem:[#allocation3 + $0x108] sm:$0xff]  ;;  %v1648_v24 = vld [vmem:[#allocation3 + $0x138] sm:$0xff]  ;;  %v4067_v27 = vsel %vm1927_vm4, %v4064_v51, %v4066_v11 }
 0x151   : > { %v2302_v38 = vld [vmem:[#allocation3 + $0xc8] sm:$0xff]  ;;  %v7877_v40 = vpop.f32.mrf.mxu1  ;;  %8076 = vmatmul.mubr.msk.bf16.gmra.mxu1 %vm587_vm2, %v4059_v25  ;;  %v2201_v42 = vpop.f32.mrf.mxu0  ;;  %v8451_v28 = vld [vmem:[#allocation2 + $0xcc] ss:$0 sps:$4 sm:$0x11]  }
 0x152   : > { %2400 = vst.msk [vmem:[#allocation3 + $0xd8] sm:$0xff] %vm889_vm5, %v2352_v35  ;;  %v2350_v43 = vadd.f32 %v2302_v38, %v2185_v7  ;;  %1734 = vst.msk [vmem:[#allocation3 + $0xe8] sm:$0xff] %vm889_vm5, %v1686_v36  ;;  %v1691_v45 = vadd.f32 %v7877_v40, %v1643_v41  ;;  %8079 = vmatprep.mubr.msk.bf16.mxu1 %vm587_vm2, %v4061_v32  ;;  %v1647_v7 = vld [vmem:[#allocation3 + $0x130] sm:$0xff]  ;;  %v1646_v32 = vld [vmem:[#allocation3 + $0x128] sm:$0xff]  ;;  %v4069_v36 = vsel %vm1927_vm4, %v4066_v11, %v4068_v16 }
 0x153   : > { %v2307_v47 = vld [vmem:[#allocation3 + $0xf0] sm:$0xff]  ;;  %v1546_v48 = vpop.f32.mrf.mxu1  ;;  %v7927_v50 = vpop.f32.mrf.mxu0  ;;  %8126 = vmatmul.mubr.msk.bf16.gmra.mxu0 %vm587_vm2, %v8441_v26  ;;  %v8449_v35 = vld [vmem:[#allocation2 + $0xc0] sm:$0xff]   ;;  %v5309_v38 = vrot.slane %v5307_v19, 1  ;;  %v5312_v40 = vshll.u32 %v9186_v17, 16 }
 0x154   : > { %2398 = vst.msk [vmem:[#allocation3 + $0xc8] sm:$0xff] %vm889_vm5, %v2350_v43  ;;  %v2355_v52 = vadd.f32 %v7923_v14, %v2307_v47  ;;  %1739 = vst.msk [vmem:[#allocation3 + $0x110] sm:$0xff] %vm889_vm5, %v1691_v45  ;;  %v1689_v18 = vadd.f32 %v1641_v49, %v1546_v48  ;;  %8129 = vmatprep.mubr.msk.bf16.mxu0 %vm587_vm2, %v8444_v37  ;;  %v1645_v14 = vld [vmem:[#allocation3 + $0x120] sm:$0xff]  ;;  %v5305_v37 = vshrl.u32 %v9176_v1, 16  ;;  %v8452_v43 = vld [vmem:[#allocation2 + $0xc8] sm:$0xff]  }
 0x155   : > { %v2305_v53 = vld [vmem:[#allocation3 + $0xe0] sm:$0xff]  ;;  %v7878_v54 = vpop.f32.mrf.mxu1  ;;  %v2214_v56 = vpop.f32.mrf.mxu0  ;;  %v9202_v45 = vld [vmem:[#allocation2 + $0x28] sm:$0xff]  }
 0x156   : > { %2403 = vst.msk [vmem:[#allocation3 + $0xf0] sm:$0xff] %vm889_vm5, %v2355_v52  ;;  %v2353_v57 = vadd.f32 %v2305_v53, %v2198_v22  ;;  %1737 = vst.msk [vmem:[#allocation3 + $0x100] sm:$0xff] %vm889_vm5, %v1689_v18  ;;  %v1692_v39 = vadd.f32 %v7878_v54, %v1644_v55  ;;  %v1651_v49 = vld [vmem:[#allocation3 + $0x150] sm:$0xff]  ;;  %v9205_v51 = vld [vmem:[#allocation2 + $0x20] sm:$0xff]   ;;  %v4070_v53 = vrot.slane %v8451_v28, 1  ;;  %v5320_v1 = vshll.u32 %v9202_v45, 16 }
 0x157   : > { %v2308_v29 = vld [vmem:[#allocation3 + $0xf8] sm:$0xff]  ;;  %v1549_v62 = vpop.f32.mrf.mxu1  ;;  %v7928_v0 = vpop.f32.mrf.mxu0 }
 0x158   : > { %2401 = vst.msk [vmem:[#allocation3 + $0xe0] sm:$0xff] %vm889_vm5, %v2353_v57  ;;  %v2356_v2 = vadd.f32 %v7924_v31, %v2308_v29  ;;  %1740 = vst.msk [vmem:[#allocation3 + $0x118] sm:$0xff] %vm889_vm5, %v1692_v39  ;;  %v1690_v3 = vadd.f32 %v1642_v63, %v1549_v62  ;;  %v5310_v39 = vor.u32 %v5309_v38, %v5305_v37  ;;  %v9243_v37 = vld [vmem:[#allocation2 + $0x40] sm:$0xff]  }
 0x159   : > { %v2306_v5 = vld [vmem:[#allocation3 + $0xe8] sm:$0xff]  ;;  %v7881_v6 = vpop.f32.mrf.mxu1  ;;  %8080 = vmatmul.mubr.msk.bf16.gmra.mxu1 %vm587_vm2, %v4063_v58  ;;  %v2217_v8 = vpop.f32.mrf.mxu0  ;;  %v5314_v58 = vrot.slane %v5312_v40, 1 }
 0x15a   : > { %2404 = vst.msk [vmem:[#allocation3 + $0xf8] sm:$0xff] %vm889_vm5, %v2356_v2  ;;  %v2354_v9 = vadd.f32 %v2306_v5, %v2201_v42  ;;  %1738 = vst.msk [vmem:[#allocation3 + $0x108] sm:$0xff] %vm889_vm5, %v1690_v3  ;;  %v1695_v10 = vadd.f32 %v7881_v6, %v1647_v7  ;;  %8083 = vmatprep.mubr.msk.bf16.mxu1 %vm587_vm2, %v4065_v33  ;;  %v6118_v2 = vrot.slane %v8457_v46, 1  ;;  %v6119_v3 = vrot.slane %v9205_v51, 1 }
 0x15b   : > { %v2311_v12 = vld [vmem:[#allocation3 + $0x110] sm:$0xff]  ;;  %v1562_v13 = vpop.f32.mrf.mxu1  ;;  %v7931_v15 = vpop.f32.mrf.mxu0  ;;  %8130 = vmatmul.mubr.msk.bf16.gmra.mxu0 %vm587_vm2, %v8445_v59  ;;  %v4071_v6 = vsel %vm1927_vm4, %v4068_v16, %v4070_v53  ;;  %v5316_v7 = vshrl.u32 %v9186_v17, 16  ;;  %v9231_v17 = vld [vmem:[#allocation2 + $0x38] sm:$0xff]  }
 0x15c   : > { %2402 = vst.msk [vmem:[#allocation3 + $0xe8] sm:$0xff] %vm889_vm5, %v2354_v9  ;;  %v2359_v20 = vadd.f32 %v7927_v50, %v2311_v12  ;;  %1743 = vst.msk [vmem:[#allocation3 + $0x130] sm:$0xff] %vm889_vm5, %v1695_v10  ;;  %v1693_v21 = vadd.f32 %v1645_v14, %v1562_v13  ;;  %8133 = vmatprep.mubr.msk.bf16.mxu0 %vm587_vm2, %v8448_v4  ;;  %v9211_v59 = vld [vmem:[#allocation2 + $0x30] sm:$0xff]   ;;  %v1650_v10 = vld [vmem:[#allocation3 + $0x148] sm:$0xff]  ;;  %v5315_v13 = vsel %vm1112_vm3, %v5310_v39, %v5314_v58 }
 0x15d   : > { %v2309_v22 = vld [vmem:[#allocation3 + $0x100] sm:$0xff]  ;;  %v7882_v23 = vpop.f32.mrf.mxu1  ;;  %v2230_v25 = vpop.f32.mrf.mxu0  ;;  %v8453_v12 = vld [vmem:[#allocation2 + $0xd0] sm:$0xff]   ;;  %v5324_v14 = vshrl.u32 %v9202_v45, 16  ;;  %v9229_v16 = vld [vmem:[#allocation2 + $0x28] sm:$0xff]   ;;  %v5318_v28 = vor.u32 %v5316_v7, %v5314_v58  ;;  %v5340_v39 = vshrl.u32 %v9231_v17, 16  ;;  %v5344_v58 = vshll.u32 %v9243_v37, 16 }
 0x15e   : > { %2407 = vst.msk [vmem:[#allocation3 + $0x110] sm:$0xff] %vm889_vm5, %v2359_v20  ;;  %v2357_v26 = vadd.f32 %v2309_v22, %v2214_v56  ;;  %1741 = vst.msk [vmem:[#allocation3 + $0x120] sm:$0xff] %vm889_vm5, %v1693_v21  ;;  %v1696_v44 = vadd.f32 %v7882_v23, %v1648_v24  ;;  %v1649_v56 = vld [vmem:[#allocation3 + $0x140] sm:$0xff]  ;;  %v1655_v22 = vld [vmem:[#allocation3 + $0x170] sm:$0xff]  ;;  %v5322_v24 = vrot.slane %v5320_v1, 1 }
 0x15f   : > { %v2312_v30 = vld [vmem:[#allocation3 + $0x118] sm:$0xff]  ;;  %v1565_v31 = vpop.f32.mrf.mxu1  ;;  %v7932_v34 = vpop.f32.mrf.mxu0  ;;  %v2893_v1 = vld [vmem:[#allocation3 + $0x10] sm:$0xff] }
 0x160   : > { %2405 = vst.msk [vmem:[#allocation3 + $0x100] sm:$0xff] %vm889_vm5, %v2357_v26  ;;  %v2360_v41 = vadd.f32 %v7928_v0, %v2312_v30  ;;  %1744 = vst.msk [vmem:[#allocation3 + $0x138] sm:$0xff] %vm889_vm5, %v1696_v44  ;;  %v1694_v42 = vadd.f32 %v1646_v32, %v1565_v31  ;;  %v1652_v0 = vld [vmem:[#allocation3 + $0x158] sm:$0xff]  ;;  %v1653_v32 = vld [vmem:[#allocation3 + $0x160] sm:$0xff] }
 0x161   : > { %v2310_v47 = vld [vmem:[#allocation3 + $0x108] sm:$0xff]  ;;  %v7885_v48 = vpop.f32.mrf.mxu1  ;;  %8084 = vmatmul.mubr.msk.bf16.gmra.mxu1 %vm587_vm2, %v4067_v27  ;;  %v2233_v50 = vpop.f32.mrf.mxu0  ;;  %v9237_v26 = vld [vmem:[#allocation2 + $0x30] sm:$0xff]  }
 0x162   : > { %2408 = vst.msk [vmem:[#allocation3 + $0x118] sm:$0xff] %vm889_vm5, %v2360_v41  ;;  %v2358_v52 = vadd.f32 %v2310_v47, %v2217_v8  ;;  %1742 = vst.msk [vmem:[#allocation3 + $0x128] sm:$0xff] %vm889_vm5, %v1694_v42  ;;  %v1699_v18 = vadd.f32 %v7885_v48, %v1651_v49  ;;  %8087 = vmatprep.mubr.msk.bf16.mxu1 %vm587_vm2, %v4069_v36  ;;  %v6121_v41 = vrot.slane %v9229_v16, 1  ;;  %v1656_v45 = vld [vmem:[#allocation3 + $0x178] sm:$0xff]  ;;  %v5336_v47 = vshll.u32 %v9231_v17, 16 }
 0x163   : > { %v2315_v54 = vld [vmem:[#allocation3 + $0x130] sm:$0xff]  ;;  %v1578_v55 = vpop.f32.mrf.mxu1  ;;  %v7935_v57 = vpop.f32.mrf.mxu0  ;;  %8134 = vmatmul.mubr.msk.bf16.gmra.mxu0 %vm587_vm2, %v8449_v35  ;;  %v5326_v35 = vor.u32 %v5324_v14, %v5322_v24  ;;  %v6123_v48 = vrot.slane %v9237_v26, 1 }
 0x164   : > { %2406 = vst.msk [vmem:[#allocation3 + $0x108] sm:$0xff] %vm889_vm5, %v2358_v52  ;;  %v2363_v60 = vadd.f32 %v7931_v15, %v2315_v54  ;;  %1747 = vst.msk [vmem:[#allocation3 + $0x150] sm:$0xff] %vm889_vm5, %v1699_v18  ;;  %v1697_v29 = vadd.f32 %v1649_v56, %v1578_v55  ;;  %8137 = vmatprep.mubr.msk.bf16.mxu0 %vm587_vm2, %v8452_v43  ;;  %v5328_v15 = vshll.u32 %v9211_v59, 16  ;;  %v5332_v18 = vshrl.u32 %v9211_v59, 16  ;;  %v1654_v55 = vld [vmem:[#allocation3 + $0x168] sm:$0xff]  ;;  %v9277_v14 = vld [vmem:[#allocation2 + $0x50] sm:$0xff]  }
 0x165   : > { %v2313_v62 = vld [vmem:[#allocation3 + $0x120] sm:$0xff]  ;;  %v7886_v63 = vpop.f32.mrf.mxu1  ;;  %v2246_v33 = vpop.f32.mrf.mxu0  ;;  %v5323_v52 = vsel %vm1112_vm3, %v5318_v28, %v5322_v24  ;;  %v6122_v59 = vsel %vm1927_vm4, %v6119_v3, %v6121_v41 }
 0x166   : > { %2411 = vst.msk [vmem:[#allocation3 + $0x130] sm:$0xff] %vm889_vm5, %v2363_v60  ;;  %v2361_v4 = vadd.f32 %v2313_v62, %v2230_v25  ;;  %1745 = vst.msk [vmem:[#allocation3 + $0x140] sm:$0xff] %vm889_vm5, %v1697_v29  ;;  %v1700_v5 = vadd.f32 %v7886_v63, %v1652_v0  ;;  %v6120_v25 = vsel %vm1927_vm4, %v6118_v2, %v6119_v3  ;;  %v5330_v36 = vrot.slane %v5328_v15, 1  ;;  %v9263_v62 = vld [vmem:[#allocation2 + $0x38] sm:$0xff]   ;;  %v9265_v63 = vld [vmem:[#allocation2 + $0x48] sm:$0xff]  }
 0x167   : > { %v2316_v8 = vld [vmem:[#allocation3 + $0x138] sm:$0xff]  ;;  %v1581_v9 = vpop.f32.mrf.mxu1  ;;  %v7936_v11 = vpop.f32.mrf.mxu0 }
 0x168   : > { %2409 = vst.msk [vmem:[#allocation3 + $0x120] sm:$0xff] %vm889_vm5, %v2361_v4  ;;  %v2364_v19 = vadd.f32 %v7932_v34, %v2316_v8  ;;  %1748 = vst.msk [vmem:[#allocation3 + $0x158] sm:$0xff] %vm889_vm5, %v1700_v5  ;;  %v1698_v61 = vadd.f32 %v1650_v10, %v1581_v9  ;;  %v5338_v4 = vrot.slane %v5336_v47, 1  ;;  %v6124_v5 = vsel %vm1927_vm4, %v6121_v41, %v6123_v48  ;;  %v2891_v10 = vld [vmem:[#allocation3] sm:$0xff]  ;;  %v9297_v41 = vld [vmem:[#allocation2 + $0x48] sm:$0xff]  }
 0x169   : > { %v2314_v20 = vld [vmem:[#allocation3 + $0x128] sm:$0xff]  ;;  %v7889_v21 = vpop.f32.mrf.mxu1  ;;  %8088 = vmatmul.mubr.msk.bf16.gmra.mxu1 %vm587_vm2, %v4071_v6  ;;  %v2249_v23 = vpop.f32.mrf.mxu0  ;;  %v5334_v7 = vor.u32 %v5332_v18, %v5330_v36 }
 0x16a   : > { %2412 = vst.msk [vmem:[#allocation3 + $0x138] sm:$0xff] %vm889_vm5, %v2364_v19  ;;  %v2362_v44 = vadd.f32 %v2314_v20, %v2233_v50  ;;  %1746 = vst.msk [vmem:[#allocation3 + $0x148] sm:$0xff] %vm889_vm5, %v1698_v61  ;;  %v1703_v27 = vadd.f32 %v7889_v21, %v1655_v22  ;;  %8143 = vmatprep.mubr.msk.bf16.mxu1 %vm587_vm2, %v5315_v13  ;;  %v9271_v6 = vld [vmem:[#allocation2 + $0x40] sm:$0xff]   ;;  %v5346_v13 = vrot.slane %v5344_v58, 1  ;;  %v6125_v61 = vrot.slane %v9263_v62, 1  ;;  %v2894_v20 = vld [vmem:[#allocation3 + $0x18] sm:$0xff] }
 0x16b   : > { %v2319_v30 = vld [vmem:[#allocation3 + $0x150] sm:$0xff]  ;;  %v1594_v31 = vpop.f32.mrf.mxu1  ;;  %v7939_v34 = vpop.f32.mrf.mxu0  ;;  %8138 = vmatmul.mubr.msk.bf16.gmra.mxu0 %vm587_vm2, %v8453_v12  ;;  %v5342_v12 = vor.u32 %v5340_v39, %v5338_v4  ;;  %v5352_v22 = vshll.u32 %v9265_v63, 16  ;;  %v9311_v58 = vld [vmem:[#allocation2 + $0x60] sm:$0xff]  }
 0x16c   : > { %2410 = vst.msk [vmem:[#allocation3 + $0x128] sm:$0xff] %vm889_vm5, %v2362_v44  ;;  %v2367_v38 = vadd.f32 %v7935_v57, %v2319_v30  ;;  %1751 = vst.msk [vmem:[#allocation3 + $0x170] sm:$0xff] %vm889_vm5, %v1703_v27  ;;  %v1701_v40 = vadd.f32 %v1653_v32, %v1594_v31  ;;  %8193 = vmatprep.mubr.msk.bf16.mxu0 %vm587_vm2, %v6120_v25  ;;  %v5331_v57 = vsel %vm1112_vm3, %v5326_v35, %v5330_v36  ;;  %v2892_v31 = vld [vmem:[#allocation3 + $0x8] sm:$0xff] }
 0x16d   : > { %v2317_v42 = vld [vmem:[#allocation3 + $0x140] sm:$0xff]  ;;  %v7890_v43 = vpop.f32.mrf.mxu1  ;;  %v2262_v46 = vpop.f32.mrf.mxu0  ;;  %v5339_v44 = vsel %vm1112_vm3, %v5334_v7, %v5338_v4  ;;  %v5348_v27 = vshrl.u32 %v9243_v37, 16  ;;  %v5356_v35 = vshrl.u32 %v9265_v63, 16  ;;  %v5360_v36 = vshll.u32 %v9277_v14, 16 }
 0x16e   : > { %2415 = vst.msk [vmem:[#allocation3 + $0x150] sm:$0xff] %vm889_vm5, %v2367_v38  ;;  %v2365_v49 = vadd.f32 %v2317_v42, %v2246_v33  ;;  %1749 = vst.msk [vmem:[#allocation3 + $0x160] sm:$0xff] %vm889_vm5, %v1701_v40  ;;  %v1704_v50 = vadd.f32 %v7890_v43, %v1656_v45  ;;  %v6126_v37 = vsel %vm1927_vm4, %v6123_v48, %v6125_v61  ;;  %v9299_v42 = vld [vmem:[#allocation2 + $0x58] sm:$0xff]  }
 0x16f   : > { %v2320_v53 = vld [vmem:[#allocation3 + $0x158] sm:$0xff]  ;;  %v1597_v54 = vpop.f32.mrf.mxu1  ;;  %v7940_v56 = vpop.f32.mrf.mxu0  ;;  %v5350_v18 = vor.u32 %v5348_v27, %v5346_v13  ;;  %v5362_v39 = vrot.slane %v5360_v36, 1 }
 0x170   : > { %2413 = vst.msk [vmem:[#allocation3 + $0x140] sm:$0xff] %vm889_vm5, %v2365_v49  ;;  %v2368_v60 = vadd.f32 %v7936_v11, %v2320_v53  ;;  %1752 = vst.msk [vmem:[#allocation3 + $0x178] sm:$0xff] %vm889_vm5, %v1704_v50  ;;  %v1702_v29 = vadd.f32 %v1654_v55, %v1597_v54  ;;  %v5354_v49 = vrot.slane %v5352_v22, 1  ;;  %v2895_v55 = vld [vmem:[#allocation3 + $0x20] sm:$0xff]  ;;  %v9345_v36 = vld [vmem:[#allocation2 + $0x70] sm:$0xff]  }
 0x171   : > { %v2318_v0 = vld [vmem:[#allocation3 + $0x148] sm:$0xff]  ;;  %v7945_v33 = vpop.f32.mrf.mxu1  ;;  %8144 = vmatmul.mubr.msk.bf16.vlgmr.msra.gmra.mxu1 %vm587_vm2, %v5323_v52  ;;  %v2265_v2 = vpop.f32.mrf.mxu0  ;;  %v9305_v52 = vld [vmem:[#allocation2 + $0x50] sm:$0xff]  }
 0x172   : > { %2416 = vst.msk [vmem:[#allocation3 + $0x158] sm:$0xff] %vm889_vm5, %v2368_v60  ;;  %v2366_v51 = vadd.f32 %v2318_v0, %v2249_v23  ;;  %1750 = vst.msk [vmem:[#allocation3 + $0x168] sm:$0xff] %vm889_vm5, %v1702_v29  ;;  %v2941_v3 = vadd.f32 %v7945_v33, %v2893_v1  ;;  %8147 = vmatprep.mubr.msk.bf16.mxu1 %vm587_vm2, %v5331_v57  ;;  %v6127_v23 = vrot.slane %v9271_v6, 1  ;;  %v2898_v0 = vld [vmem:[#allocation3 + $0x38] sm:$0xff]  ;;  %v5368_v1 = vshll.u32 %v9299_v42, 16 }
 0x173   : > { %v2323_v8 = vld [vmem:[#allocation3 + $0x170] sm:$0xff]  ;;  %v2700_v9 = vpop.f32.mrf.mxu1  ;;  %v7995_v11 = vpop.f32.mrf.mxu0  ;;  %8194 = vmatmul.mubr.msk.bf16.vlgmr.msra.gmra.mxu0 %vm587_vm2, %v6122_v59  ;;  %v5358_v57 = vor.u32 %v5356_v35, %v5354_v49  ;;  %v6129_v59 = vrot.slane %v9297_v41, 1 }
 0x174   : > { %2414 = vst.msk [vmem:[#allocation3 + $0x148] sm:$0xff] %vm889_vm5, %v2366_v51  ;;  %v2371_v15 = vadd.f32 %v7939_v34, %v2323_v8  ;;  %2989 = vst.msk [vmem:[#allocation3 + $0x10] sm:$0xff] %vm889_vm5, %v2941_v3  ;;  %v2939_v19 = vadd.f32 %v2891_v10, %v2700_v9  ;;  %8197 = vmatprep.mubr.msk.bf16.mxu0 %vm587_vm2, %v6124_v5  ;;  %v5347_v34 = vsel %vm1112_vm3, %v5342_v12, %v5346_v13  ;;  %v2896_v9 = vld [vmem:[#allocation3 + $0x28] sm:$0xff] }
 0x175   : > { %v2321_v16 = vld [vmem:[#allocation3 + $0x160] sm:$0xff]  ;;  %v7946_v17 = vpop.f32.mrf.mxu1  ;;  %v3514_v21 = vpop.f32.mrf.mxu0  ;;  %v6128_v50 = vsel %vm1927_vm4, %v6125_v61, %v6127_v23  ;;  %v5355_v51 = vsel %vm1112_vm3, %v5350_v18, %v5354_v49  ;;  %v5364_v3 = vshrl.u32 %v9277_v14, 16  ;;  %v5372_v12 = vshrl.u32 %v9299_v42, 16 }
 0x176   : > { %2419 = vst.msk [vmem:[#allocation3 + $0x170] sm:$0xff] %vm889_vm5, %v2371_v15  ;;  %v2369_v24 = vadd.f32 %v2321_v16, %v2262_v46  ;;  %2987 = vst.msk [vmem:[#allocation3] sm:$0xff] %vm889_vm5, %v2939_v19  ;;  %v2942_v25 = vadd.f32 %v7946_v17, %v2894_v20  ;;  %v2897_v46 = vld [vmem:[#allocation3 + $0x30] sm:$0xff]  ;;  %v5376_v13 = vshll.u32 %v9311_v58, 16  ;;  %v6130_v14 = vsel %vm1927_vm4, %v6127_v23, %v6129_v59  ;;  %v9331_v61 = vld [vmem:[#allocation2 + $0x58] sm:$0xff]  }
 0x177   : > { %v2324_v28 = vld [vmem:[#allocation3 + $0x178] sm:$0xff]  ;;  %v2703_v30 = vpop.f32.mrf.mxu1  ;;  %v7996_v32 = vpop.f32.mrf.mxu0  ;;  %v9333_v16 = vld [vmem:[#allocation2 + $0x68] sm:$0xff]   ;;  %v5366_v27 = vor.u32 %v5364_v3, %v5362_v39 }
 0x178   : > { %2417 = vst.msk [vmem:[#allocation3 + $0x160] sm:$0xff] %vm889_vm5, %v2369_v24  ;;  %v2372_v38 = vadd.f32 %v7940_v56, %v2324_v28  ;;  %2990 = vst.msk [vmem:[#allocation3 + $0x18] sm:$0xff] %vm889_vm5, %v2942_v25  ;;  %v2940_v40 = vadd.f32 %v2892_v31, %v2703_v30  ;;  %v5370_v24 = vrot.slane %v5368_v1, 1  ;;  %v2899_v31 = vld [vmem:[#allocation3 + $0x40] sm:$0xff]  ;;  %v5378_v35 = vrot.slane %v5376_v13, 1 }
 0x179   : > { %v2322_v43 = vld [vmem:[#allocation3 + $0x168] sm:$0xff]  ;;  %v7949_v45 = vpop.f32.mrf.mxu1  ;;  %8148 = vmatmul.mubr.msk.bf16.gmra.mxu1 %vm587_vm2, %v5339_v44  ;;  %v3517_v47 = vpop.f32.mrf.mxu0 }
 0x17a   : > { %2420 = vst.msk [vmem:[#allocation3 + $0x178] sm:$0xff] %vm889_vm5, %v2372_v38  ;;  %v2370_v26 = vadd.f32 %v2322_v43, %v2265_v2  ;;  %2988 = vst.msk [vmem:[#allocation3 + $0x8] sm:$0xff] %vm889_vm5, %v2940_v40  ;;  %v2945_v48 = vadd.f32 %v7949_v45, %v2897_v46  ;;  %8151 = vmatprep.mubr.msk.bf16.mxu1 %vm587_vm2, %v5347_v34  ;;  %v6131_v2 = vrot.slane %v9305_v52, 1  ;;  %v9339_v44 = vld [vmem:[#allocation2 + $0x60] sm:$0xff]   ;;  %v2902_v43 = vld [vmem:[#allocation3 + $0x58] sm:$0xff]  ;;  %v5384_v46 = vshll.u32 %v9333_v16, 16 }
 0x17b   : > { %v3707_v53 = vld [vmem:[#allocation3 + $0x10] sm:$0xff]  ;;  %v2716_v54 = vpop.f32.mrf.mxu1  ;;  %v7999_v56 = vpop.f32.mrf.mxu0  ;;  %8198 = vmatmul.mubr.msk.bf16.gmra.mxu0 %vm587_vm2, %v6126_v37  ;;  %v5374_v34 = vor.u32 %v5372_v12, %v5370_v24  ;;  %v6133_v37 = vrot.slane %v9331_v61, 1  ;;  %v9379_v13 = vld [vmem:[#allocation2 + $0x80] sm:$0xff]  }
 0x17c   : > { %2418 = vst.msk [vmem:[#allocation3 + $0x168] sm:$0xff] %vm889_vm5, %v2370_v26  ;;  %v3755_v60 = vadd.f32 %v7995_v11, %v3707_v53  ;;  %2993 = vst.msk [vmem:[#allocation3 + $0x30] sm:$0xff] %vm889_vm5, %v2945_v48  ;;  %v2943_v29 = vadd.f32 %v2895_v55, %v2716_v54  ;;  %8201 = vmatprep.mubr.msk.bf16.mxu0 %vm587_vm2, %v6128_v50  ;;  %v5363_v11 = vsel %vm1112_vm3, %v5358_v57, %v5362_v39  ;;  %v2900_v54 = vld [vmem:[#allocation3 + $0x48] sm:$0xff] }
 0x17d   : > { %v3705_v62 = vld [vmem:[#allocation3] sm:$0xff]  ;;  %v7950_v63 = vpop.f32.mrf.mxu1  ;;  %v3530_v33 = vpop.f32.mrf.mxu0  ;;  %v6132_v25 = vsel %vm1927_vm4, %v6129_v59, %v6131_v2  ;;  %v5371_v26 = vsel %vm1112_vm3, %v5366_v27, %v5370_v24  ;;  %v5380_v48 = vshrl.u32 %v9311_v58, 16  ;;  %v5388_v57 = vshrl.u32 %v9333_v16, 16  ;;  %v9365_v59 = vld [vmem:[#allocation2 + $0x68] sm:$0xff]  }
 0x17e   : > { %3803 = vst.msk [vmem:[#allocation3 + $0x10] sm:$0xff] %vm889_vm5, %v3755_v60  ;;  %v3753_v4 = vadd.f32 %v3705_v62, %v3514_v21  ;;  %2991 = vst.msk [vmem:[#allocation3 + $0x20] sm:$0xff] %vm889_vm5, %v2943_v29  ;;  %v2946_v5 = vadd.f32 %v7950_v63, %v2898_v0  ;;  %v2901_v21 = vld [vmem:[#allocation3 + $0x50] sm:$0xff]  ;;  %v5392_v39 = vshll.u32 %v9345_v36, 16  ;;  %v6134_v58 = vsel %vm1927_vm4, %v6131_v2, %v6133_v37  ;;  %v9367_v62 = vld [vmem:[#allocation2 + $0x78] sm:$0xff]  }
 0x17f   : > { %v3708_v7 = vld [vmem:[#allocation3 + $0x18] sm:$0xff]  ;;  %v2719_v8 = vpop.f32.mrf.mxu1  ;;  %v8000_v10 = vpop.f32.mrf.mxu0  ;;  %v5382_v3 = vor.u32 %v5380_v48, %v5378_v35 }
 0x180   : > { %3801 = vst.msk [vmem:[#allocation3] sm:$0xff] %vm889_vm5, %v3753_v4  ;;  %v3756_v15 = vadd.f32 %v7996_v32, %v3708_v7  ;;  %2994 = vst.msk [vmem:[#allocation3 + $0x38] sm:$0xff] %vm889_vm5, %v2946_v5  ;;  %v2944_v19 = vadd.f32 %v2896_v9, %v2719_v8  ;;  %v5386_v4 = vrot.slane %v5384_v46, 1  ;;  %v2903_v9 = vld [vmem:[#allocation3 + $0x60] sm:$0xff]  ;;  %v5394_v12 = vrot.slane %v5392_v39, 1  ;;  %v9413_v39 = vld [vmem:[#allocation2 + $0x90] sm:$0xff]  }
 0x181   : > { %v3706_v17 = vld [vmem:[#allocation3 + $0x8] sm:$0xff]  ;;  %v7953_v20 = vpop.f32.mrf.mxu1  ;;  %8152 = vmatmul.mubr.msk.bf16.gmra.mxu1 %vm587_vm2, %v5355_v51  ;;  %v3533_v22 = vpop.f32.mrf.mxu0  ;;  %v9373_v51 = vld [vmem:[#allocation2 + $0x70] sm:$0xff]  }
 0x182   : > { %3804 = vst.msk [vmem:[#allocation3 + $0x18] sm:$0xff] %vm889_vm5, %v3756_v15  ;;  %v3754_v6 = vadd.f32 %v3706_v17, %v3517_v47  ;;  %2992 = vst.msk [vmem:[#allocation3 + $0x28] sm:$0xff] %vm889_vm5, %v2944_v19  ;;  %v2949_v23 = vadd.f32 %v7953_v20, %v2901_v21  ;;  %8155 = vmatprep.mubr.msk.bf16.mxu1 %vm587_vm2, %v5363_v11  ;;  %v6135_v47 = vrot.slane %v9339_v44, 1  ;;  %v2906_v17 = vld [vmem:[#allocation3 + $0x78] sm:$0xff]  ;;  %v5400_v21 = vshll.u32 %v9367_v62, 16 }
 0x183   : > { %v3711_v28 = vld [vmem:[#allocation3 + $0x30] sm:$0xff]  ;;  %v2732_v30 = vpop.f32.mrf.mxu1  ;;  %v8003_v32 = vpop.f32.mrf.mxu0  ;;  %8202 = vmatmul.mubr.msk.bf16.gmra.mxu0 %vm587_vm2, %v6130_v14  ;;  %v5390_v11 = vor.u32 %v5388_v57, %v5386_v4  ;;  %v6137_v14 = vrot.slane %v9365_v59, 1 }
 0x184   : > { %3802 = vst.msk [vmem:[#allocation3 + $0x8] sm:$0xff] %vm889_vm5, %v3754_v6  ;;  %v3759_v38 = vadd.f32 %v7999_v56, %v3711_v28  ;;  %2997 = vst.msk [vmem:[#allocation3 + $0x50] sm:$0xff] %vm889_vm5, %v2949_v23  ;;  %v2947_v40 = vadd.f32 %v2899_v31, %v2732_v30  ;;  %8205 = vmatprep.mubr.msk.bf16.mxu0 %vm587_vm2, %v6132_v25  ;;  %v5379_v56 = vsel %vm1112_vm3, %v5374_v34, %v5378_v35  ;;  %v2904_v30 = vld [vmem:[#allocation3 + $0x68] sm:$0xff] }
 0x185   : > { %v3709_v41 = vld [vmem:[#allocation3 + $0x20] sm:$0xff]  ;;  %v7954_v42 = vpop.f32.mrf.mxu1  ;;  %v3546_v45 = vpop.f32.mrf.mxu0  ;;  %v6136_v5 = vsel %vm1927_vm4, %v6133_v37, %v6135_v47  ;;  %v5387_v6 = vsel %vm1112_vm3, %v5382_v3, %v5386_v4  ;;  %v5396_v23 = vshrl.u32 %v9345_v36, 16  ;;  %v5404_v34 = vshrl.u32 %v9367_v62, 16 }
 0x186   : > { %3807 = vst.msk [vmem:[#allocation3 + $0x30] sm:$0xff] %vm889_vm5, %v3759_v38  ;;  %v3757_v49 = vadd.f32 %v3709_v41, %v3530_v33  ;;  %2995 = vst.msk [vmem:[#allocation3 + $0x40] sm:$0xff] %vm889_vm5, %v2947_v40  ;;  %v2950_v50 = vadd.f32 %v7954_v42, %v2902_v43  ;;  %v2905_v33 = vld [vmem:[#allocation3 + $0x70] sm:$0xff]  ;;  %v5408_v35 = vshll.u32 %v9379_v13, 16  ;;  %v6138_v36 = vsel %vm1927_vm4, %v6135_v47, %v6137_v14  ;;  %v9399_v37 = vld [vmem:[#allocation2 + $0x78] sm:$0xff]  }
 0x187   : > { %v3712_v18 = vld [vmem:[#allocation3 + $0x38] sm:$0xff]  ;;  %v2735_v53 = vpop.f32.mrf.mxu1  ;;  %v8004_v55 = vpop.f32.mrf.mxu0  ;;  %v9401_v41 = vld [vmem:[#allocation2 + $0x88] sm:$0xff]   ;;  %v5398_v48 = vor.u32 %v5396_v23, %v5394_v12 }
 0x188   : > { %3805 = vst.msk [vmem:[#allocation3 + $0x20] sm:$0xff] %vm889_vm5, %v3757_v49  ;;  %v3760_v60 = vadd.f32 %v8000_v10, %v3712_v18  ;;  %2998 = vst.msk [vmem:[#allocation3 + $0x58] sm:$0xff] %vm889_vm5, %v2950_v50  ;;  %v2948_v29 = vadd.f32 %v2900_v54, %v2735_v53  ;;  %v5402_v49 = vrot.slane %v5400_v21, 1  ;;  %v2907_v54 = vld [vmem:[#allocation3 + $0x80] sm:$0xff]  ;;  %v5410_v57 = vrot.slane %v5408_v35, 1 }
 0x189   : > { %v3710_v63 = vld [vmem:[#allocation3 + $0x28] sm:$0xff]  ;;  %v7957_v0 = vpop.f32.mrf.mxu1  ;;  %8156 = vmatmul.mubr.msk.bf16.gmra.mxu1 %vm587_vm2, %v5371_v26  ;;  %v3549_v1 = vpop.f32.mrf.mxu0 }
 0x18a   : > { %3808 = vst.msk [vmem:[#allocation3 + $0x38] sm:$0xff] %vm889_vm5, %v3760_v60  ;;  %v3758_v52 = vadd.f32 %v3710_v63, %v3533_v22  ;;  %2996 = vst.msk [vmem:[#allocation3 + $0x48] sm:$0xff] %vm889_vm5, %v2948_v29  ;;  %v2953_v2 = vadd.f32 %v7957_v0, %v2905_v33  ;;  %8159 = vmatprep.mubr.msk.bf16.mxu1 %vm587_vm2, %v5379_v56  ;;  %v6139_v22 = vrot.slane %v9373_v51, 1  ;;  %v9407_v26 = vld [vmem:[#allocation2 + $0x80] sm:$0xff]   ;;  %v2910_v63 = vld [vmem:[#allocation3 + $0x98] sm:$0xff]  ;;  %v5416_v33 = vshll.u32 %v9401_v41, 16 }
 0x18b   : > { %v3715_v7 = vld [vmem:[#allocation3 + $0x50] sm:$0xff]  ;;  %v2748_v8 = vpop.f32.mrf.mxu1  ;;  %v8007_v10 = vpop.f32.mrf.mxu0  ;;  %8206 = vmatmul.mubr.msk.bf16.gmra.mxu0 %vm587_vm2, %v6134_v58  ;;  %v5406_v56 = vor.u32 %v5404_v34, %v5402_v49  ;;  %v6141_v58 = vrot.slane %v9399_v37, 1  ;;  %v9447_v35 = vld [vmem:[#allocation2 + $0xa0] sm:$0xff]  }
 0x18c   : > { %3806 = vst.msk [vmem:[#allocation3 + $0x28] sm:$0xff] %vm889_vm5, %v3758_v52  ;;  %v3763_v15 = vadd.f32 %v8003_v32, %v3715_v7  ;;  %3001 = vst.msk [vmem:[#allocation3 + $0x70] sm:$0xff] %vm889_vm5, %v2953_v2  ;;  %v2951_v19 = vadd.f32 %v2903_v9, %v2748_v8  ;;  %8209 = vmatprep.mubr.msk.bf16.mxu0 %vm587_vm2, %v6136_v5  ;;  %v5395_v32 = vsel %vm1112_vm3, %v5390_v11, %v5394_v12  ;;  %v2908_v8 = vld [vmem:[#allocation3 + $0x88] sm:$0xff] }
 0x18d   : > { %v3713_v61 = vld [vmem:[#allocation3 + $0x40] sm:$0xff]  ;;  %v7958_v16 = vpop.f32.mrf.mxu1  ;;  %v3562_v20 = vpop.f32.mrf.mxu0  ;;  %v6140_v50 = vsel %vm1927_vm4, %v6137_v14, %v6139_v22  ;;  %v5403_v52 = vsel %vm1112_vm3, %v5398_v48, %v5402_v49  ;;  %v5412_v2 = vshrl.u32 %v9379_v13, 16  ;;  %v5420_v11 = vshrl.u32 %v9401_v41, 16  ;;  %v9433_v14 = vld [vmem:[#allocation2 + $0x88] sm:$0xff]  }
 0x18e   : > { %3811 = vst.msk [vmem:[#allocation3 + $0x50] sm:$0xff] %vm889_vm5, %v3763_v15  ;;  %v3761_v24 = vadd.f32 %v3713_v61, %v3546_v45  ;;  %2999 = vst.msk [vmem:[#allocation3 + $0x60] sm:$0xff] %vm889_vm5, %v2951_v19  ;;  %v2954_v25 = vadd.f32 %v7958_v16, %v2906_v17  ;;  %v2909_v45 = vld [vmem:[#allocation3 + $0x90] sm:$0xff]  ;;  %v5424_v12 = vshll.u32 %v9413_v39, 16  ;;  %v6142_v13 = vsel %vm1927_vm4, %v6139_v22, %v6141_v58  ;;  %v9435_v61 = vld [vmem:[#allocation2 + $0x98] sm:$0xff]  }
 0x18f   : > { %v3716_v27 = vld [vmem:[#allocation3 + $0x58] sm:$0xff]  ;;  %v2751_v28 = vpop.f32.mrf.mxu1  ;;  %v8008_v31 = vpop.f32.mrf.mxu0  ;;  %v5414_v23 = vor.u32 %v5412_v2, %v5410_v57 }
 0x190   : > { %3809 = vst.msk [vmem:[#allocation3 + $0x40] sm:$0xff] %vm889_vm5, %v3761_v24  ;;  %v3764_v38 = vadd.f32 %v8004_v55, %v3716_v27  ;;  %3002 = vst.msk [vmem:[#allocation3 + $0x78] sm:$0xff] %vm889_vm5, %v2954_v25  ;;  %v2952_v40 = vadd.f32 %v2904_v30, %v2751_v28  ;;  %v5418_v24 = vrot.slane %v5416_v33, 1  ;;  %v2911_v30 = vld [vmem:[#allocation3 + $0xa0] sm:$0xff]  ;;  %v5426_v34 = vrot.slane %v5424_v12, 1  ;;  %v9481_v12 = vld [vmem:[#allocation2 + $0xb0] sm:$0xff]  }
 0x191   : > { %v3714_v42 = vld [vmem:[#allocation3 + $0x48] sm:$0xff]  ;;  %v7961_v43 = vpop.f32.mrf.mxu1  ;;  %8160 = vmatmul.mubr.msk.bf16.gmra.mxu1 %vm587_vm2, %v5387_v6  ;;  %v3565_v46 = vpop.f32.mrf.mxu0  ;;  %v9441_v6 = vld [vmem:[#allocation2 + $0x90] sm:$0xff]  }
 0x192   : > { %3812 = vst.msk [vmem:[#allocation3 + $0x58] sm:$0xff] %vm889_vm5, %v3764_v38  ;;  %v3762_v44 = vadd.f32 %v3714_v42, %v3549_v1  ;;  %3000 = vst.msk [vmem:[#allocation3 + $0x68] sm:$0xff] %vm889_vm5, %v2952_v40  ;;  %v2957_v47 = vadd.f32 %v7961_v43, %v2909_v45  ;;  %8163 = vmatprep.mubr.msk.bf16.mxu1 %vm587_vm2, %v5395_v32  ;;  %v6143_v1 = vrot.slane %v9407_v26, 1  ;;  %v2914_v42 = vld [vmem:[#allocation3 + $0xb8] sm:$0xff]  ;;  %v5432_v45 = vshll.u32 %v9435_v61, 16 }
 0x193   : > { %v3719_v18 = vld [vmem:[#allocation3 + $0x70] sm:$0xff]  ;;  %v2764_v53 = vpop.f32.mrf.mxu1  ;;  %v8011_v55 = vpop.f32.mrf.mxu0  ;;  %8210 = vmatmul.mubr.msk.bf16.gmra.mxu0 %vm587_vm2, %v6138_v36  ;;  %v5422_v32 = vor.u32 %v5420_v11, %v5418_v24  ;;  %v6145_v36 = vrot.slane %v9433_v14, 1 }
 0x194   : > { %3810 = vst.msk [vmem:[#allocation3 + $0x48] sm:$0xff] %vm889_vm5, %v3762_v44  ;;  %v3767_v60 = vadd.f32 %v8007_v10, %v3719_v18  ;;  %3005 = vst.msk [vmem:[#allocation3 + $0x90] sm:$0xff] %vm889_vm5, %v2957_v47  ;;  %v2955_v29 = vadd.f32 %v2907_v54, %v2764_v53  ;;  %8213 = vmatprep.mubr.msk.bf16.mxu0 %vm587_vm2, %v6140_v50  ;;  %v5411_v10 = vsel %vm1112_vm3, %v5406_v56, %v5410_v57  ;;  %v2912_v53 = vld [vmem:[#allocation3 + $0xa8] sm:$0xff] }
 0x195   : > { %v3717_v59 = vld [vmem:[#allocation3 + $0x60] sm:$0xff]  ;;  %v7962_v62 = vpop.f32.mrf.mxu1  ;;  %v3578_v0 = vpop.f32.mrf.mxu0  ;;  %v6144_v25 = vsel %vm1927_vm4, %v6141_v58, %v6143_v1  ;;  %v5419_v44 = vsel %vm1112_vm3, %v5414_v23, %v5418_v24  ;;  %v5428_v47 = vshrl.u32 %v9413_v39, 16  ;;  %v5436_v56 = vshrl.u32 %v9435_v61, 16 }
 0x196   : > { %3815 = vst.msk [vmem:[#allocation3 + $0x70] sm:$0xff] %vm889_vm5, %v3767_v60  ;;  %v3765_v4 = vadd.f32 %v3717_v59, %v3562_v20  ;;  %3003 = vst.msk [vmem:[#allocation3 + $0x80] sm:$0xff] %vm889_vm5, %v2955_v29  ;;  %v2958_v5 = vadd.f32 %v7962_v62, %v2910_v63  ;;  %v2913_v20 = vld [vmem:[#allocation3 + $0xb0] sm:$0xff]  ;;  %v5440_v57 = vshll.u32 %v9447_v35, 16  ;;  %v6146_v39 = vsel %vm1927_vm4, %v6143_v1, %v6145_v36  ;;  %v9467_v58 = vld [vmem:[#allocation2 + $0x98] sm:$0xff]  }
 0x197   : > { %v3720_v3 = vld [vmem:[#allocation3 + $0x78] sm:$0xff]  ;;  %v2767_v7 = vpop.f32.mrf.mxu1  ;;  %v8012_v9 = vpop.f32.mrf.mxu0  ;;  %v9469_v59 = vld [vmem:[#allocation2 + $0xa8] sm:$0xff]   ;;  %v5430_v2 = vor.u32 %v5428_v47, %v5426_v34 }
 0x198   : > { %3813 = vst.msk [vmem:[#allocation3 + $0x60] sm:$0xff] %vm889_vm5, %v3765_v4  ;;  %v3768_v15 = vadd.f32 %v8008_v31, %v3720_v3  ;;  %3006 = vst.msk [vmem:[#allocation3 + $0x98] sm:$0xff] %vm889_vm5, %v2958_v5  ;;  %v2956_v19 = vadd.f32 %v2908_v8, %v2767_v7  ;;  %v5434_v4 = vrot.slane %v5432_v45, 1  ;;  %v2915_v8 = vld [vmem:[#allocation3 + $0xc0] sm:$0xff]  ;;  %v5442_v11 = vrot.slane %v5440_v57, 1 }
 0x199   : > { %v3718_v16 = vld [vmem:[#allocation3 + $0x68] sm:$0xff]  ;;  %v7965_v17 = vpop.f32.mrf.mxu1  ;;  %8164 = vmatmul.mubr.msk.bf16.gmra.mxu1 %vm587_vm2, %v5403_v52  ;;  %v3581_v21 = vpop.f32.mrf.mxu0 }
 0x19a   : > { %3816 = vst.msk [vmem:[#allocation3 + $0x78] sm:$0xff] %vm889_vm5, %v3768_v15  ;;  %v3766_v51 = vadd.f32 %v3718_v16, %v3565_v46  ;;  %3004 = vst.msk [vmem:[#allocation3 + $0x88] sm:$0xff] %vm889_vm5, %v2956_v19  ;;  %v2961_v22 = vadd.f32 %v7965_v17, %v2913_v20  ;;  %8167 = vmatprep.mubr.msk.bf16.mxu1 %vm587_vm2, %v5411_v10  ;;  %v6147_v46 = vrot.slane %v9441_v6, 1  ;;  %v9475_v52 = vld [vmem:[#allocation2 + $0xa0] sm:$0xff]   ;;  %v2918_v16 = vld [vmem:[#allocation3 + $0xd8] sm:$0xff]  ;;  %v5448_v20 = vshll.u32 %v9469_v59, 16 }
 0x19b   : > { %v3723_v27 = vld [vmem:[#allocation3 + $0x90] sm:$0xff]  ;;  %v2780_v28 = vpop.f32.mrf.mxu1  ;;  %v8015_v31 = vpop.f32.mrf.mxu0  ;;  %8214 = vmatmul.mubr.msk.bf16.gmra.mxu0 %vm587_vm2, %v6142_v13  ;;  %v5438_v10 = vor.u32 %v5436_v56, %v5434_v4  ;;  %v6149_v13 = vrot.slane %v9467_v58, 1  ;;  %v9515_v57 = vld [vmem:[#allocation2 + $0xc0] sm:$0xff]  }
 0x19c   : > { %3814 = vst.msk [vmem:[#allocation3 + $0x68] sm:$0xff] %vm889_vm5, %v3766_v51  ;;  %v3771_v38 = vadd.f32 %v8011_v55, %v3723_v27  ;;  %3009 = vst.msk [vmem:[#allocation3 + $0xb0] sm:$0xff] %vm889_vm5, %v2961_v22  ;;  %v2959_v40 = vadd.f32 %v2911_v30, %v2780_v28  ;;  %8217 = vmatprep.mubr.msk.bf16.mxu0 %vm587_vm2, %v6144_v25  ;;  %v5427_v55 = vsel %vm1112_vm3, %v5422_v32, %v5426_v34  ;;  %v2916_v28 = vld [vmem:[#allocation3 + $0xc8] sm:$0xff] }
 0x19d   : > { %v3721_v37 = vld [vmem:[#allocation3 + $0x80] sm:$0xff]  ;;  %v7966_v41 = vpop.f32.mrf.mxu1  ;;  %v3594_v43 = vpop.f32.mrf.mxu0  ;;  %v6148_v5 = vsel %vm1927_vm4, %v6145_v36, %v6147_v46  ;;  %v5435_v51 = vsel %vm1112_vm3, %v5430_v2, %v5434_v4  ;;  %v5444_v22 = vshrl.u32 %v9447_v35, 16  ;;  %v5452_v32 = vshrl.u32 %v9469_v59, 16  ;;  %v9501_v36 = vld [vmem:[#allocation2 + $0xa8] sm:$0xff]  }
 0x19e   : > { %3819 = vst.msk [vmem:[#allocation3 + $0x90] sm:$0xff] %vm889_vm5, %v3771_v38  ;;  %v3769_v49 = vadd.f32 %v3721_v37, %v3578_v0  ;;  %3007 = vst.msk [vmem:[#allocation3 + $0xa0] sm:$0xff] %vm889_vm5, %v2959_v40  ;;  %v2962_v50 = vadd.f32 %v7966_v41, %v2914_v42  ;;  %v2917_v0 = vld [vmem:[#allocation3 + $0xd0] sm:$0xff]  ;;  %v5456_v34 = vshll.u32 %v9481_v12, 16  ;;  %v6150_v35 = vsel %vm1927_vm4, %v6147_v46, %v6149_v13  ;;  %v9503_v37 = vld [vmem:[#allocation2 + $0xb8] sm:$0xff]  }
 0x19f   : > { %v3724_v48 = vld [vmem:[#allocation3 + $0x98] sm:$0xff]  ;;  %v2783_v18 = vpop.f32.mrf.mxu1  ;;  %v8016_v54 = vpop.f32.mrf.mxu0  ;;  %v5446_v47 = vor.u32 %v5444_v22, %v5442_v11 }
 0x1a0   : > { %3817 = vst.msk [vmem:[#allocation3 + $0x80] sm:$0xff] %vm889_vm5, %v3769_v49  ;;  %v3772_v60 = vadd.f32 %v8012_v9, %v3724_v48  ;;  %3010 = vst.msk [vmem:[#allocation3 + $0xb8] sm:$0xff] %vm889_vm5, %v2962_v50  ;;  %v2960_v29 = vadd.f32 %v2912_v53, %v2783_v18  ;;  %v5450_v49 = vrot.slane %v5448_v20, 1  ;;  %v2919_v53 = vld [vmem:[#allocation3 + $0xe0] sm:$0xff]  ;;  %v5458_v56 = vrot.slane %v5456_v34, 1  ;;  %v9549_v34 = vld [vmem:[#allocation2 + $0xd0] sm:$0xff]  }
 0x1a1   : > { %v3722_v62 = vld [vmem:[#allocation3 + $0x88] sm:$0xff]  ;;  %v7969_v63 = vpop.f32.mrf.mxu1  ;;  %8168 = vmatmul.mubr.msk.bf16.gmra.mxu1 %vm587_vm2, %v5419_v44  ;;  %v3597_v33 = vpop.f32.mrf.mxu0  ;;  %v9509_v44 = vld [vmem:[#allocation2 + $0xb0] sm:$0xff]  }
 0x1a2   : > { %3820 = vst.msk [vmem:[#allocation3 + $0x98] sm:$0xff] %vm889_vm5, %v3772_v60  ;;  %v3770_v26 = vadd.f32 %v3722_v62, %v3581_v21  ;;  %3008 = vst.msk [vmem:[#allocation3 + $0xa8] sm:$0xff] %vm889_vm5, %v2960_v29  ;;  %v2965_v1 = vadd.f32 %v7969_v63, %v2917_v0  ;;  %8171 = vmatprep.mubr.msk.bf16.mxu1 %vm587_vm2, %v5427_v55  ;;  %v6151_v21 = vrot.slane %v9475_v52, 1  ;;  %v2922_v62 = vld [vmem:[#allocation3 + $0xf8] sm:$0xff]  ;;  %v5464_v0 = vshll.u32 %v9503_v37, 16 }
 0x1a3   : > { %v3727_v3 = vld [vmem:[#allocation3 + $0xb0] sm:$0xff]  ;;  %v2796_v7 = vpop.f32.mrf.mxu1  ;;  %v8019_v9 = vpop.f32.mrf.mxu0  ;;  %8218 = vmatmul.mubr.msk.bf16.gmra.mxu0 %vm587_vm2, %v6146_v39  ;;  %v5454_v55 = vor.u32 %v5452_v32, %v5450_v49  ;;  %v6153_v39 = vrot.slane %v9501_v36, 1 }
 0x1a4   : > { %3818 = vst.msk [vmem:[#allocation3 + $0x88] sm:$0xff] %vm889_vm5, %v3770_v26  ;;  %v3775_v15 = vadd.f32 %v8015_v31, %v3727_v3  ;;  %3013 = vst.msk [vmem:[#allocation3 + $0xd0] sm:$0xff] %vm889_vm5, %v2965_v1  ;;  %v2963_v19 = vadd.f32 %v2915_v8, %v2796_v7  ;;  %8221 = vmatprep.mubr.msk.bf16.mxu0 %vm587_vm2, %v6148_v5  ;;  %v5443_v31 = vsel %vm1112_vm3, %v5438_v10, %v5442_v11  ;;  %v2920_v7 = vld [vmem:[#allocation3 + $0xe8] sm:$0xff] }
 0x1a5   : > { %v3725_v14 = vld [vmem:[#allocation3 + $0xa0] sm:$0xff]  ;;  %v7970_v61 = vpop.f32.mrf.mxu1  ;;  %v3610_v17 = vpop.f32.mrf.mxu0  ;;  %v6152_v50 = vsel %vm1927_vm4, %v6149_v13, %v6151_v21  ;;  %v5451_v26 = vsel %vm1112_vm3, %v5446_v47, %v5450_v49  ;;  %v5460_v1 = vshrl.u32 %v9481_v12, 16  ;;  %v5468_v10 = vshrl.u32 %v9503_v37, 16 }
 0x1a6   : > { %3823 = vst.msk [vmem:[#allocation3 + $0xb0] sm:$0xff] %vm889_vm5, %v3775_v15  ;;  %v3773_v24 = vadd.f32 %v3725_v14, %v3594_v43  ;;  %3011 = vst.msk [vmem:[#allocation3 + $0xc0] sm:$0xff] %vm889_vm5, %v2963_v19  ;;  %v2966_v25 = vadd.f32 %v7970_v61, %v2918_v16  ;;  %v2921_v43 = vld [vmem:[#allocation3 + $0xf0] sm:$0xff]  ;;  %v5472_v11 = vshll.u32 %v9515_v57, 16  ;;  %v6154_v12 = vsel %vm1927_vm4, %v6151_v21, %v6153_v39  ;;  %v9535_v13 = vld [vmem:[#allocation2 + $0xb8] sm:$0xff]  }
 0x1a7   : > { %v3728_v23 = vld [vmem:[#allocation3 + $0xb8] sm:$0xff]  ;;  %v2799_v27 = vpop.f32.mrf.mxu1  ;;  %v8020_v30 = vpop.f32.mrf.mxu0  ;;  %v9537_v14 = vld [vmem:[#allocation2 + $0xc8] sm:$0xff]   ;;  %v5462_v22 = vor.u32 %v5460_v1, %v5458_v56 }
 0x1a8   : > { %3821 = vst.msk [vmem:[#allocation3 + $0xa0] sm:$0xff] %vm889_vm5, %v3773_v24  ;;  %v3776_v38 = vadd.f32 %v8016_v54, %v3728_v23  ;;  %3014 = vst.msk [vmem:[#allocation3 + $0xd8] sm:$0xff] %vm889_vm5, %v2966_v25  ;;  %v2964_v40 = vadd.f32 %v2916_v28, %v2799_v27  ;;  %v5466_v24 = vrot.slane %v5464_v0, 1  ;;  %v2923_v28 = vld [vmem:[#allocation3 + $0x100] sm:$0xff]  ;;  %v5474_v32 = vrot.slane %v5472_v11, 1 }
 0x1a9   : > { %v3726_v41 = vld [vmem:[#allocation3 + $0xa8] sm:$0xff]  ;;  %v7973_v42 = vpop.f32.mrf.mxu1  ;;  %8172 = vmatmul.mubr.msk.bf16.gmra.mxu1 %vm587_vm2, %v5435_v51  ;;  %v3613_v45 = vpop.f32.mrf.mxu0  ;;  %v8501_v1 = vld [vmem:[#allocation2 + $0xd8] ss:$0 sps:$4 sm:$0x11]  }
 0x1aa   : > { %3824 = vst.msk [vmem:[#allocation3 + $0xb8] sm:$0xff] %vm889_vm5, %v3776_v38  ;;  %v3774_v6 = vadd.f32 %v3726_v41, %v3597_v33  ;;  %3012 = vst.msk [vmem:[#allocation3 + $0xc8] sm:$0xff] %vm889_vm5, %v2964_v40  ;;  %v2969_v46 = vadd.f32 %v7973_v42, %v2921_v43  ;;  %8175 = vmatprep.mubr.msk.bf16.mxu1 %vm587_vm2, %v5443_v31  ;;  %v6155_v33 = vrot.slane %v9509_v44, 1  ;;  %v9543_v51 = vld [vmem:[#allocation2 + $0xc0] sm:$0xff]   ;;  %v2926_v41 = vld [vmem:[#allocation3 + $0x118] sm:$0xff]  ;;  %v5476_v43 = vshrl.u32 %v9515_v57, 16 }
 0x1ab   : > { %v3731_v48 = vld [vmem:[#allocation3 + $0xd0] sm:$0xff]  ;;  %v2812_v18 = vpop.f32.mrf.mxu1  ;;  %v8023_v54 = vpop.f32.mrf.mxu0  ;;  %8222 = vmatmul.mubr.msk.bf16.gmra.mxu0 %vm587_vm2, %v6150_v35  ;;  %v5470_v31 = vor.u32 %v5468_v10, %v5466_v24  ;;  %v6157_v35 = vrot.slane %v9535_v13, 1  ;;  %v6159_v49 = vrot.slane %v9543_v51, 1 }
 0x1ac   : > { %3822 = vst.msk [vmem:[#allocation3 + $0xa8] sm:$0xff] %vm889_vm5, %v3774_v6  ;;  %v3779_v60 = vadd.f32 %v8019_v9, %v3731_v48  ;;  %3017 = vst.msk [vmem:[#allocation3 + $0xf0] sm:$0xff] %vm889_vm5, %v2969_v46  ;;  %v2967_v29 = vadd.f32 %v2919_v53, %v2812_v18  ;;  %8225 = vmatprep.mubr.msk.bf16.mxu0 %vm587_vm2, %v6152_v50  ;;  %v5459_v9 = vsel %vm1112_vm3, %v5454_v55, %v5458_v56  ;;  %v2924_v18 = vld [vmem:[#allocation3 + $0x108] sm:$0xff] }
 0x1ad   : > { %v3729_v58 = vld [vmem:[#allocation3 + $0xc0] sm:$0xff]  ;;  %v7974_v59 = vpop.f32.mrf.mxu1  ;;  %v3626_v63 = vpop.f32.mrf.mxu0  ;;  %v6156_v25 = vsel %vm1927_vm4, %v6153_v39, %v6155_v33  ;;  %v5467_v46 = vsel %vm1112_vm3, %v5462_v22, %v5466_v24  ;;  %v5484_v55 = vshrl.u32 %v9537_v14, 16  ;;  %v5488_v56 = vshll.u32 %v9549_v34, 16  ;;  %v8499_v39 = vld [vmem:[#allocation2 + $0xc8] sm:$0xff]  }
 0x1ae   : > { %3827 = vst.msk [vmem:[#allocation3 + $0xd0] sm:$0xff] %vm889_vm5, %v3779_v60  ;;  %v3777_v4 = vadd.f32 %v3729_v58, %v3610_v17  ;;  %3015 = vst.msk [vmem:[#allocation3 + $0xe0] sm:$0xff] %vm889_vm5, %v2967_v29  ;;  %v2970_v5 = vadd.f32 %v7974_v59, %v2922_v62  ;;  %v2925_v17 = vld [vmem:[#allocation3 + $0x110] sm:$0xff]  ;;  %v6158_v29 = vsel %vm1927_vm4, %v6155_v33, %v6157_v35 }
 0x1af   : > { %v3732_v2 = vld [vmem:[#allocation3 + $0xd8] sm:$0xff]  ;;  %v2815_v3 = vpop.f32.mrf.mxu1  ;;  %v8024_v8 = vpop.f32.mrf.mxu0  ;;  %v2929_v62 = vld [vmem:[#allocation3 + $0x130] sm:$0xff]  ;;  %v5478_v0 = vor.u32 %v5476_v43, %v5474_v32  ;;  %v5490_v10 = vrot.slane %v5488_v56, 1 }
 0x1b0   : > { %3825 = vst.msk [vmem:[#allocation3 + $0xc0] sm:$0xff] %vm889_vm5, %v3777_v4  ;;  %v3780_v15 = vadd.f32 %v8020_v30, %v3732_v2  ;;  %3018 = vst.msk [vmem:[#allocation3 + $0xf8] sm:$0xff] %vm889_vm5, %v2970_v5  ;;  %v2968_v19 = vadd.f32 %v2920_v7, %v2815_v3  ;;  %v6160_v5 = vsel %vm1927_vm4, %v6157_v35, %v6159_v49  ;;  %v2927_v7 = vld [vmem:[#allocation3 + $0x120] sm:$0xff]  ;;  %v2933_v35 = vld [vmem:[#allocation3 + $0x150] sm:$0xff] }
 0x1b1   : > { %v3730_v61 = vld [vmem:[#allocation3 + $0xc8] sm:$0xff]  ;;  %v7977_v16 = vpop.f32.mrf.mxu1  ;;  %8176 = vmatmul.mubr.msk.bf16.gmra.mxu1 %vm587_vm2, %v5451_v26  ;;  %v3629_v20 = vpop.f32.mrf.mxu0  ;;  %v9573_v26 = vld [vmem:[#allocation2 + $0xd0] sm:$0xff]  }
 0x1b2   : > { %3828 = vst.msk [vmem:[#allocation3 + $0xd8] sm:$0xff] %vm889_vm5, %v3780_v15  ;;  %v3778_v52 = vadd.f32 %v3730_v61, %v3613_v45  ;;  %3016 = vst.msk [vmem:[#allocation3 + $0xe8] sm:$0xff] %vm889_vm5, %v2968_v19  ;;  %v2973_v21 = vadd.f32 %v7977_v16, %v2925_v17  ;;  %8179 = vmatprep.mubr.msk.bf16.mxu1 %vm587_vm2, %v5459_v9  ;;  %v5480_v45 = vshll.u32 %v9537_v14, 16  ;;  %v6161_v19 = vrot.slane %v8499_v39, 1  ;;  %v2930_v14 = vld [vmem:[#allocation3 + $0x138] sm:$0xff] }
 0x1b3   : > { %v3735_v23 = vld [vmem:[#allocation3 + $0xf0] sm:$0xff]  ;;  %v2828_v27 = vpop.f32.mrf.mxu1  ;;  %v8027_v30 = vpop.f32.mrf.mxu0  ;;  %8226 = vmatmul.mubr.msk.bf16.gmra.mxu0 %vm587_vm2, %v6154_v12  ;;  %v6163_v17 = vrot.slane %v9573_v26, 1 }
 0x1b4   : > { %3826 = vst.msk [vmem:[#allocation3 + $0xc8] sm:$0xff] %vm889_vm5, %v3778_v52  ;;  %v3783_v38 = vadd.f32 %v8023_v54, %v3735_v23  ;;  %3021 = vst.msk [vmem:[#allocation3 + $0x110] sm:$0xff] %vm889_vm5, %v2973_v21  ;;  %v2971_v40 = vadd.f32 %v2923_v28, %v2828_v27  ;;  %8229 = vmatprep.mubr.msk.bf16.mxu0 %vm587_vm2, %v6156_v25  ;;  %v5475_v54 = vsel %vm1112_vm3, %v5470_v31, %v5474_v32  ;;  %v2928_v23 = vld [vmem:[#allocation3 + $0x128] sm:$0xff]  ;;  %v2937_v26 = vld [vmem:[#allocation3 + $0x170] sm:$0xff] }
 0x1b5   : > { %v3733_v36 = vld [vmem:[#allocation3 + $0xe0] sm:$0xff]  ;;  %v7978_v37 = vpop.f32.mrf.mxu1  ;;  %v3642_v42 = vpop.f32.mrf.mxu0  ;;  %v5482_v4 = vrot.slane %v5480_v45, 1  ;;  %v5492_v25 = vshrl.u32 %v9549_v34, 16  ;;  %v5496_v52 = vshll.u32 %v8501_v1, 16  ;;  %v6162_v32 = vsel %vm1927_vm4, %v6159_v49, %v6161_v19 }
 0x1b6   : > { %3831 = vst.msk [vmem:[#allocation3 + $0xf0] sm:$0xff] %vm889_vm5, %v3783_v38  ;;  %v3781_v50 = vadd.f32 %v3733_v36, %v3626_v63  ;;  %3019 = vst.msk [vmem:[#allocation3 + $0x100] sm:$0xff] %vm889_vm5, %v2971_v40  ;;  %v2974_v6 = vadd.f32 %v7978_v37, %v2926_v41  ;;  %v8503_v38 = vld [vmem:[#allocation2 + $0xd8] ss:$0 sps:$4 sm:$0x11]   ;;  %v6164_v37 = vsel %vm1927_vm4, %v6161_v19, %v6163_v17 }
 0x1b7   : > { %v3736_v47 = vld [vmem:[#allocation3 + $0xf8] sm:$0xff]  ;;  %v2831_v48 = vpop.f32.mrf.mxu1  ;;  %v8028_v53 = vpop.f32.mrf.mxu0  ;;  %v5486_v9 = vor.u32 %v5484_v55, %v5482_v4  ;;  %v5483_v16 = vsel %vm1112_vm3, %v5478_v0, %v5482_v4  ;;  %v5494_v43 = vor.u32 %v5492_v25, %v5490_v10  ;;  %v5498_v51 = vrot.slane %v5496_v52, 1 }
 0x1b8   : > { %3829 = vst.msk [vmem:[#allocation3 + $0xe0] sm:$0xff] %vm889_vm5, %v3781_v50  ;;  %v3784_v57 = vadd.f32 %v8024_v8, %v3736_v47  ;;  %3022 = vst.msk [vmem:[#allocation3 + $0x118] sm:$0xff] %vm889_vm5, %v2974_v6  ;;  %v2972_v60 = vadd.f32 %v2924_v18, %v2831_v48  ;;  %v2931_v50 = vld [vmem:[#allocation3 + $0x140] sm:$0xff]  ;;  %v6165_v48 = vrot.slane %v8503_v38, 1  ;;  %v2938_v19 = vld [vmem:[#allocation3 + $0x178] sm:$0xff] }
 0x1b9   : > { %v3734_v58 = vld [vmem:[#allocation3 + $0xe8] sm:$0xff]  ;;  %v7981_v59 = vpop.f32.mrf.mxu1  ;;  %8180 = vmatmul.mubr.msk.bf16.gmra.mxu1 %vm587_vm2, %v5467_v46  ;;  %v3645_v63 = vpop.f32.mrf.mxu0  ;;  %v5491_v28 = vsel %vm1112_vm3, %v5486_v9, %v5490_v10 }
 0x1ba   : > { %3832 = vst.msk [vmem:[#allocation3 + $0xf8] sm:$0xff] %vm889_vm5, %v3784_v57  ;;  %v3782_v44 = vadd.f32 %v3734_v58, %v3629_v20  ;;  %3020 = vst.msk [vmem:[#allocation3 + $0x108] sm:$0xff] %vm889_vm5, %v2972_v60  ;;  %v2977_v33 = vadd.f32 %v7981_v59, %v2929_v62  ;;  %8183 = vmatprep.mubr.msk.bf16.mxu1 %vm587_vm2, %v5475_v54  ;;  %v2934_v54 = vld [vmem:[#allocation3 + $0x158] sm:$0xff]  ;;  %v5499_v60 = vsel %vm1112_vm3, %v5494_v43, %v5498_v51  ;;  %v2932_v58 = vld [vmem:[#allocation3 + $0x148] sm:$0xff] }
 0x1bb   : > { %v3739_v2 = vld [vmem:[#allocation3 + $0x110] sm:$0xff]  ;;  %v2844_v3 = vpop.f32.mrf.mxu1  ;;  %v8031_v8 = vpop.f32.mrf.mxu0  ;;  %8230 = vmatmul.mubr.msk.bf16.gmra.mxu0 %vm587_vm2, %v6158_v29  ;;  %v6166_v0 = vsel %vm1927_vm4, %v6163_v17, %v6165_v48  ;;  %v2936_v17 = vld [vmem:[#allocation3 + $0x168] sm:$0xff] }
 0x1bc   : > { %3830 = vst.msk [vmem:[#allocation3 + $0xe8] sm:$0xff] %vm889_vm5, %v3782_v44  ;;  %v3787_v11 = vadd.f32 %v8027_v30, %v3739_v2  ;;  %3025 = vst.msk [vmem:[#allocation3 + $0x130] sm:$0xff] %vm889_vm5, %v2977_v33  ;;  %v2975_v15 = vadd.f32 %v2927_v7, %v2844_v3  ;;  %8233 = vmatprep.mubr.msk.bf16.mxu0 %vm587_vm2, %v6160_v5  ;;  %v2935_v7 = vld [vmem:[#allocation3 + $0x160] sm:$0xff] }
 0x1bd   : > { %v3737_v12 = vld [vmem:[#allocation3 + $0x100] sm:$0xff]  ;;  %v7982_v13 = vpop.f32.mrf.mxu1  ;;  %v3658_v61 = vpop.f32.mrf.mxu0 }
 0x1be   : > { %3835 = vst.msk [vmem:[#allocation3 + $0x110] sm:$0xff] %vm889_vm5, %v3787_v11  ;;  %v3785_v20 = vadd.f32 %v3737_v12, %v3642_v42  ;;  %3023 = vst.msk [vmem:[#allocation3 + $0x120] sm:$0xff] %vm889_vm5, %v2975_v15  ;;  %v2978_v24 = vadd.f32 %v7982_v13, %v2930_v14 }
 0x1bf   : > { %v3740_v21 = vld [vmem:[#allocation3 + $0x118] sm:$0xff]  ;;  %v2847_v22 = vpop.f32.mrf.mxu1  ;;  %v8032_v27 = vpop.f32.mrf.mxu0 }
 0x1c0   : > { %3833 = vst.msk [vmem:[#allocation3 + $0x100] sm:$0xff] %vm889_vm5, %v3785_v20  ;;  %v3788_v30 = vadd.f32 %v8028_v53, %v3740_v21  ;;  %3026 = vst.msk [vmem:[#allocation3 + $0x138] sm:$0xff] %vm889_vm5, %v2978_v24  ;;  %v2976_v31 = vadd.f32 %v2928_v23, %v2847_v22  ;;  %v4374_v22 = vld [vmem:[#allocation3 + $0x10] sm:$0xff] }
 0x1c1   : > { %v3738_v40 = vld [vmem:[#allocation3 + $0x108] sm:$0xff]  ;;  %v7985_v34 = vpop.f32.mrf.mxu1  ;;  %8184 = vmatmul.mubr.msk.bf16.gmra.mxu1 %vm587_vm2, %v5483_v16  ;;  %v3661_v36 = vpop.f32.mrf.mxu0 }
 0x1c2   : > { %3836 = vst.msk [vmem:[#allocation3 + $0x118] sm:$0xff] %vm889_vm5, %v3788_v30  ;;  %v3786_v41 = vadd.f32 %v3738_v40, %v3645_v63  ;;  %3024 = vst.msk [vmem:[#allocation3 + $0x128] sm:$0xff] %vm889_vm5, %v2976_v31  ;;  %v2981_v42 = vadd.f32 %v7985_v34, %v2933_v35  ;;  %8187 = vmatprep.mubr.msk.bf16.mxu1 %vm587_vm2, %v5491_v28 }
 0x1c3   : > { %v3743_v45 = vld [vmem:[#allocation3 + $0x130] sm:$0xff]  ;;  %v2860_v49 = vpop.f32.mrf.mxu1  ;;  %v8035_v6 = vpop.f32.mrf.mxu0  ;;  %8234 = vmatmul.mubr.msk.bf16.gmra.mxu0 %vm587_vm2, %v6162_v32  ;;  %v4372_v32 = vld [vmem:[#allocation3] sm:$0xff] }
 0x1c4   : > { %3834 = vst.msk [vmem:[#allocation3 + $0x108] sm:$0xff] %vm889_vm5, %v3786_v41  ;;  %v3791_v46 = vadd.f32 %v8031_v8, %v3743_v45  ;;  %3029 = vst.msk [vmem:[#allocation3 + $0x150] sm:$0xff] %vm889_vm5, %v2981_v42  ;;  %v2979_v47 = vadd.f32 %v2931_v50, %v2860_v49  ;;  %8237 = vmatprep.mubr.msk.bf16.mxu0 %vm587_vm2, %v6164_v37  ;;  %v4375_v37 = vld [vmem:[#allocation3 + $0x18] sm:$0xff]  ;;  %v4373_v49 = vld [vmem:[#allocation3 + $0x8] sm:$0xff] }
 0x1c5   : > { %v3741_v18 = vld [vmem:[#allocation3 + $0x120] sm:$0xff]  ;;  %v7986_v53 = vpop.f32.mrf.mxu1  ;;  %v3674_v55 = vpop.f32.mrf.mxu0 }
 0x1c6   : > { %3839 = vst.msk [vmem:[#allocation3 + $0x130] sm:$0xff] %vm889_vm5, %v3791_v46  ;;  %v3789_v56 = vadd.f32 %v3741_v18, %v3658_v61  ;;  %3027 = vst.msk [vmem:[#allocation3 + $0x140] sm:$0xff] %vm889_vm5, %v2979_v47  ;;  %v2982_v57 = vadd.f32 %v7986_v53, %v2934_v54  ;;  %v4378_v18 = vld [vmem:[#allocation3 + $0x30] sm:$0xff] }
 0x1c7   : > { %v3744_v29 = vld [vmem:[#allocation3 + $0x138] sm:$0xff]  ;;  %v2863_v39 = vpop.f32.mrf.mxu1  ;;  %v8036_v59 = vpop.f32.mrf.mxu0 }
 0x1c8   : > { %3837 = vst.msk [vmem:[#allocation3 + $0x120] sm:$0xff] %vm889_vm5, %v3789_v56  ;;  %v3792_v62 = vadd.f32 %v8032_v27, %v3744_v29  ;;  %3030 = vst.msk [vmem:[#allocation3 + $0x158] sm:$0xff] %vm889_vm5, %v2982_v57  ;;  %v2980_v63 = vadd.f32 %v2932_v58, %v2863_v39 }
 0x1c9   : > { %v3742_v4 = vld [vmem:[#allocation3 + $0x128] sm:$0xff]  ;;  %v7989_v5 = vpop.f32.mrf.mxu1  ;;  %8188 = vmatmul.mubr.msk.bf16.gmra.mxu1 %vm587_vm2, %v5499_v60  ;;  %v3677_v44 = vpop.f32.mrf.mxu0  ;;  %v4376_v60 = vld [vmem:[#allocation3 + $0x20] sm:$0xff] }
 0x1ca   : > { %3840 = vst.msk [vmem:[#allocation3 + $0x138] sm:$0xff] %vm889_vm5, %v3792_v62  ;;  %v3790_v33 = vadd.f32 %v3742_v4, %v3661_v36  ;;  %3028 = vst.msk [vmem:[#allocation3 + $0x148] sm:$0xff] %vm889_vm5, %v2980_v63  ;;  %v2985_v1 = vadd.f32 %v7989_v5, %v2937_v26  ;;  %v4379_v63 = vld [vmem:[#allocation3 + $0x38] sm:$0xff] }
 0x1cb   : > { %v3747_v2 = vld [vmem:[#allocation3 + $0x150] sm:$0xff]  ;;  %v2876_v3 = vpop.f32.mrf.mxu1  ;;  %v8039_v8 = vpop.f32.mrf.mxu0  ;;  %8238 = vmatmul.mubr.msk.bf16.gmra.mxu0 %vm587_vm2, %v6166_v0 }
 0x1cc   : > { %3838 = vst.msk [vmem:[#allocation3 + $0x128] sm:$0xff] %vm889_vm5, %v3790_v33  ;;  %v3795_v9 = vadd.f32 %v8035_v6, %v3747_v2  ;;  %3033 = vst.msk [vmem:[#allocation3 + $0x170] sm:$0xff] %vm889_vm5, %v2985_v1  ;;  %v2983_v10 = vadd.f32 %v2935_v7, %v2876_v3  ;;  %v4377_v33 = vld [vmem:[#allocation3 + $0x28] sm:$0xff] }
 0x1cd   : > { %v3745_v11 = vld [vmem:[#allocation3 + $0x140] sm:$0xff]  ;;  %v7990_v15 = vpop.f32.mrf.mxu1  ;;  %v3690_v12 = vpop.f32.mrf.mxu0 }
 0x1ce   : > { %3843 = vst.msk [vmem:[#allocation3 + $0x150] sm:$0xff] %vm889_vm5, %v3795_v9  ;;  %v3793_v13 = vadd.f32 %v3745_v11, %v3674_v55  ;;  %3031 = vst.msk [vmem:[#allocation3 + $0x160] sm:$0xff] %vm889_vm5, %v2983_v10  ;;  %v2986_v14 = vadd.f32 %v7990_v15, %v2938_v19  ;;  %v4382_v9 = vld [vmem:[#allocation3 + $0x50] sm:$0xff] }
 0x1cf   : > { %v3748_v61 = vld [vmem:[#allocation3 + $0x158] sm:$0xff]  ;;  %v2879_v16 = vpop.f32.mrf.mxu1  ;;  %v8040_v20 = vpop.f32.mrf.mxu0 }
 0x1d0   : > { %3841 = vst.msk [vmem:[#allocation3 + $0x140] sm:$0xff] %vm889_vm5, %v3793_v13  ;;  %v3796_v24 = vadd.f32 %v8036_v59, %v3748_v61  ;;  %3034 = vst.msk [vmem:[#allocation3 + $0x178] sm:$0xff] %vm889_vm5, %v2986_v14  ;;  %v2984_v25 = vadd.f32 %v2936_v17, %v2879_v16  ;;  %v4380_v13 = vld [vmem:[#allocation3 + $0x40] sm:$0xff] }
 0x1d1   : > { %v3746_v52 = vld [vmem:[#allocation3 + $0x148] sm:$0xff]  ;;  %v8045_v21 = vpop.f32.mrf.mxu1  ;;  %v3693_v23 = vpop.f32.mrf.mxu0 }
 0x1d2   : > { %3844 = vst.msk [vmem:[#allocation3 + $0x158] sm:$0xff] %vm889_vm5, %v3796_v24  ;;  %v3794_v27 = vadd.f32 %v3746_v52, %v3677_v44  ;;  %3032 = vst.msk [vmem:[#allocation3 + $0x168] sm:$0xff] %vm889_vm5, %v2984_v25  ;;  %v4422_v28 = vadd.f32 %v8045_v21, %v4374_v22  ;;  %v4383_v24 = vld [vmem:[#allocation3 + $0x58] sm:$0xff] }
 0x1d3   : > { %v3751_v30 = vld [vmem:[#allocation3 + $0x170] sm:$0xff]  ;;  %v4181_v31 = vpop.f32.mrf.mxu1  ;;  %v8095_v38 = vpop.f32.mrf.mxu0 }
 0x1d4   : > { %3842 = vst.msk [vmem:[#allocation3 + $0x148] sm:$0xff] %vm889_vm5, %v3794_v27  ;;  %v3799_v40 = vadd.f32 %v8039_v8, %v3751_v30  ;;  %4470 = vst.msk [vmem:[#allocation3 + $0x10] sm:$0xff] %vm889_vm5, %v4422_v28  ;;  %v4420_v34 = vadd.f32 %v4372_v32, %v4181_v31  ;;  %v4381_v27 = vld [vmem:[#allocation3 + $0x48] sm:$0xff] }
 0x1d5   : > { %v3749_v35 = vld [vmem:[#allocation3 + $0x160] sm:$0xff]  ;;  %v8046_v36 = vpop.f32.mrf.mxu1  ;;  %v4795_v41 = vpop.f32.mrf.mxu0 }
 0x1d6   : > { %3847 = vst.msk [vmem:[#allocation3 + $0x170] sm:$0xff] %vm889_vm5, %v3799_v40  ;;  %v3797_v42 = vadd.f32 %v3749_v35, %v3690_v12  ;;  %4468 = vst.msk [vmem:[#allocation3] sm:$0xff] %vm889_vm5, %v4420_v34  ;;  %v4423_v43 = vadd.f32 %v8046_v36, %v4375_v37  ;;  %v4386_v40 = vld [vmem:[#allocation3 + $0x70] sm:$0xff] }
 0x1d7   : > { %v3752_v51 = vld [vmem:[#allocation3 + $0x178] sm:$0xff]  ;;  %v4184_v45 = vpop.f32.mrf.mxu1  ;;  %v8096_v50 = vpop.f32.mrf.mxu0 }
 0x1d8   : > { %3845 = vst.msk [vmem:[#allocation3 + $0x160] sm:$0xff] %vm889_vm5, %v3797_v42  ;;  %v3800_v6 = vadd.f32 %v8040_v20, %v3752_v51  ;;  %4471 = vst.msk [vmem:[#allocation3 + $0x18] sm:$0xff] %vm889_vm5, %v4423_v43  ;;  %v4421_v46 = vadd.f32 %v4373_v49, %v4184_v45  ;;  %v4384_v42 = vld [vmem:[#allocation3 + $0x60] sm:$0xff] }
 0x1d9   : > { %v3750_v47 = vld [vmem:[#allocation3 + $0x168] sm:$0xff]  ;;  %v8049_v48 = vpop.f32.mrf.mxu1  ;;  %v4798_v53 = vpop.f32.mrf.mxu0 }
 0x1da   : > { %3848 = vst.msk [vmem:[#allocation3 + $0x178] sm:$0xff] %vm889_vm5, %v3800_v6  ;;  %v3798_v54 = vadd.f32 %v3750_v47, %v3693_v23  ;;  %4469 = vst.msk [vmem:[#allocation3 + $0x8] sm:$0xff] %vm889_vm5, %v4421_v46  ;;  %v4426_v55 = vadd.f32 %v8049_v48, %v4378_v18  ;;  %v4387_v6 = vld [vmem:[#allocation3 + $0x78] sm:$0xff] }
 0x1db   : > { %v4988_v56 = vld [vmem:[#allocation3 + $0x10] sm:$0xff]  ;;  %v4197_v57 = vpop.f32.mrf.mxu1  ;;  %v8099_v29 = vpop.f32.mrf.mxu0 }
 0x1dc   : > { %3846 = vst.msk [vmem:[#allocation3 + $0x168] sm:$0xff] %vm889_vm5, %v3798_v54  ;;  %v5036_v39 = vadd.f32 %v8095_v38, %v4988_v56  ;;  %4474 = vst.msk [vmem:[#allocation3 + $0x30] sm:$0xff] %vm889_vm5, %v4426_v55  ;;  %v4424_v58 = vadd.f32 %v4376_v60, %v4197_v57  ;;  %v4385_v54 = vld [vmem:[#allocation3 + $0x68] sm:$0xff] }
 0x1dd   : > { %v4986_v59 = vld [vmem:[#allocation3] sm:$0xff]  ;;  %v8050_v62 = vpop.f32.mrf.mxu1  ;;  %v4811_v0 = vpop.f32.mrf.mxu0 }
 0x1de   : > { %5084 = vst.msk [vmem:[#allocation3 + $0x10] sm:$0xff] %vm889_vm5, %v5036_v39  ;;  %v5034_v4 = vadd.f32 %v4986_v59, %v4795_v41  ;;  %4472 = vst.msk [vmem:[#allocation3 + $0x20] sm:$0xff] %vm889_vm5, %v4424_v58  ;;  %v4427_v5 = vadd.f32 %v8050_v62, %v4379_v63  ;;  %v4390_v39 = vld [vmem:[#allocation3 + $0x90] sm:$0xff] }
 0x1df   : > { %v4989_v26 = vld [vmem:[#allocation3 + $0x18] sm:$0xff]  ;;  %v4200_v44 = vpop.f32.mrf.mxu1  ;;  %v8100_v1 = vpop.f32.mrf.mxu0 }
 0x1e0   : > { %5082 = vst.msk [vmem:[#allocation3] sm:$0xff] %vm889_vm5, %v5034_v4  ;;  %v5037_v2 = vadd.f32 %v8096_v50, %v4989_v26  ;;  %4475 = vst.msk [vmem:[#allocation3 + $0x38] sm:$0xff] %vm889_vm5, %v4427_v5  ;;  %v4425_v3 = vadd.f32 %v4377_v33, %v4200_v44  ;;  %v4388_v4 = vld [vmem:[#allocation3 + $0x80] sm:$0xff] }
 0x1e1   : > { %v4987_v7 = vld [vmem:[#allocation3 + $0x8] sm:$0xff]  ;;  %v8053_v8 = vpop.f32.mrf.mxu1  ;;  %v4814_v10 = vpop.f32.mrf.mxu0 }
 0x1e2   : > { %5085 = vst.msk [vmem:[#allocation3 + $0x18] sm:$0xff] %vm889_vm5, %v5037_v2  ;;  %v5035_v11 = vadd.f32 %v4987_v7, %v4798_v53  ;;  %4473 = vst.msk [vmem:[#allocation3 + $0x28] sm:$0xff] %vm889_vm5, %v4425_v3  ;;  %v4430_v15 = vadd.f32 %v8053_v8, %v4382_v9  ;;  %v4391_v2 = vld [vmem:[#allocation3 + $0x98] sm:$0xff] }
 0x1e3   : > { %v4992_v19 = vld [vmem:[#allocation3 + $0x30] sm:$0xff]  ;;  %v4213_v12 = vpop.f32.mrf.mxu1  ;;  %v8103_v14 = vpop.f32.mrf.mxu0 }
 0x1e4   : > { %5083 = vst.msk [vmem:[#allocation3 + $0x8] sm:$0xff] %vm889_vm5, %v5035_v11  ;;  %v5040_v61 = vadd.f32 %v8099_v29, %v4992_v19  ;;  %4478 = vst.msk [vmem:[#allocation3 + $0x50] sm:$0xff] %vm889_vm5, %v4430_v15  ;;  %v4428_v16 = vadd.f32 %v4380_v13, %v4213_v12  ;;  %v4389_v11 = vld [vmem:[#allocation3 + $0x88] sm:$0xff] }
 0x1e5   : > { %v4990_v17 = vld [vmem:[#allocation3 + $0x20] sm:$0xff]  ;;  %v8054_v20 = vpop.f32.mrf.mxu1  ;;  %v4827_v25 = vpop.f32.mrf.mxu0 }
 0x1e6   : > { %5088 = vst.msk [vmem:[#allocation3 + $0x30] sm:$0xff] %vm889_vm5, %v5040_v61  ;;  %v5038_v52 = vadd.f32 %v4990_v17, %v4811_v0  ;;  %4476 = vst.msk [vmem:[#allocation3 + $0x40] sm:$0xff] %vm889_vm5, %v4428_v16  ;;  %v4431_v21 = vadd.f32 %v8054_v20, %v4383_v24  ;;  %v4394_v61 = vld [vmem:[#allocation3 + $0xb0] sm:$0xff] }
 0x1e7   : > { %v4993_v22 = vld [vmem:[#allocation3 + $0x38] sm:$0xff]  ;;  %v4216_v23 = vpop.f32.mrf.mxu1  ;;  %v8104_v28 = vpop.f32.mrf.mxu0 }
 0x1e8   : > { %5086 = vst.msk [vmem:[#allocation3 + $0x20] sm:$0xff] %vm889_vm5, %v5038_v52  ;;  %v5041_v30 = vadd.f32 %v8100_v1, %v4993_v22  ;;  %4479 = vst.msk [vmem:[#allocation3 + $0x58] sm:$0xff] %vm889_vm5, %v4431_v21  ;;  %v4429_v31 = vadd.f32 %v4381_v27, %v4216_v23  ;;  %v4392_v52 = vld [vmem:[#allocation3 + $0xa0] sm:$0xff] }
 0x1e9   : > { %v4991_v32 = vld [vmem:[#allocation3 + $0x28] sm:$0xff]  ;;  %v8057_v38 = vpop.f32.mrf.mxu1  ;;  %v4830_v34 = vpop.f32.mrf.mxu0 }
 0x1ea   : > { %5089 = vst.msk [vmem:[#allocation3 + $0x38] sm:$0xff] %vm889_vm5, %v5041_v30  ;;  %v5039_v35 = vadd.f32 %v4991_v32, %v4814_v10  ;;  %4477 = vst.msk [vmem:[#allocation3 + $0x48] sm:$0xff] %vm889_vm5, %v4429_v31  ;;  %v4434_v36 = vadd.f32 %v8057_v38, %v4386_v40  ;;  %v4395_v30 = vld [vmem:[#allocation3 + $0xb8] sm:$0xff] }
 0x1eb   : > { %v4996_v37 = vld [vmem:[#allocation3 + $0x50] sm:$0xff]  ;;  %v4229_v41 = vpop.f32.mrf.mxu1  ;;  %v8107_v43 = vpop.f32.mrf.mxu0 }
 0x1ec   : > { %5087 = vst.msk [vmem:[#allocation3 + $0x28] sm:$0xff] %vm889_vm5, %v5039_v35  ;;  %v5044_v51 = vadd.f32 %v8103_v14, %v4996_v37  ;;  %4482 = vst.msk [vmem:[#allocation3 + $0x70] sm:$0xff] %vm889_vm5, %v4434_v36  ;;  %v4432_v45 = vadd.f32 %v4384_v42, %v4229_v41  ;;  %v4393_v35 = vld [vmem:[#allocation3 + $0xa8] sm:$0xff] }
 0x1ed   : > { %v4994_v49 = vld [vmem:[#allocation3 + $0x40] sm:$0xff]  ;;  %v8058_v50 = vpop.f32.mrf.mxu1  ;;  %v4843_v46 = vpop.f32.mrf.mxu0 }
 0x1ee   : > { %5092 = vst.msk [vmem:[#allocation3 + $0x50] sm:$0xff] %vm889_vm5, %v5044_v51  ;;  %v5042_v47 = vadd.f32 %v4994_v49, %v4827_v25  ;;  %4480 = vst.msk [vmem:[#allocation3 + $0x60] sm:$0xff] %vm889_vm5, %v4432_v45  ;;  %v4435_v48 = vadd.f32 %v8058_v50, %v4387_v6  ;;  %v4398_v51 = vld [vmem:[#allocation3 + $0xd0] sm:$0xff] }
 0x1ef   : > { %v4997_v18 = vld [vmem:[#allocation3 + $0x58] sm:$0xff]  ;;  %v4232_v53 = vpop.f32.mrf.mxu1  ;;  %v8108_v55 = vpop.f32.mrf.mxu0 }
 0x1f0   : > { %5090 = vst.msk [vmem:[#allocation3 + $0x40] sm:$0xff] %vm889_vm5, %v5042_v47  ;;  %v5045_v56 = vadd.f32 %v8104_v28, %v4997_v18  ;;  %4483 = vst.msk [vmem:[#allocation3 + $0x78] sm:$0xff] %vm889_vm5, %v4435_v48  ;;  %v4433_v57 = vadd.f32 %v4385_v54, %v4232_v53  ;;  %v4396_v47 = vld [vmem:[#allocation3 + $0xc0] sm:$0xff] }
 0x1f1   : > { %v4995_v60 = vld [vmem:[#allocation3 + $0x48] sm:$0xff]  ;;  %v8061_v29 = vpop.f32.mrf.mxu1  ;;  %v4846_v58 = vpop.f32.mrf.mxu0 }
 0x1f2   : > { %5093 = vst.msk [vmem:[#allocation3 + $0x58] sm:$0xff] %vm889_vm5, %v5045_v56  ;;  %v5043_v59 = vadd.f32 %v4995_v60, %v4830_v34  ;;  %4481 = vst.msk [vmem:[#allocation3 + $0x68] sm:$0xff] %vm889_vm5, %v4433_v57  ;;  %v4438_v62 = vadd.f32 %v8061_v29, %v4390_v39  ;;  %v4399_v56 = vld [vmem:[#allocation3 + $0xd8] sm:$0xff] }
 0x1f3   : > { %v5000_v63 = vld [vmem:[#allocation3 + $0x70] sm:$0xff]  ;;  %v4245_v0 = vpop.f32.mrf.mxu1  ;;  %v8111_v5 = vpop.f32.mrf.mxu0 }
 0x1f4   : > { %5091 = vst.msk [vmem:[#allocation3 + $0x48] sm:$0xff] %vm889_vm5, %v5043_v59  ;;  %v5048_v26 = vadd.f32 %v8107_v43, %v5000_v63  ;;  %4486 = vst.msk [vmem:[#allocation3 + $0x90] sm:$0xff] %vm889_vm5, %v4438_v62  ;;  %v4436_v44 = vadd.f32 %v4388_v4, %v4245_v0  ;;  %v4397_v59 = vld [vmem:[#allocation3 + $0xc8] sm:$0xff] }
 0x1f5   : > { %v4998_v33 = vld [vmem:[#allocation3 + $0x60] sm:$0xff]  ;;  %v8062_v1 = vpop.f32.mrf.mxu1  ;;  %v4859_v3 = vpop.f32.mrf.mxu0 }
 0x1f6   : > { %5096 = vst.msk [vmem:[#allocation3 + $0x70] sm:$0xff] %vm889_vm5, %v5048_v26  ;;  %v5046_v7 = vadd.f32 %v4998_v33, %v4843_v46  ;;  %4484 = vst.msk [vmem:[#allocation3 + $0x80] sm:$0xff] %vm889_vm5, %v4436_v44  ;;  %v4439_v8 = vadd.f32 %v8062_v1, %v4391_v2  ;;  %v4402_v26 = vld [vmem:[#allocation3 + $0xf0] sm:$0xff] }
 0x1f7   : > { %v5001_v9 = vld [vmem:[#allocation3 + $0x78] sm:$0xff]  ;;  %v4248_v10 = vpop.f32.mrf.mxu1  ;;  %v8112_v15 = vpop.f32.mrf.mxu0 }
 0x1f8   : > { %5094 = vst.msk [vmem:[#allocation3 + $0x60] sm:$0xff] %vm889_vm5, %v5046_v7  ;;  %v5049_v19 = vadd.f32 %v8108_v55, %v5001_v9  ;;  %4487 = vst.msk [vmem:[#allocation3 + $0x98] sm:$0xff] %vm889_vm5, %v4439_v8  ;;  %v4437_v12 = vadd.f32 %v4389_v11, %v4248_v10  ;;  %v4400_v7 = vld [vmem:[#allocation3 + $0xe0] sm:$0xff] }
 0x1f9   : > { %v4999_v13 = vld [vmem:[#allocation3 + $0x68] sm:$0xff]  ;;  %v8065_v14 = vpop.f32.mrf.mxu1  ;;  %v4862_v16 = vpop.f32.mrf.mxu0 }
 0x1fa   : > { %5097 = vst.msk [vmem:[#allocation3 + $0x78] sm:$0xff] %vm889_vm5, %v5049_v19  ;;  %v5047_v17 = vadd.f32 %v4999_v13, %v4846_v58  ;;  %4485 = vst.msk [vmem:[#allocation3 + $0x88] sm:$0xff] %vm889_vm5, %v4437_v12  ;;  %v4442_v20 = vadd.f32 %v8065_v14, %v4394_v61  ;;  %v4403_v19 = vld [vmem:[#allocation3 + $0xf8] sm:$0xff] }
 0x1fb   : > { %v5004_v24 = vld [vmem:[#allocation3 + $0x90] sm:$0xff]  ;;  %v4261_v25 = vpop.f32.mrf.mxu1  ;;  %v8115_v21 = vpop.f32.mrf.mxu0 }
 0x1fc   : > { %5095 = vst.msk [vmem:[#allocation3 + $0x68] sm:$0xff] %vm889_vm5, %v5047_v17  ;;  %v5052_v22 = vadd.f32 %v8111_v5, %v5004_v24  ;;  %4490 = vst.msk [vmem:[#allocation3 + $0xb0] sm:$0xff] %vm889_vm5, %v4442_v20  ;;  %v4440_v23 = vadd.f32 %v4392_v52, %v4261_v25  ;;  %v4401_v17 = vld [vmem:[#allocation3 + $0xe8] sm:$0xff] }
 0x1fd   : > { %v5002_v27 = vld [vmem:[#allocation3 + $0x80] sm:$0xff]  ;;  %v8066_v28 = vpop.f32.mrf.mxu1  ;;  %v4875_v31 = vpop.f32.mrf.mxu0 }
 0x1fe   : > { %5100 = vst.msk [vmem:[#allocation3 + $0x90] sm:$0xff] %vm889_vm5, %v5052_v22  ;;  %v5050_v32 = vadd.f32 %v5002_v27, %v4859_v3  ;;  %4488 = vst.msk [vmem:[#allocation3 + $0xa0] sm:$0xff] %vm889_vm5, %v4440_v23  ;;  %v4443_v38 = vadd.f32 %v8066_v28, %v4395_v30  ;;  %v4406_v22 = vld [vmem:[#allocation3 + $0x110] sm:$0xff] }
 0x1ff   : > { %v5005_v40 = vld [vmem:[#allocation3 + $0x98] sm:$0xff]  ;;  %v4264_v34 = vpop.f32.mrf.mxu1  ;;  %v8116_v36 = vpop.f32.mrf.mxu0 }
 0x200   : > { %5098 = vst.msk [vmem:[#allocation3 + $0x80] sm:$0xff] %vm889_vm5, %v5050_v32  ;;  %v5053_v37 = vadd.f32 %v8112_v15, %v5005_v40  ;;  %4491 = vst.msk [vmem:[#allocation3 + $0xb8] sm:$0xff] %vm889_vm5, %v4443_v38  ;;  %v4441_v41 = vadd.f32 %v4393_v35, %v4264_v34  ;;  %v4404_v32 = vld [vmem:[#allocation3 + $0x100] sm:$0xff] }
 0x201   : > { %v5003_v42 = vld [vmem:[#allocation3 + $0x88] sm:$0xff]  ;;  %v8069_v43 = vpop.f32.mrf.mxu1  ;;  %v4878_v45 = vpop.f32.mrf.mxu0 }
 0x202   : > { %5101 = vst.msk [vmem:[#allocation3 + $0x98] sm:$0xff] %vm889_vm5, %v5053_v37  ;;  %v5051_v49 = vadd.f32 %v5003_v42, %v4862_v16  ;;  %4489 = vst.msk [vmem:[#allocation3 + $0xa8] sm:$0xff] %vm889_vm5, %v4441_v41  ;;  %v4446_v50 = vadd.f32 %v8069_v43, %v4398_v51  ;;  %v4407_v37 = vld [vmem:[#allocation3 + $0x118] sm:$0xff] }
 0x203   : > { %v5008_v6 = vld [vmem:[#allocation3 + $0xb0] sm:$0xff]  ;;  %v4277_v46 = vpop.f32.mrf.mxu1  ;;  %v8119_v48 = vpop.f32.mrf.mxu0 }
 0x204   : > { %5099 = vst.msk [vmem:[#allocation3 + $0x88] sm:$0xff] %vm889_vm5, %v5051_v49  ;;  %v5056_v18 = vadd.f32 %v8115_v21, %v5008_v6  ;;  %4494 = vst.msk [vmem:[#allocation3 + $0xd0] sm:$0xff] %vm889_vm5, %v4446_v50  ;;  %v4444_v53 = vadd.f32 %v4396_v47, %v4277_v46  ;;  %v4405_v49 = vld [vmem:[#allocation3 + $0x108] sm:$0xff] }
 0x205   : > { %v5006_v54 = vld [vmem:[#allocation3 + $0xa0] sm:$0xff]  ;;  %v8070_v55 = vpop.f32.mrf.mxu1  ;;  %v4891_v57 = vpop.f32.mrf.mxu0 }
 0x206   : > { %5104 = vst.msk [vmem:[#allocation3 + $0xb0] sm:$0xff] %vm889_vm5, %v5056_v18  ;;  %v5054_v60 = vadd.f32 %v5006_v54, %v4875_v31  ;;  %4492 = vst.msk [vmem:[#allocation3 + $0xc0] sm:$0xff] %vm889_vm5, %v4444_v53  ;;  %v4447_v29 = vadd.f32 %v8070_v55, %v4399_v56  ;;  %v4410_v18 = vld [vmem:[#allocation3 + $0x130] sm:$0xff] }
 0x207   : > { %v5009_v39 = vld [vmem:[#allocation3 + $0xb8] sm:$0xff]  ;;  %v4280_v58 = vpop.f32.mrf.mxu1  ;;  %v8120_v62 = vpop.f32.mrf.mxu0 }
 0x208   : > { %5102 = vst.msk [vmem:[#allocation3 + $0xa0] sm:$0xff] %vm889_vm5, %v5054_v60  ;;  %v5057_v63 = vadd.f32 %v8116_v36, %v5009_v39  ;;  %4495 = vst.msk [vmem:[#allocation3 + $0xd8] sm:$0xff] %vm889_vm5, %v4447_v29  ;;  %v4445_v0 = vadd.f32 %v4397_v59, %v4280_v58  ;;  %v4408_v60 = vld [vmem:[#allocation3 + $0x120] sm:$0xff] }
 0x209   : > { %v5007_v4 = vld [vmem:[#allocation3 + $0xa8] sm:$0xff]  ;;  %v8073_v5 = vpop.f32.mrf.mxu1  ;;  %v4894_v44 = vpop.f32.mrf.mxu0 }
 0x20a   : > { %5105 = vst.msk [vmem:[#allocation3 + $0xb8] sm:$0xff] %vm889_vm5, %v5057_v63  ;;  %v5055_v33 = vadd.f32 %v5007_v4, %v4878_v45  ;;  %4493 = vst.msk [vmem:[#allocation3 + $0xc8] sm:$0xff] %vm889_vm5, %v4445_v0  ;;  %v4450_v1 = vadd.f32 %v8073_v5, %v4402_v26  ;;  %v4411_v63 = vld [vmem:[#allocation3 + $0x138] sm:$0xff] }
 0x20b   : > { %v5012_v2 = vld [vmem:[#allocation3 + $0xd0] sm:$0xff]  ;;  %v4293_v3 = vpop.f32.mrf.mxu1  ;;  %v8123_v8 = vpop.f32.mrf.mxu0 }
 0x20c   : > { %5103 = vst.msk [vmem:[#allocation3 + $0xa8] sm:$0xff] %vm889_vm5, %v5055_v33  ;;  %v5060_v9 = vadd.f32 %v8119_v48, %v5012_v2  ;;  %4498 = vst.msk [vmem:[#allocation3 + $0xf0] sm:$0xff] %vm889_vm5, %v4450_v1  ;;  %v4448_v10 = vadd.f32 %v4400_v7, %v4293_v3  ;;  %v4409_v33 = vld [vmem:[#allocation3 + $0x128] sm:$0xff] }
 0x20d   : > { %v5010_v11 = vld [vmem:[#allocation3 + $0xc0] sm:$0xff]  ;;  %v8074_v15 = vpop.f32.mrf.mxu1  ;;  %v4907_v12 = vpop.f32.mrf.mxu0 }
 0x20e   : > { %5108 = vst.msk [vmem:[#allocation3 + $0xd0] sm:$0xff] %vm889_vm5, %v5060_v9  ;;  %v5058_v13 = vadd.f32 %v5010_v11, %v4891_v57  ;;  %4496 = vst.msk [vmem:[#allocation3 + $0xe0] sm:$0xff] %vm889_vm5, %v4448_v10  ;;  %v4451_v14 = vadd.f32 %v8074_v15, %v4403_v19  ;;  %v4414_v9 = vld [vmem:[#allocation3 + $0x150] sm:$0xff] }
 0x20f   : > { %v5013_v61 = vld [vmem:[#allocation3 + $0xd8] sm:$0xff]  ;;  %v4296_v16 = vpop.f32.mrf.mxu1  ;;  %v8124_v20 = vpop.f32.mrf.mxu0 }
 0x210   : > { %5106 = vst.msk [vmem:[#allocation3 + $0xc0] sm:$0xff] %vm889_vm5, %v5058_v13  ;;  %v5061_v24 = vadd.f32 %v8120_v62, %v5013_v61  ;;  %4499 = vst.msk [vmem:[#allocation3 + $0xf8] sm:$0xff] %vm889_vm5, %v4451_v14  ;;  %v4449_v25 = vadd.f32 %v4401_v17, %v4296_v16  ;;  %v4412_v13 = vld [vmem:[#allocation3 + $0x140] sm:$0xff] }
 0x211   : > { %v5011_v52 = vld [vmem:[#allocation3 + $0xc8] sm:$0xff]  ;;  %v8077_v21 = vpop.f32.mrf.mxu1  ;;  %v4910_v23 = vpop.f32.mrf.mxu0 }
 0x212   : > { %5109 = vst.msk [vmem:[#allocation3 + $0xd8] sm:$0xff] %vm889_vm5, %v5061_v24  ;;  %v5059_v27 = vadd.f32 %v5011_v52, %v4894_v44  ;;  %4497 = vst.msk [vmem:[#allocation3 + $0xe8] sm:$0xff] %vm889_vm5, %v4449_v25  ;;  %v4454_v28 = vadd.f32 %v8077_v21, %v4406_v22  ;;  %v4415_v24 = vld [vmem:[#allocation3 + $0x158] sm:$0xff] }
 0x213   : > { %v5016_v30 = vld [vmem:[#allocation3 + $0xf0] sm:$0xff]  ;;  %v4309_v31 = vpop.f32.mrf.mxu1  ;;  %v8127_v38 = vpop.f32.mrf.mxu0 }
 0x214   : > { %5107 = vst.msk [vmem:[#allocation3 + $0xc8] sm:$0xff] %vm889_vm5, %v5059_v27  ;;  %v5064_v40 = vadd.f32 %v8123_v8, %v5016_v30  ;;  %4502 = vst.msk [vmem:[#allocation3 + $0x110] sm:$0xff] %vm889_vm5, %v4454_v28  ;;  %v4452_v34 = vadd.f32 %v4404_v32, %v4309_v31  ;;  %v4413_v27 = vld [vmem:[#allocation3 + $0x148] sm:$0xff] }
 0x215   : > { %v5014_v35 = vld [vmem:[#allocation3 + $0xe0] sm:$0xff]  ;;  %v8078_v36 = vpop.f32.mrf.mxu1  ;;  %v4923_v41 = vpop.f32.mrf.mxu0 }
 0x216   : > { %5112 = vst.msk [vmem:[#allocation3 + $0xf0] sm:$0xff] %vm889_vm5, %v5064_v40  ;;  %v5062_v42 = vadd.f32 %v5014_v35, %v4907_v12  ;;  %4500 = vst.msk [vmem:[#allocation3 + $0x100] sm:$0xff] %vm889_vm5, %v4452_v34  ;;  %v4455_v43 = vadd.f32 %v8078_v36, %v4407_v37  ;;  %v4418_v40 = vld [vmem:[#allocation3 + $0x170] sm:$0xff] }
 0x217   : > { %v5017_v51 = vld [vmem:[#allocation3 + $0xf8] sm:$0xff]  ;;  %v4312_v45 = vpop.f32.mrf.mxu1  ;;  %v8128_v50 = vpop.f32.mrf.mxu0 }
 0x218   : > { %5110 = vst.msk [vmem:[#allocation3 + $0xe0] sm:$0xff] %vm889_vm5, %v5062_v42  ;;  %v5065_v6 = vadd.f32 %v8124_v20, %v5017_v51  ;;  %4503 = vst.msk [vmem:[#allocation3 + $0x118] sm:$0xff] %vm889_vm5, %v4455_v43  ;;  %v4453_v46 = vadd.f32 %v4405_v49, %v4312_v45  ;;  %v4416_v42 = vld [vmem:[#allocation3 + $0x160] sm:$0xff] }
 0x219   : > { %v5015_v47 = vld [vmem:[#allocation3 + $0xe8] sm:$0xff]  ;;  %v8081_v48 = vpop.f32.mrf.mxu1  ;;  %v4926_v53 = vpop.f32.mrf.mxu0 }
 0x21a   : > { %5113 = vst.msk [vmem:[#allocation3 + $0xf8] sm:$0xff] %vm889_vm5, %v5065_v6  ;;  %v5063_v54 = vadd.f32 %v5015_v47, %v4910_v23  ;;  %4501 = vst.msk [vmem:[#allocation3 + $0x108] sm:$0xff] %vm889_vm5, %v4453_v46  ;;  %v4458_v55 = vadd.f32 %v8081_v48, %v4410_v18  ;;  %v4419_v6 = vld [vmem:[#allocation3 + $0x178] sm:$0xff] }
 0x21b   : > { %v5020_v56 = vld [vmem:[#allocation3 + $0x110] sm:$0xff]  ;;  %v4325_v57 = vpop.f32.mrf.mxu1  ;;  %v8131_v29 = vpop.f32.mrf.mxu0 }
 0x21c   : > { %5111 = vst.msk [vmem:[#allocation3 + $0xe8] sm:$0xff] %vm889_vm5, %v5063_v54  ;;  %v5068_v39 = vadd.f32 %v8127_v38, %v5020_v56  ;;  %4506 = vst.msk [vmem:[#allocation3 + $0x130] sm:$0xff] %vm889_vm5, %v4458_v55  ;;  %v4456_v58 = vadd.f32 %v4408_v60, %v4325_v57  ;;  %v4417_v54 = vld [vmem:[#allocation3 + $0x168] sm:$0xff] }
 0x21d   : > { %v5018_v59 = vld [vmem:[#allocation3 + $0x100] sm:$0xff]  ;;  %v8082_v62 = vpop.f32.mrf.mxu1  ;;  %v4939_v0 = vpop.f32.mrf.mxu0 }
 0x21e   : > { %5116 = vst.msk [vmem:[#allocation3 + $0x110] sm:$0xff] %vm889_vm5, %v5068_v39  ;;  %v5066_v4 = vadd.f32 %v5018_v59, %v4923_v41  ;;  %4504 = vst.msk [vmem:[#allocation3 + $0x120] sm:$0xff] %vm889_vm5, %v4456_v58  ;;  %v4459_v5 = vadd.f32 %v8082_v62, %v4411_v63  ;;  %v5802_v39 = vld [vmem:[#allocation3 + $0x10] sm:$0xff] }
 0x21f   : > { %v5021_v26 = vld [vmem:[#allocation3 + $0x118] sm:$0xff]  ;;  %v4328_v44 = vpop.f32.mrf.mxu1  ;;  %v8132_v1 = vpop.f32.mrf.mxu0 }
 0x220   : > { %5114 = vst.msk [vmem:[#allocation3 + $0x100] sm:$0xff] %vm889_vm5, %v5066_v4  ;;  %v5069_v2 = vadd.f32 %v8128_v50, %v5021_v26  ;;  %4507 = vst.msk [vmem:[#allocation3 + $0x138] sm:$0xff] %vm889_vm5, %v4459_v5  ;;  %v4457_v3 = vadd.f32 %v4409_v33, %v4328_v44  ;;  %v5800_v4 = vld [vmem:[#allocation3] sm:$0xff] }
 0x221   : > { %v5019_v7 = vld [vmem:[#allocation3 + $0x108] sm:$0xff]  ;;  %v8085_v8 = vpop.f32.mrf.mxu1  ;;  %v4942_v10 = vpop.f32.mrf.mxu0 }
 0x222   : > { %5117 = vst.msk [vmem:[#allocation3 + $0x118] sm:$0xff] %vm889_vm5, %v5069_v2  ;;  %v5067_v11 = vadd.f32 %v5019_v7, %v4926_v53  ;;  %4505 = vst.msk [vmem:[#allocation3 + $0x128] sm:$0xff] %vm889_vm5, %v4457_v3  ;;  %v4462_v15 = vadd.f32 %v8085_v8, %v4414_v9  ;;  %v5803_v2 = vld [vmem:[#allocation3 + $0x18] sm:$0xff] }
 0x223   : > { %v5024_v19 = vld [vmem:[#allocation3 + $0x130] sm:$0xff]  ;;  %v4341_v12 = vpop.f32.mrf.mxu1  ;;  %v8135_v14 = vpop.f32.mrf.mxu0 }
 0x224   : > { %5115 = vst.msk [vmem:[#allocation3 + $0x108] sm:$0xff] %vm889_vm5, %v5067_v11  ;;  %v5072_v61 = vadd.f32 %v8131_v29, %v5024_v19  ;;  %4510 = vst.msk [vmem:[#allocation3 + $0x150] sm:$0xff] %vm889_vm5, %v4462_v15  ;;  %v4460_v16 = vadd.f32 %v4412_v13, %v4341_v12  ;;  %v5801_v11 = vld [vmem:[#allocation3 + $0x8] sm:$0xff] }
 0x225   : > { %v5022_v17 = vld [vmem:[#allocation3 + $0x120] sm:$0xff]  ;;  %v8086_v20 = vpop.f32.mrf.mxu1  ;;  %v4955_v25 = vpop.f32.mrf.mxu0 }
 0x226   : > { %5120 = vst.msk [vmem:[#allocation3 + $0x130] sm:$0xff] %vm889_vm5, %v5072_v61  ;;  %v5070_v52 = vadd.f32 %v5022_v17, %v4939_v0  ;;  %4508 = vst.msk [vmem:[#allocation3 + $0x140] sm:$0xff] %vm889_vm5, %v4460_v16  ;;  %v4463_v21 = vadd.f32 %v8086_v20, %v4415_v24  ;;  %v5806_v61 = vld [vmem:[#allocation3 + $0x30] sm:$0xff] }
 0x227   : > { %v5025_v22 = vld [vmem:[#allocation3 + $0x138] sm:$0xff]  ;;  %v4344_v23 = vpop.f32.mrf.mxu1  ;;  %v8136_v28 = vpop.f32.mrf.mxu0 }
 0x228   : > { %5118 = vst.msk [vmem:[#allocation3 + $0x120] sm:$0xff] %vm889_vm5, %v5070_v52  ;;  %v5073_v30 = vadd.f32 %v8132_v1, %v5025_v22  ;;  %4511 = vst.msk [vmem:[#allocation3 + $0x158] sm:$0xff] %vm889_vm5, %v4463_v21  ;;  %v4461_v31 = vadd.f32 %v4413_v27, %v4344_v23  ;;  %v5804_v52 = vld [vmem:[#allocation3 + $0x20] sm:$0xff] }
 0x229   : > { %v5023_v32 = vld [vmem:[#allocation3 + $0x128] sm:$0xff]  ;;  %v8089_v38 = vpop.f32.mrf.mxu1  ;;  %v4958_v34 = vpop.f32.mrf.mxu0 }
 0x22a   : > { %5121 = vst.msk [vmem:[#allocation3 + $0x138] sm:$0xff] %vm889_vm5, %v5073_v30  ;;  %v5071_v35 = vadd.f32 %v5023_v32, %v4942_v10  ;;  %4509 = vst.msk [vmem:[#allocation3 + $0x148] sm:$0xff] %vm889_vm5, %v4461_v31  ;;  %v4466_v36 = vadd.f32 %v8089_v38, %v4418_v40  ;;  %v5807_v30 = vld [vmem:[#allocation3 + $0x38] sm:$0xff] }
 0x22b   : > { %v5028_v37 = vld [vmem:[#allocation3 + $0x150] sm:$0xff]  ;;  %v4357_v41 = vpop.f32.mrf.mxu1  ;;  %v8139_v43 = vpop.f32.mrf.mxu0 }
 0x22c   : > { %5119 = vst.msk [vmem:[#allocation3 + $0x128] sm:$0xff] %vm889_vm5, %v5071_v35  ;;  %v5076_v51 = vadd.f32 %v8135_v14, %v5028_v37  ;;  %4514 = vst.msk [vmem:[#allocation3 + $0x170] sm:$0xff] %vm889_vm5, %v4466_v36  ;;  %v4464_v45 = vadd.f32 %v4416_v42, %v4357_v41  ;;  %v5805_v35 = vld [vmem:[#allocation3 + $0x28] sm:$0xff] }
 0x22d   : > { %v5026_v49 = vld [vmem:[#allocation3 + $0x140] sm:$0xff]  ;;  %v8090_v50 = vpop.f32.mrf.mxu1  ;;  %v4971_v46 = vpop.f32.mrf.mxu0 }
 0x22e   : > { %5124 = vst.msk [vmem:[#allocation3 + $0x150] sm:$0xff] %vm889_vm5, %v5076_v51  ;;  %v5074_v47 = vadd.f32 %v5026_v49, %v4955_v25  ;;  %4512 = vst.msk [vmem:[#allocation3 + $0x160] sm:$0xff] %vm889_vm5, %v4464_v45  ;;  %v4467_v48 = vadd.f32 %v8090_v50, %v4419_v6  ;;  %v5810_v51 = vld [vmem:[#allocation3 + $0x50] sm:$0xff]  ;;  %v9735_v6 = vld [vmem:[%s10189_s3] ss:$0 sm:$0xff] }
 0x22f   : > { %v5029_v18 = vld [vmem:[#allocation3 + $0x158] sm:$0xff]  ;;  %v4360_v53 = vpop.f32.mrf.mxu1  ;;  %v8140_v55 = vpop.f32.mrf.mxu0 }
 0x230   : > { %5122 = vst.msk [vmem:[#allocation3 + $0x140] sm:$0xff] %vm889_vm5, %v5074_v47  ;;  %v5077_v56 = vadd.f32 %v8136_v28, %v5029_v18  ;;  %4515 = vst.msk [vmem:[#allocation3 + $0x178] sm:$0xff] %vm889_vm5, %v4467_v48  ;;  %v4465_v57 = vadd.f32 %v4417_v54, %v4360_v53  ;;  %v5808_v48 = vld [vmem:[#allocation3 + $0x40] sm:$0xff] }
 0x231   : > { %v5027_v60 = vld [vmem:[#allocation3 + $0x148] sm:$0xff]  ;;  %v8145_v29 = vpop.f32.mrf.mxu1  ;;  %v4974_v58 = vpop.f32.mrf.mxu0 }
 0x232   : > { %5125 = vst.msk [vmem:[#allocation3 + $0x158] sm:$0xff] %vm889_vm5, %v5077_v56  ;;  %v5075_v59 = vadd.f32 %v5027_v60, %v4958_v34  ;;  %4513 = vst.msk [vmem:[#allocation3 + $0x168] sm:$0xff] %vm889_vm5, %v4465_v57  ;;  %v5850_v62 = vadd.f32 %v8145_v29, %v5802_v39  ;;  %v5811_v60 = vld [vmem:[#allocation3 + $0x58] sm:$0xff] }
 0x233   : > { %v5032_v63 = vld [vmem:[#allocation3 + $0x170] sm:$0xff]  ;;  %v5609_v0 = vpop.f32.mrf.mxu1  ;;  %v8195_v5 = vpop.f32.mrf.mxu0 }
 0x234   : > { %5123 = vst.msk [vmem:[#allocation3 + $0x148] sm:$0xff] %vm889_vm5, %v5075_v59  ;;  %v5080_v26 = vadd.f32 %v8139_v43, %v5032_v63  ;;  %5898 = vst.msk [vmem:[#allocation3 + $0x10] sm:$0xff] %vm889_vm5, %v5850_v62  ;;  %v5848_v44 = vadd.f32 %v5800_v4, %v5609_v0  ;;  %v5809_v4 = vld [vmem:[#allocation3 + $0x48] sm:$0xff] }
 0x235   : > { %v5030_v33 = vld [vmem:[#allocation3 + $0x160] sm:$0xff]  ;;  %v8146_v1 = vpop.f32.mrf.mxu1  ;;  %v6276_v3 = vpop.f32.mrf.mxu0 }
 0x236   : > { %5128 = vst.msk [vmem:[#allocation3 + $0x170] sm:$0xff] %vm889_vm5, %v5080_v26  ;;  %v5078_v7 = vadd.f32 %v5030_v33, %v4971_v46  ;;  %5896 = vst.msk [vmem:[#allocation3] sm:$0xff] %vm889_vm5, %v5848_v44  ;;  %v5851_v8 = vadd.f32 %v8146_v1, %v5803_v2 }
 0x237   : > { %v5033_v9 = vld [vmem:[#allocation3 + $0x178] sm:$0xff]  ;;  %v5612_v10 = vpop.f32.mrf.mxu1  ;;  %v8196_v15 = vpop.f32.mrf.mxu0 }
 0x238   : > { %5126 = vst.msk [vmem:[#allocation3 + $0x160] sm:$0xff] %vm889_vm5, %v5078_v7  ;;  %v5081_v19 = vadd.f32 %v8140_v55, %v5033_v9  ;;  %5899 = vst.msk [vmem:[#allocation3 + $0x18] sm:$0xff] %vm889_vm5, %v5851_v8  ;;  %v5849_v12 = vadd.f32 %v5801_v11, %v5612_v10 }
 0x239   : > { %v5031_v13 = vld [vmem:[#allocation3 + $0x168] sm:$0xff]  ;;  %v8149_v14 = vpop.f32.mrf.mxu1  ;;  %v6279_v16 = vpop.f32.mrf.mxu0 }
 0x23a   : > { %5129 = vst.msk [vmem:[#allocation3 + $0x178] sm:$0xff] %vm889_vm5, %v5081_v19  ;;  %v5079_v17 = vadd.f32 %v5031_v13, %v4974_v58  ;;  %5897 = vst.msk [vmem:[#allocation3 + $0x8] sm:$0xff] %vm889_vm5, %v5849_v12  ;;  %v5854_v20 = vadd.f32 %v8149_v14, %v5806_v61  ;;  %v5814_v19 = vld [vmem:[#allocation3 + $0x70] sm:$0xff] }
 0x23b   : > { %v6469_v24 = vld [vmem:[#allocation3 + $0x10] sm:$0xff]  ;;  %v5625_v25 = vpop.f32.mrf.mxu1  ;;  %v8199_v21 = vpop.f32.mrf.mxu0 }
 0x23c   : > { %5127 = vst.msk [vmem:[#allocation3 + $0x168] sm:$0xff] %vm889_vm5, %v5079_v17  ;;  %v6517_v22 = vadd.f32 %v8195_v5, %v6469_v24  ;;  %5902 = vst.msk [vmem:[#allocation3 + $0x30] sm:$0xff] %vm889_vm5, %v5854_v20  ;;  %v5852_v23 = vadd.f32 %v5804_v52, %v5625_v25  ;;  %v5812_v52 = vld [vmem:[#allocation3 + $0x60] sm:$0xff] }
 0x23d   : > { %v6467_v27 = vld [vmem:[#allocation3] sm:$0xff]  ;;  %v8150_v28 = vpop.f32.mrf.mxu1  ;;  %v6292_v31 = vpop.f32.mrf.mxu0 }
 0x23e   : > { %6565 = vst.msk [vmem:[#allocation3 + $0x10] sm:$0xff] %vm889_vm5, %v6517_v22  ;;  %v6515_v32 = vadd.f32 %v6467_v27, %v6276_v3  ;;  %5900 = vst.msk [vmem:[#allocation3 + $0x20] sm:$0xff] %vm889_vm5, %v5852_v23  ;;  %v5855_v38 = vadd.f32 %v8150_v28, %v5807_v30 }
 0x23f   : > { %v6470_v40 = vld [vmem:[#allocation3 + $0x18] sm:$0xff]  ;;  %v5628_v34 = vpop.f32.mrf.mxu1  ;;  %v8200_v36 = vpop.f32.mrf.mxu0 }
 0x240   : > { %6563 = vst.msk [vmem:[#allocation3] sm:$0xff] %vm889_vm5, %v6515_v32  ;;  %v6518_v37 = vadd.f32 %v8196_v15, %v6470_v40  ;;  %5903 = vst.msk [vmem:[#allocation3 + $0x38] sm:$0xff] %vm889_vm5, %v5855_v38  ;;  %v5853_v41 = vadd.f32 %v5805_v35, %v5628_v34  ;;  %v5815_v34 = vld [vmem:[#allocation3 + $0x78] sm:$0xff] }
 0x241   : > { %v6468_v42 = vld [vmem:[#allocation3 + $0x8] sm:$0xff]  ;;  %v8153_v43 = vpop.f32.mrf.mxu1  ;;  %v6295_v45 = vpop.f32.mrf.mxu0 }
 0x242   : > { %6566 = vst.msk [vmem:[#allocation3 + $0x18] sm:$0xff] %vm889_vm5, %v6518_v37  ;;  %v6516_v49 = vadd.f32 %v6468_v42, %v6279_v16  ;;  %5901 = vst.msk [vmem:[#allocation3 + $0x28] sm:$0xff] %vm889_vm5, %v5853_v41  ;;  %v5858_v50 = vadd.f32 %v8153_v43, %v5810_v51 }
 0x243   : > { %v6473_v46 = vld [vmem:[#allocation3 + $0x30] sm:$0xff]  ;;  %v5641_v47 = vpop.f32.mrf.mxu1  ;;  %v8203_v18 = vpop.f32.mrf.mxu0 }
 0x244   : > { %6564 = vst.msk [vmem:[#allocation3 + $0x8] sm:$0xff] %vm889_vm5, %v6516_v49  ;;  %v6521_v53 = vadd.f32 %v8199_v21, %v6473_v46  ;;  %5906 = vst.msk [vmem:[#allocation3 + $0x50] sm:$0xff] %vm889_vm5, %v5858_v50  ;;  %v5856_v54 = vadd.f32 %v5808_v48, %v5641_v47  ;;  %v5813_v47 = vld [vmem:[#allocation3 + $0x68] sm:$0xff] }
 0x245   : > { %v6613_v55 = vld [vmem:[#allocation3 + $0x10] sm:$0xff]  ;;  %v6471_v56 = vld [vmem:[#allocation3 + $0x20] sm:$0xff]  ;;  %v8154_v57 = vpop.f32.mrf.mxu1  ;;  %v6308_v29 = vpop.f32.mrf.mxu0 }
 0x246   : > { %v6668_v39 = vadd.f32 %v9735_v6, %v6613_v55  ;;  %6569 = vst.msk [vmem:[#allocation3 + $0x30] sm:$0xff] %vm889_vm5, %v6521_v53  ;;  %v6519_v58 = vadd.f32 %v6471_v56, %v6292_v31  ;;  %5904 = vst.msk [vmem:[#allocation3 + $0x40] sm:$0xff] %vm889_vm5, %v5856_v54  ;;  %v5859_v59 = vadd.f32 %v8154_v57, %v5811_v60 }
 0x247   : > { %v6611_v62 = vld [vmem:[#allocation3] sm:$0xff]  ;;  %v6474_v63 = vld [vmem:[#allocation3 + $0x38] sm:$0xff]  ;;  %v5644_v0 = vpop.f32.mrf.mxu1  ;;  %v8204_v5 = vpop.f32.mrf.mxu0 }
 0x248   : > { %v6716_v26 = vadd.f32 3.0, %v6668_v39  ;;  %v9743_v44 = vadd.f32 %v9735_v6, %v6611_v62  ;;  %6567 = vst.msk [vmem:[#allocation3 + $0x20] sm:$0xff] %vm889_vm5, %v6519_v58  ;;  %v6522_v33 = vadd.f32 %v8200_v36, %v6474_v63  ;;  %5907 = vst.msk [vmem:[#allocation3 + $0x58] sm:$0xff] %vm889_vm5, %v5859_v59  ;;  %v5857_v1 = vadd.f32 %v5809_v4, %v5644_v0  ;;  %v5818_v62 = vld [vmem:[#allocation3 + $0x90] sm:$0xff] }
 0x249   : > { %v6614_v2 = vld [vmem:[#allocation3 + $0x18] sm:$0xff]  ;;  %v6472_v3 = vld [vmem:[#allocation3 + $0x28] sm:$0xff]  ;;  %v8157_v7 = vpop.f32.mrf.mxu1  ;;  %v9747_v8 = vpop.f32.mrf.mxu0 }
 0x24a   : > { %v6764_v9 = vmax.f32 %v6716_v26, 0.0  ;;  %v6714_v10 = vadd.f32 3.0, %v9743_v44  ;;  %v9751_v11 = vadd.f32 %v9735_v6, %v6614_v2  ;;  %6570 = vst.msk [vmem:[#allocation3 + $0x38] sm:$0xff] %vm889_vm5, %v6522_v33  ;;  %v6520_v15 = vadd.f32 %v6472_v3, %v6295_v45  ;;  %5905 = vst.msk [vmem:[#allocation3 + $0x48] sm:$0xff] %vm889_vm5, %v5857_v1 }
 0x24b   : > { %v6612_v12 = vld [vmem:[#allocation3 + $0x8] sm:$0xff]  ;;  %v6477_v13 = vld [vmem:[#allocation3 + $0x50] sm:$0xff]  ;;  %v5862_v14 = vadd.f32 %v8157_v7, %v5814_v19  ;;  %v5657_v61 = vpop.f32.mrf.mxu1  ;;  %v9756_v16 = vpop.f32.mrf.mxu0 }
 0x24c   : > { %v6812_v17 = vmin.f32 %v6764_v9, 6.0  ;;  %v6762_v20 = vmax.f32 %v6714_v10, 0.0  ;;  %v6717_v24 = vadd.f32 3.0, %v9751_v11  ;;  %v9760_v25 = vadd.f32 %v9735_v6, %v6612_v12  ;;  %6568 = vst.msk [vmem:[#allocation3 + $0x28] sm:$0xff] %vm889_vm5, %v6520_v15  ;;  %v5816_v10 = vld [vmem:[#allocation3 + $0x80] sm:$0xff] }
 0x24d   : > { %v6617_v21 = vld [vmem:[#allocation3 + $0x30] sm:$0xff]  ;;  %v6525_v22 = vadd.f32 %v8203_v18, %v6477_v13  ;;  %v6475_v23 = vld [vmem:[#allocation3 + $0x40] sm:$0xff]  ;;  %5910 = vst.msk [vmem:[#allocation3 + $0x70] sm:$0xff] %vm889_vm5, %v5862_v14  ;;  %v5860_v27 = vadd.f32 %v5812_v52, %v5657_v61  ;;  %v8158_v28 = vpop.f32.mrf.mxu1  ;;  %v9764_v30 = vpop.f32.mrf.mxu0  ;;  %v5819_v14 = vld [vmem:[#allocation3 + $0x98] sm:$0xff] }
 0x24e   : > { %v6860_v31 = vmul.f32 0.16666667, %v6812_v17  ;;  %v6810_v32 = vmin.f32 %v6762_v20, 6.0  ;;  %v6765_v38 = vmax.f32 %v6717_v24, 0.0  ;;  %v6715_v40 = vadd.f32 3.0, %v9760_v25 }
 0x24f   : > { %v9773_v35 = vadd.f32 %v9735_v6, %v6617_v21  ;;  %v6615_v36 = vld [vmem:[#allocation3 + $0x20] sm:$0xff]  ;;  %6573 = vst.msk [vmem:[#allocation3 + $0x50] sm:$0xff] %vm889_vm5, %v6525_v22  ;;  %v6523_v37 = vadd.f32 %v6475_v23, %v6308_v29  ;;  %v6478_v41 = vld [vmem:[#allocation3 + $0x58] sm:$0xff]  ;;  %5908 = vst.msk [vmem:[#allocation3 + $0x60] sm:$0xff] %vm889_vm5, %v5860_v27  ;;  %v5863_v42 = vadd.f32 %v8158_v28, %v5815_v34  ;;  %v5660_v43 = vpop.f32.mrf.mxu1  ;;  %v9777_v51 = vpop.f32.mrf.mxu0 }
 0x250   : > { %v6908_v45 = vmul.f32 %v6860_v31, %v6668_v39  ;;  %v6858_v49 = vmul.f32 0.16666667, %v6810_v32  ;;  %v6813_v50 = vmin.f32 %v6765_v38, 6.0  ;;  %v6763_v46 = vmax.f32 %v6715_v40, 0.0  ;;  %v5817_v31 = vld [vmem:[#allocation3 + $0x88] sm:$0xff] }
 0x251   : > { %v6720_v48 = vadd.f32 3.0, %v9773_v35  ;;  %v9781_v18 = vadd.f32 %v9735_v6, %v6615_v36  ;;  %v6618_v53 = vld [vmem:[#allocation3 + $0x38] sm:$0xff]  ;;  %6571 = vst.msk [vmem:[#allocation3 + $0x40] sm:$0xff] %vm889_vm5, %v6523_v37  ;;  %v6526_v54 = vadd.f32 %v8204_v5, %v6478_v41  ;;  %v6476_v55 = vld [vmem:[#allocation3 + $0x48] sm:$0xff]  ;;  %5911 = vst.msk [vmem:[#allocation3 + $0x78] sm:$0xff] %vm889_vm5, %v5863_v42  ;;  %v5861_v56 = vadd.f32 %v5813_v47, %v5660_v43  ;;  %v8161_v57 = vpop.f32.mrf.mxu1  ;;  %v9785_v60 = vpop.f32.mrf.mxu0 }
 0x252   : > { %6956 = vst.msk [vmem:[%s9770_s27 + $0x10] sm:$0xff] %vm889_vm5, %v6908_v45  ;;  %v6906_v29 = vmul.f32 %v6858_v49, %v9743_v44  ;;  %v6861_v39 = vmul.f32 0.16666667, %v6813_v50  ;;  %v6811_v58 = vmin.f32 %v6763_v46, 6.0  ;;  %v9791_v59 = vadd.f32 %v9735_v6, %v6618_v53  ;;  %v5822_v45 = vld [vmem:[#allocation3 + $0xb0] sm:$0xff] }
 0x253   : > { %v6768_v63 = vmax.f32 %v6720_v48, 0.0  ;;  %v6718_v0 = vadd.f32 3.0, %v9781_v18  ;;  %v6616_v4 = vld [vmem:[#allocation3 + $0x28] sm:$0xff]  ;;  %6574 = vst.msk [vmem:[#allocation3 + $0x58] sm:$0xff] %vm889_vm5, %v6526_v54  ;;  %v6524_v5 = vadd.f32 %v6476_v55, %v9747_v8  ;;  %5909 = vst.msk [vmem:[#allocation3 + $0x68] sm:$0xff] %vm889_vm5, %v5861_v56  ;;  %v5866_v26 = vadd.f32 %v8161_v57, %v5818_v62  ;;  %v5673_v33 = vpop.f32.mrf.mxu1  ;;  %v9797_v1 = vpop.f32.mrf.mxu0 }
 0x254   : > { %6954 = vst.msk [vmem:[%s9770_s27] sm:$0xff] %vm889_vm5, %v6906_v29  ;;  %v6909_v44 = vmul.f32 %v6861_v39, %v9751_v11  ;;  %v6859_v2 = vmul.f32 0.16666667, %v6811_v58  ;;  %v6721_v3 = vadd.f32 3.0, %v9791_v59  ;;  %v9804_v7 = vadd.f32 %v9735_v6, %v6616_v4  ;;  %v6481_v9 = vld [vmem:[#allocation3 + $0x70] sm:$0xff]  ;;  %v5820_v39 = vld [vmem:[#allocation3 + $0xa0] sm:$0xff] }
 0x255   : > { %v6816_v8 = vmin.f32 %v6768_v63, 6.0  ;;  %v6766_v15 = vmax.f32 %v6718_v0, 0.0  ;;  %6572 = vst.msk [vmem:[#allocation3 + $0x48] sm:$0xff] %vm889_vm5, %v6524_v5  ;;  %v6529_v19 = vadd.f32 %v9756_v16, %v6481_v9  ;;  %5914 = vst.msk [vmem:[#allocation3 + $0x90] sm:$0xff] %vm889_vm5, %v5866_v26  ;;  %v5864_v12 = vadd.f32 %v5816_v10, %v5673_v33  ;;  %v8162_v13 = vpop.f32.mrf.mxu1  ;;  %v9809_v11 = vpop.f32.mrf.mxu0 }
 0x256   : > { %6957 = vst.msk [vmem:[%s9770_s27 + $0x18] sm:$0xff] %vm889_vm5, %v6909_v44  ;;  %v6907_v61 = vmul.f32 %v6859_v2, %v9760_v25  ;;  %v6769_v17 = vmax.f32 %v6721_v3, 0.0  ;;  %v6719_v20 = vadd.f32 3.0, %v9804_v7  ;;  %v6621_v24 = vld [vmem:[#allocation3 + $0x50] sm:$0xff]  ;;  %v6479_v52 = vld [vmem:[#allocation3 + $0x60] sm:$0xff]  ;;  %v5867_v21 = vadd.f32 %v8162_v13, %v5819_v14  ;;  %v5823_v2 = vld [vmem:[#allocation3 + $0xb8] sm:$0xff] }
 0x257   : > { %v6864_v22 = vmul.f32 0.16666667, %v6816_v8  ;;  %v6814_v16 = vmin.f32 %v6766_v15, 6.0  ;;  %v9816_v23 = vadd.f32 %v9735_v6, %v6621_v24  ;;  %6577 = vst.msk [vmem:[#allocation3 + $0x70] sm:$0xff] %vm889_vm5, %v6529_v19  ;;  %v6527_v27 = vadd.f32 %v6479_v52, %v9764_v30  ;;  %5912 = vst.msk [vmem:[#allocation3 + $0x80] sm:$0xff] %vm889_vm5, %v5864_v12  ;;  %v5676_v28 = vpop.f32.mrf.mxu1  ;;  %v9821_v25 = vpop.f32.mrf.mxu0  ;;  %v5821_v19 = vld [vmem:[#allocation3 + $0xa8] sm:$0xff] }
 0x258   : > { %6955 = vst.msk [vmem:[%s9770_s27 + $0x8] sm:$0xff] %vm889_vm5, %v6907_v61  ;;  %v6817_v32 = vmin.f32 %v6769_v17, 6.0  ;;  %v6767_v38 = vmax.f32 %v6719_v20, 0.0  ;;  %v6619_v40 = vld [vmem:[#allocation3 + $0x40] sm:$0xff]  ;;  %v6482_v34 = vld [vmem:[#allocation3 + $0x78] sm:$0xff]  ;;  %5915 = vst.msk [vmem:[#allocation3 + $0x98] sm:$0xff] %vm889_vm5, %v5867_v21  ;;  %v5865_v36 = vadd.f32 %v5817_v31, %v5676_v28 }
 0x259   : > { %v6912_v37 = vmul.f32 %v6864_v22, %v9773_v35  ;;  %v6862_v41 = vmul.f32 0.16666667, %v6814_v16  ;;  %v6724_v30 = vadd.f32 3.0, %v9816_v23  ;;  %v9829_v42 = vadd.f32 %v9735_v6, %v6619_v40  ;;  %6575 = vst.msk [vmem:[#allocation3 + $0x60] sm:$0xff] %vm889_vm5, %v6527_v27  ;;  %v8165_v43 = vpop.f32.mrf.mxu1  ;;  %v9832_v49 = vpop.f32.mrf.mxu0  ;;  %v5826_v40 = vld [vmem:[#allocation3 + $0xd0] sm:$0xff] }
 0x25a   : > { %v6865_v50 = vmul.f32 0.16666667, %v6817_v32  ;;  %v6815_v46 = vmin.f32 %v6767_v38, 6.0  ;;  %v6622_v47 = vld [vmem:[#allocation3 + $0x58] sm:$0xff]  ;;  %v6530_v48 = vadd.f32 %v9777_v51, %v6482_v34  ;;  %v6480_v53 = vld [vmem:[#allocation3 + $0x68] sm:$0xff]  ;;  %5913 = vst.msk [vmem:[#allocation3 + $0x88] sm:$0xff] %vm889_vm5, %v5865_v36  ;;  %v5870_v35 = vadd.f32 %v8165_v43, %v5822_v45 }
 0x25b   : > { %6960 = vst.msk [vmem:[%s9770_s27 + $0x30] sm:$0xff] %vm889_vm5, %v6912_v37  ;;  %v6910_v54 = vmul.f32 %v6862_v41, %v9781_v18  ;;  %v6772_v55 = vmax.f32 %v6724_v30, 0.0  ;;  %v6722_v56 = vadd.f32 3.0, %v9829_v42  ;;  %v9841_v57 = vadd.f32 %v9735_v6, %v6622_v47  ;;  %v5689_v29 = vpop.f32.mrf.mxu1  ;;  %v9843_v58 = vpop.f32.mrf.mxu0 }
 0x25c   : > { %v6913_v51 = vmul.f32 %v6865_v50, %v9791_v59  ;;  %v6863_v62 = vmul.f32 0.16666667, %v6815_v46  ;;  %v6620_v63 = vld [vmem:[#allocation3 + $0x48] sm:$0xff]  ;;  %6578 = vst.msk [vmem:[#allocation3 + $0x78] sm:$0xff] %vm889_vm5, %v6530_v48  ;;  %v6528_v0 = vadd.f32 %v6480_v53, %v9785_v60  ;;  %v6485_v18 = vld [vmem:[#allocation3 + $0x90] sm:$0xff]  ;;  %5918 = vst.msk [vmem:[#allocation3 + $0xb0] sm:$0xff] %vm889_vm5, %v5870_v35  ;;  %v5868_v4 = vadd.f32 %v5820_v39, %v5689_v29 }
 0x25d   : > { %6958 = vst.msk [vmem:[%s9770_s27 + $0x20] sm:$0xff] %vm889_vm5, %v6910_v54  ;;  %v6820_v5 = vmin.f32 %v6772_v55, 6.0  ;;  %v6770_v26 = vmax.f32 %v6722_v56, 0.0  ;;  %v6725_v33 = vadd.f32 3.0, %v9841_v57  ;;  %v9853_v44 = vadd.f32 %v9735_v6, %v6620_v63  ;;  %v8166_v59 = vpop.f32.mrf.mxu1  ;;  %v9855_v3 = vpop.f32.mrf.mxu0 }
 0x25e   : > { %6961 = vst.msk [vmem:[%s9770_s27 + $0x38] sm:$0xff] %vm889_vm5, %v6913_v51  ;;  %v6911_v60 = vmul.f32 %v6863_v62, %v9804_v7  ;;  %v6625_v9 = vld [vmem:[#allocation3 + $0x70] sm:$0xff]  ;;  %6576 = vst.msk [vmem:[#allocation3 + $0x68] sm:$0xff] %vm889_vm5, %v6528_v0  ;;  %v6533_v10 = vadd.f32 %v9797_v1, %v6485_v18  ;;  %v6483_v8 = vld [vmem:[#allocation3 + $0x80] sm:$0xff]  ;;  %v5871_v15 = vadd.f32 %v8166_v59, %v5823_v2 }
 0x25f   : > { %5916 = vst.msk [vmem:[#allocation3 + $0xa0] sm:$0xff] %vm889_vm5, %v5868_v4  ;;  %v6868_v12 = vmul.f32 0.16666667, %v6820_v5  ;;  %v6818_v13 = vmin.f32 %v6770_v26, 6.0  ;;  %v6773_v14 = vmax.f32 %v6725_v33, 0.0  ;;  %v6723_v61 = vadd.f32 3.0, %v9853_v44  ;;  %v5692_v20 = vpop.f32.mrf.mxu1  ;;  %v9864_v24 = vpop.f32.mrf.mxu0 }
 0x260   : > { %v6486_v17 = vld [vmem:[#allocation3 + $0x98] sm:$0xff]  ;;  %6959 = vst.msk [vmem:[%s9770_s27 + $0x28] sm:$0xff] %vm889_vm5, %v6911_v60  ;;  %v9869_v7 = vadd.f32 %v9735_v6, %v6625_v9  ;;  %v6623_v1 = vld [vmem:[#allocation3 + $0x60] sm:$0xff]  ;;  %6581 = vst.msk [vmem:[#allocation3 + $0x90] sm:$0xff] %vm889_vm5, %v6533_v10  ;;  %v6531_v52 = vadd.f32 %v6483_v8, %v9809_v11  ;;  %v5869_v22 = vadd.f32 %v5821_v19, %v5692_v20 }
 0x261   : > { %v6534_v21 = vadd.f32 %v9821_v25, %v6486_v17  ;;  %5919 = vst.msk [vmem:[#allocation3 + $0xb8] sm:$0xff] %vm889_vm5, %v5871_v15  ;;  %v6916_v16 = vmul.f32 %v6868_v12, %v9816_v23  ;;  %v6866_v27 = vmul.f32 0.16666667, %v6818_v13  ;;  %v6821_v28 = vmin.f32 %v6773_v14, 6.0  ;;  %v6484_v32 = vld [vmem:[#allocation3 + $0x88] sm:$0xff]  ;;  %v8169_v38 = vpop.f32.mrf.mxu1  ;;  %v9876_v34 = vpop.f32.mrf.mxu0  ;;  %v5827_v18 = vld [vmem:[#allocation3 + $0xd8] sm:$0xff] }
 0x262   : > { %v6771_v31 = vmax.f32 %v6723_v61, 0.0  ;;  %v6728_v36 = vadd.f32 3.0, %v9869_v7  ;;  %v9880_v11 = vadd.f32 %v9735_v6, %v6623_v1  ;;  %6579 = vst.msk [vmem:[#allocation3 + $0x80] sm:$0xff] %vm889_vm5, %v6531_v52  ;;  %v6532_v25 = vadd.f32 %v6484_v32, %v9832_v49  ;;  %5917 = vst.msk [vmem:[#allocation3 + $0xa8] sm:$0xff] %vm889_vm5, %v5869_v22  ;;  %v5825_v15 = vld [vmem:[#allocation3 + $0xc8] sm:$0xff] }
 0x263   : > { %6582 = vst.msk [vmem:[#allocation3 + $0x98] sm:$0xff] %vm889_vm5, %v6534_v21  ;;  %v5874_v23 = vadd.f32 %v8169_v38, %v5826_v40  ;;  %6964 = vst.msk [vmem:[%s9770_s27 + $0x50] sm:$0xff] %vm889_vm5, %v6916_v16  ;;  %v6914_v37 = vmul.f32 %v6866_v27, %v9829_v42  ;;  %v6869_v41 = vmul.f32 0.16666667, %v6821_v28  ;;  %v6626_v43 = vld [vmem:[#allocation3 + $0x78] sm:$0xff]  ;;  %v6489_v45 = vld [vmem:[#allocation3 + $0xb0] sm:$0xff]  ;;  %v5705_v50 = vpop.f32.mrf.mxu1  ;;  %v9889_v46 = vpop.f32.mrf.mxu0 }
 0x264   : > { %v6819_v30 = vmin.f32 %v6771_v31, 6.0  ;;  %v6776_v47 = vmax.f32 %v6728_v36, 0.0  ;;  %v6726_v48 = vadd.f32 3.0, %v9880_v11  ;;  %v9893_v49 = vadd.f32 %v9735_v6, %v6626_v43  ;;  %6580 = vst.msk [vmem:[#allocation3 + $0x88] sm:$0xff] %vm889_vm5, %v6532_v25  ;;  %v5824_v42 = vld [vmem:[#allocation3 + $0xc0] sm:$0xff] }
 0x265   : > { %v6537_v53 = vadd.f32 %v9843_v58, %v6489_v45  ;;  %5922 = vst.msk [vmem:[#allocation3 + $0xd0] sm:$0xff] %vm889_vm5, %v5874_v23  ;;  %6962 = vst.msk [vmem:[%s9770_s27 + $0x40] sm:$0xff] %vm889_vm5, %v6914_v37  ;;  %v6917_v35 = vmul.f32 %v6869_v41, %v9841_v57  ;;  %v6624_v55 = vld [vmem:[#allocation3 + $0x68] sm:$0xff]  ;;  %v5872_v29 = vadd.f32 %v5824_v42, %v5705_v50  ;;  %v8170_v39 = vpop.f32.mrf.mxu1  ;;  %v9901_v51 = vpop.f32.mrf.mxu0 }
 0x266   : > { %v6867_v54 = vmul.f32 0.16666667, %v6819_v30  ;;  %v6487_v56 = vld [vmem:[#allocation3 + $0xa0] sm:$0xff]  ;;  %v6824_v62 = vmin.f32 %v6776_v47, 6.0  ;;  %v6774_v63 = vmax.f32 %v6726_v48, 0.0  ;;  %v6729_v0 = vadd.f32 3.0, %v9893_v49 }
 0x267   : > { %v9905_v58 = vadd.f32 %v9735_v6, %v6624_v55  ;;  %6585 = vst.msk [vmem:[#allocation3 + $0xb0] sm:$0xff] %vm889_vm5, %v6537_v53  ;;  %6965 = vst.msk [vmem:[%s9770_s27 + $0x58] sm:$0xff] %vm889_vm5, %v6917_v35  ;;  %v6629_v4 = vld [vmem:[#allocation3 + $0x90] sm:$0xff]  ;;  %v6535_v5 = vadd.f32 %v6487_v56, %v9855_v3  ;;  %v5875_v33 = vadd.f32 %v8170_v39, %v5827_v18  ;;  %v5708_v59 = vpop.f32.mrf.mxu1  ;;  %v9913_v2 = vpop.f32.mrf.mxu0 }
 0x268   : > { %v6915_v57 = vmul.f32 %v6867_v54, %v9853_v44  ;;  %v6490_v26 = vld [vmem:[#allocation3 + $0xb8] sm:$0xff]  ;;  %5920 = vst.msk [vmem:[#allocation3 + $0xc0] sm:$0xff] %vm889_vm5, %v5872_v29  ;;  %v6872_v60 = vmul.f32 0.16666667, %v6824_v62  ;;  %v6822_v9 = vmin.f32 %v6774_v63, 6.0  ;;  %v6777_v10 = vmax.f32 %v6729_v0, 0.0 }
 0x269   : > { %v6727_v8 = vadd.f32 3.0, %v9905_v58  ;;  %v9919_v44 = vadd.f32 %v9735_v6, %v6629_v4  ;;  %v6627_v19 = vld [vmem:[#allocation3 + $0x80] sm:$0xff]  ;;  %6583 = vst.msk [vmem:[#allocation3 + $0xa0] sm:$0xff] %vm889_vm5, %v6535_v5  ;;  %v6538_v12 = vadd.f32 %v9864_v24, %v6490_v26  ;;  %v6488_v13 = vld [vmem:[#allocation3 + $0xa8] sm:$0xff]  ;;  %5923 = vst.msk [vmem:[#allocation3 + $0xd8] sm:$0xff] %vm889_vm5, %v5875_v33  ;;  %v5873_v14 = vadd.f32 %v5825_v15, %v5708_v59  ;;  %v8173_v61 = vpop.f32.mrf.mxu1  ;;  %v9924_v17 = vpop.f32.mrf.mxu0 }
 0x26a   : > { %6963 = vst.msk [vmem:[%s9770_s27 + $0x48] sm:$0xff] %vm889_vm5, %v6915_v57  ;;  %v6630_v3 = vld [vmem:[#allocation3 + $0x98] sm:$0xff]  ;;  %v6920_v20 = vmul.f32 %v6872_v60, %v9869_v7  ;;  %v6870_v1 = vmul.f32 0.16666667, %v6822_v9  ;;  %v6825_v52 = vmin.f32 %v6777_v10, 6.0  ;;  %v9929_v16 = vadd.f32 %v9735_v6, %v6627_v19  ;;  %v5830_v55 = vld [vmem:[#allocation3 + $0xf0] sm:$0xff] }
 0x26b   : > { %v6775_v21 = vmax.f32 %v6727_v8, 0.0  ;;  %v6732_v22 = vadd.f32 3.0, %v9919_v44  ;;  %v9932_v24 = vadd.f32 %v9735_v6, %v6630_v3  ;;  %v6628_v27 = vld [vmem:[#allocation3 + $0x88] sm:$0xff]  ;;  %6586 = vst.msk [vmem:[#allocation3 + $0xb8] sm:$0xff] %vm889_vm5, %v6538_v12  ;;  %v6536_v28 = vadd.f32 %v6488_v13, %v9876_v34  ;;  %5921 = vst.msk [vmem:[#allocation3 + $0xc8] sm:$0xff] %vm889_vm5, %v5873_v14  ;;  %v5721_v7 = vpop.f32.mrf.mxu1  ;;  %v9937_v32 = vpop.f32.mrf.mxu0  ;;  %v5828_v26 = vld [vmem:[#allocation3 + $0xe0] sm:$0xff] }
 0x26c   : > { %v6493_v31 = vld [vmem:[#allocation3 + $0xd0] sm:$0xff]  ;;  %6968 = vst.msk [vmem:[%s9770_s27 + $0x70] sm:$0xff] %vm889_vm5, %v6920_v20  ;;  %v6918_v38 = vmul.f32 %v6870_v1, %v9880_v11  ;;  %v6873_v40 = vmul.f32 0.16666667, %v6825_v52  ;;  %v9943_v25 = vadd.f32 %v9735_v6, %v6628_v27  ;;  %v6730_v37 = vadd.f32 3.0, %v9929_v16 }
 0x26d   : > { %v6823_v36 = vmin.f32 %v6775_v21, 6.0  ;;  %v6780_v23 = vmax.f32 %v6732_v22, 0.0  ;;  %v6733_v34 = vadd.f32 3.0, %v9932_v24  ;;  %6584 = vst.msk [vmem:[#allocation3 + $0xa8] sm:$0xff] %vm889_vm5, %v6536_v28  ;;  %v6541_v30 = vadd.f32 %v9889_v46, %v6493_v31  ;;  %v9949_v43 = vpop.f32.mrf.mxu1  ;;  %v9951_v45 = vpop.f32.mrf.mxu0  ;;  %v5831_v31 = vld [vmem:[#allocation3 + $0xf8] sm:$0xff] }
 0x26e   : > { %v6633_v41 = vld [vmem:[#allocation3 + $0xb0] sm:$0xff]  ;;  %6966 = vst.msk [vmem:[%s9770_s27 + $0x60] sm:$0xff] %vm889_vm5, %v6918_v38  ;;  %v6921_v11 = vmul.f32 %v6873_v40, %v9893_v49  ;;  %v6731_v47 = vadd.f32 3.0, %v9943_v25  ;;  %v6778_v35 = vmax.f32 %v6730_v37, 0.0  ;;  %v5878_v0 = vadd.f32 %v8173_v61, %v5830_v55 }
 0x26f   : > { %v6871_v50 = vmul.f32 0.16666667, %v6823_v36  ;;  %v9958_v48 = vadd.f32 %v9735_v6, %v6633_v41  ;;  %v6491_v53 = vld [vmem:[#allocation3 + $0xc0] sm:$0xff]  ;;  %v6828_v42 = vmin.f32 %v6780_v23, 6.0  ;;  %v6781_v54 = vmax.f32 %v6733_v34, 0.0  ;;  %6589 = vst.msk [vmem:[#allocation3 + $0xd0] sm:$0xff] %vm889_vm5, %v6541_v30  ;;  %v5724_v56 = vpop.f32.mrf.mxu1  ;;  %v9962_v29 = vpop.f32.mrf.mxu0 }
 0x270   : > { %v6539_v46 = vadd.f32 %v6491_v53, %v9901_v51  ;;  %6969 = vst.msk [vmem:[%s9770_s27 + $0x78] sm:$0xff] %vm889_vm5, %v6921_v11  ;;  %v6779_v39 = vmax.f32 %v6731_v47, 0.0  ;;  %v6631_v63 = vld [vmem:[#allocation3 + $0xa0] sm:$0xff]  ;;  %v6494_v18 = vld [vmem:[#allocation3 + $0xd8] sm:$0xff]  ;;  %v6826_v4 = vmin.f32 %v6778_v35, 6.0  ;;  %5926 = vst.msk [vmem:[#allocation3 + $0xf0] sm:$0xff] %vm889_vm5, %v5878_v0  ;;  %v5876_v8 = vadd.f32 %v5828_v26, %v5721_v7 }
 0x271   : > { %v6919_v49 = vmul.f32 %v6871_v50, %v9905_v58  ;;  %v6736_v62 = vadd.f32 3.0, %v9958_v48  ;;  %v6876_v57 = vmul.f32 0.16666667, %v6828_v42  ;;  %v6829_v5 = vmin.f32 %v6781_v54, 6.0  ;;  %v8177_v33 = vpop.f32.mrf.mxu1  ;;  %v9972_v59 = vpop.f32.mrf.mxu0  ;;  %v5834_v30 = vld [vmem:[#allocation3 + $0x110] sm:$0xff]  ;;  %v5832_v11 = vld [vmem:[#allocation3 + $0x100] sm:$0xff] }
 0x272   : > { %v9969_v51 = vadd.f32 %v9735_v6, %v6631_v63  ;;  %6587 = vst.msk [vmem:[#allocation3 + $0xc0] sm:$0xff] %vm889_vm5, %v6539_v46  ;;  %v6827_v58 = vmin.f32 %v6779_v39, 6.0  ;;  %v6634_v9 = vld [vmem:[#allocation3 + $0xb8] sm:$0xff]  ;;  %v6542_v10 = vadd.f32 %v9913_v2, %v6494_v18  ;;  %v6492_v15 = vld [vmem:[#allocation3 + $0xc8] sm:$0xff]  ;;  %v6874_v3 = vmul.f32 0.16666667, %v6826_v4 }
 0x273   : > { %6967 = vst.msk [vmem:[%s9770_s27 + $0x68] sm:$0xff] %vm889_vm5, %v6919_v49  ;;  %v6784_v60 = vmax.f32 %v6736_v62, 0.0  ;;  %v6924_v19 = vmul.f32 %v6876_v57, %v9919_v44  ;;  %v6877_v12 = vmul.f32 0.16666667, %v6829_v5  ;;  %v5737_v14 = vpop.f32.mrf.mxu1  ;;  %v9980_v61 = vpop.f32.mrf.mxu0  ;;  %v9983_v52 = vadd.f32 %v9735_v6, %v6634_v9  ;;  %5924 = vst.msk [vmem:[#allocation3 + $0xe0] sm:$0xff] %vm889_vm5, %v5876_v8  ;;  %v5835_v46 = vld [vmem:[#allocation3 + $0x118] sm:$0xff] }
 0x274   : > { %v6734_v13 = vadd.f32 3.0, %v9969_v51  ;;  %v6875_v20 = vmul.f32 0.16666667, %v6827_v58  ;;  %v6632_v21 = vld [vmem:[#allocation3 + $0xa8] sm:$0xff]  ;;  %6590 = vst.msk [vmem:[#allocation3 + $0xd8] sm:$0xff] %vm889_vm5, %v6542_v10  ;;  %v6540_v2 = vadd.f32 %v6492_v15, %v9924_v17  ;;  %v6922_v44 = vmul.f32 %v6874_v3, %v9929_v16  ;;  %v5838_v8 = vld [vmem:[#allocation3 + $0x130] sm:$0xff] }
 0x275   : > { %v6832_v1 = vmin.f32 %v6784_v60, 6.0  ;;  %6972 = vst.msk [vmem:[%s9770_s27 + $0x90] sm:$0xff] %vm889_vm5, %v6924_v19  ;;  %v6925_v22 = vmul.f32 %v6877_v12, %v9932_v24  ;;  %v9993_v28 = vadd.f32 %v9735_v6, %v6632_v21  ;;  %v8178_v7 = vpop.f32.mrf.mxu1  ;;  %v9995_v38 = vpop.f32.mrf.mxu0  ;;  %v6737_v17 = vadd.f32 3.0, %v9983_v52  ;;  %v5829_v24 = vld [vmem:[#allocation3 + $0xe8] sm:$0xff] }
 0x276   : > { %v6782_v27 = vmax.f32 %v6734_v13, 0.0  ;;  %v6923_v40 = vmul.f32 %v6875_v20, %v9943_v25  ;;  %v6637_v23 = vld [vmem:[#allocation3 + $0xd0] sm:$0xff]  ;;  %6588 = vst.msk [vmem:[#allocation3 + $0xc8] sm:$0xff] %vm889_vm5, %v6540_v2  ;;  %v5879_v16 = vadd.f32 %v9949_v43, %v5831_v31  ;;  %6970 = vst.msk [vmem:[%s9770_s27 + $0x80] sm:$0xff] %vm889_vm5, %v6922_v44  ;;  %v5877_v25 = vadd.f32 %v5829_v24, %v5724_v56  ;;  %v5833_v63 = vld [vmem:[#allocation3 + $0x108] sm:$0xff] }
 0x277   : > { %v6880_v36 = vmul.f32 0.16666667, %v6832_v1  ;;  %6973 = vst.msk [vmem:[%s9770_s27 + $0x98] sm:$0xff] %vm889_vm5, %v6925_v22  ;;  %v6735_v34 = vadd.f32 3.0, %v9993_v28  ;;  %v10007_v41 = vadd.f32 %v9735_v6, %v6637_v23  ;;  %v5740_v50 = vpop.f32.mrf.mxu1  ;;  %v10009_v47 = vpop.f32.mrf.mxu0  ;;  %v6785_v53 = vmax.f32 %v6737_v17, 0.0  ;;  %v6497_v62 = vld [vmem:[#allocation3 + $0xf0] sm:$0xff] }
 0x278   : > { %v6830_v37 = vmin.f32 %v6782_v27, 6.0  ;;  %6971 = vst.msk [vmem:[%s9770_s27 + $0x88] sm:$0xff] %vm889_vm5, %v6923_v40  ;;  %5927 = vst.msk [vmem:[#allocation3 + $0xf8] sm:$0xff] %vm889_vm5, %v5879_v16  ;;  %v5882_v35 = vadd.f32 %v8177_v33, %v5834_v30  ;;  %v5880_v54 = vadd.f32 %v5832_v11, %v5737_v14  ;;  %v6545_v57 = vadd.f32 %v9937_v32, %v6497_v62  ;;  %v5836_v13 = vld [vmem:[#allocation3 + $0x120] sm:$0xff]  ;;  %v5839_v22 = vld [vmem:[#allocation3 + $0x138] sm:$0xff] }
 0x279   : > { %v6928_v43 = vmul.f32 %v6880_v36, %v9958_v48  ;;  %v6635_v42 = vld [vmem:[#allocation3 + $0xc0] sm:$0xff]  ;;  %v6783_v49 = vmax.f32 %v6735_v34, 0.0  ;;  %v6740_v56 = vadd.f32 3.0, %v10007_v41  ;;  %5925 = vst.msk [vmem:[#allocation3 + $0xe8] sm:$0xff] %vm889_vm5, %v5877_v25  ;;  %v8181_v48 = vpop.f32.mrf.mxu1  ;;  %v10020_v0 = vpop.f32.mrf.mxu0  ;;  %v6833_v18 = vmin.f32 %v6785_v53, 6.0 }
 0x27a   : > { %v6878_v55 = vmul.f32 0.16666667, %v6830_v37  ;;  %v10017_v39 = vadd.f32 %v9735_v6, %v6635_v42  ;;  %5930 = vst.msk [vmem:[#allocation3 + $0x110] sm:$0xff] %vm889_vm5, %v5882_v35  ;;  %5928 = vst.msk [vmem:[#allocation3 + $0x100] sm:$0xff] %vm889_vm5, %v5880_v54  ;;  %v5883_v4 = vadd.f32 %v8178_v7, %v5835_v46  ;;  %v5881_v5 = vadd.f32 %v5833_v63, %v5740_v50  ;;  %v6495_v10 = vld [vmem:[#allocation3 + $0xe0] sm:$0xff] }
 0x27b   : > { %6976 = vst.msk [vmem:[%s9770_s27 + $0xb0] sm:$0xff] %vm889_vm5, %v6928_v43  ;;  %v6831_v33 = vmin.f32 %v6783_v49, 6.0  ;;  %v6788_v58 = vmax.f32 %v6740_v56, 0.0  ;;  %v6638_v9 = vld [vmem:[#allocation3 + $0xd8] sm:$0xff]  ;;  %v5753_v15 = vpop.f32.mrf.mxu1  ;;  %v10029_v19 = vpop.f32.mrf.mxu0  ;;  %v6881_v32 = vmul.f32 0.16666667, %v6833_v18  ;;  %v6543_v12 = vadd.f32 %v6495_v10, %v9951_v45 }
 0x27c   : > { %v6926_v26 = vmul.f32 %v6878_v55, %v9969_v51  ;;  %v6738_v60 = vadd.f32 3.0, %v10017_v39  ;;  %v10032_v3 = vadd.f32 %v9735_v6, %v6638_v9  ;;  %6593 = vst.msk [vmem:[#allocation3 + $0xf0] sm:$0xff] %vm889_vm5, %v6545_v57  ;;  %5931 = vst.msk [vmem:[#allocation3 + $0x118] sm:$0xff] %vm889_vm5, %v5883_v4  ;;  %v5886_v51 = vadd.f32 %v8181_v48, %v5838_v8  ;;  %v5842_v56 = vld [vmem:[#allocation3 + $0x150] sm:$0xff] }
 0x27d   : > { %5929 = vst.msk [vmem:[#allocation3 + $0x108] sm:$0xff] %vm889_vm5, %v5881_v5  ;;  %v6879_v14 = vmul.f32 0.16666667, %v6831_v33  ;;  %v6836_v20 = vmin.f32 %v6788_v58, 6.0  ;;  %v6636_v21 = vld [vmem:[#allocation3 + $0xc8] sm:$0xff]  ;;  %v5884_v2 = vadd.f32 %v5836_v13, %v5753_v15  ;;  %v8182_v44 = vpop.f32.mrf.mxu1  ;;  %v10040_v27 = vpop.f32.mrf.mxu0  ;;  %v6929_v45 = vmul.f32 %v6881_v32, %v9983_v52  ;;  %6591 = vst.msk [vmem:[#allocation3 + $0xe0] sm:$0xff] %vm889_vm5, %v6543_v12 }
 0x27e   : > { %6974 = vst.msk [vmem:[%s9770_s27 + $0xa0] sm:$0xff] %vm889_vm5, %v6926_v26  ;;  %v6786_v1 = vmax.f32 %v6738_v60, 0.0  ;;  %v6741_v31 = vadd.f32 3.0, %v10032_v3  ;;  %v10045_v7 = vadd.f32 %v9735_v6, %v6636_v21  ;;  %5934 = vst.msk [vmem:[#allocation3 + $0x130] sm:$0xff] %vm889_vm5, %v5886_v51  ;;  %v5887_v40 = vadd.f32 %v8182_v44, %v5839_v22  ;;  %v5837_v52 = vld [vmem:[#allocation3 + $0x128] sm:$0xff]  ;;  %v5840_v5 = vld [vmem:[#allocation3 + $0x140] sm:$0xff] }
 0x27f   : > { %v6927_v36 = vmul.f32 %v6879_v14, %v9993_v28  ;;  %v6884_v17 = vmul.f32 0.16666667, %v6836_v20  ;;  %v6498_v16 = vld [vmem:[#allocation3 + $0xf8] sm:$0xff]  ;;  %5932 = vst.msk [vmem:[#allocation3 + $0x120] sm:$0xff] %vm889_vm5, %v5884_v2  ;;  %v5756_v24 = vpop.f32.mrf.mxu1  ;;  %6977 = vst.msk [vmem:[%s9770_s27 + $0xb8] sm:$0xff] %vm889_vm5, %v6929_v45  ;;  %v8232_v54 = vpop.f32.mrf.mxu0  ;;  %v5841_v2 = vld [vmem:[#allocation3 + $0x148] sm:$0xff] }
 0x280   : > { %v6834_v23 = vmin.f32 %v6786_v1, 6.0  ;;  %v6789_v37 = vmax.f32 %v6741_v31, 0.0  ;;  %v6739_v34 = vadd.f32 3.0, %v10045_v7  ;;  %v6546_v25 = vadd.f32 %v9962_v29, %v6498_v16  ;;  %v6496_v30 = vld [vmem:[#allocation3 + $0xe8] sm:$0xff]  ;;  %5935 = vst.msk [vmem:[#allocation3 + $0x138] sm:$0xff] %vm889_vm5, %v5887_v40  ;;  %v5843_v12 = vld [vmem:[#allocation3 + $0x158] sm:$0xff] }
 0x281   : > { %v5885_v11 = vadd.f32 %v5837_v52, %v5756_v24  ;;  %6975 = vst.msk [vmem:[%s9770_s27 + $0xa8] sm:$0xff] %vm889_vm5, %v6927_v36  ;;  %v6932_v28 = vmul.f32 %v6884_v17, %v10007_v41  ;;  %v6544_v43 = vadd.f32 %v6496_v30, %v9972_v59  ;;  %v6501_v53 = vld [vmem:[#allocation3 + $0x110] sm:$0xff]  ;;  %v6499_v42 = vld [vmem:[#allocation3 + $0x100] sm:$0xff]  ;;  %v8185_v35 = vpop.f32.mrf.mxu1  ;;  %v6423_v60 = vpop.f32.mrf.mxu0 }
 0x282   : > { %v6882_v50 = vmul.f32 0.16666667, %v6834_v23  ;;  %v6837_v46 = vmin.f32 %v6789_v37, 6.0  ;;  %v6787_v55 = vmax.f32 %v6739_v34, 0.0  ;;  %6594 = vst.msk [vmem:[#allocation3 + $0xf8] sm:$0xff] %vm889_vm5, %v6546_v25  ;;  %v6549_v29 = vadd.f32 %v9980_v61, %v6501_v53  ;;  %v5846_v16 = vld [vmem:[#allocation3 + $0x170] sm:$0xff] }
 0x283   : > { %v6547_v49 = vadd.f32 %v6499_v42, %v9995_v38  ;;  %5933 = vst.msk [vmem:[#allocation3 + $0x128] sm:$0xff] %vm889_vm5, %v5885_v11  ;;  %6980 = vst.msk [vmem:[%s9770_s27 + $0xd0] sm:$0xff] %vm889_vm5, %v6932_v28  ;;  %v6641_v41 = vld [vmem:[#allocation3 + $0xf0] sm:$0xff]  ;;  %v6502_v62 = vld [vmem:[#allocation3 + $0x118] sm:$0xff]  ;;  %v5890_v48 = vadd.f32 %v8185_v35, %v5842_v56  ;;  %v5769_v18 = vpop.f32.mrf.mxu1  ;;  %v8235_v22 = vpop.f32.mrf.mxu0 }
 0x284   : > { %v6930_v59 = vmul.f32 %v6882_v50, %v10017_v39  ;;  %6592 = vst.msk [vmem:[#allocation3 + $0xe8] sm:$0xff] %vm889_vm5, %v6544_v43  ;;  %v6500_v63 = vld [vmem:[#allocation3 + $0x108] sm:$0xff]  ;;  %v6885_v57 = vmul.f32 0.16666667, %v6837_v46  ;;  %v6835_v4 = vmin.f32 %v6787_v55, 6.0  ;;  %v10069_v61 = vadd.f32 %v9735_v6, %v6641_v41  ;;  %6597 = vst.msk [vmem:[#allocation3 + $0x110] sm:$0xff] %vm889_vm5, %v6549_v29 }
 0x285   : > { %6595 = vst.msk [vmem:[#allocation3 + $0x100] sm:$0xff] %vm889_vm5, %v6547_v49  ;;  %v6550_v38 = vadd.f32 %v10009_v47, %v6502_v62  ;;  %v6639_v39 = vld [vmem:[#allocation3 + $0xe0] sm:$0xff]  ;;  %v6548_v26 = vadd.f32 %v6500_v63, %v10020_v0  ;;  %v6505_v33 = vld [vmem:[#allocation3 + $0x130] sm:$0xff]  ;;  %5938 = vst.msk [vmem:[#allocation3 + $0x150] sm:$0xff] %vm889_vm5, %v5890_v48  ;;  %v5888_v58 = vadd.f32 %v5840_v5, %v5769_v18  ;;  %v8186_v9 = vpop.f32.mrf.mxu1  ;;  %v6436_v55 = vpop.f32.mrf.mxu0 }
 0x286   : > { %6978 = vst.msk [vmem:[%s9770_s27 + $0xc0] sm:$0xff] %vm889_vm5, %v6930_v59  ;;  %v6933_v10 = vmul.f32 %v6885_v57, %v10032_v3  ;;  %v6883_v8 = vmul.f32 0.16666667, %v6835_v4  ;;  %v6744_v15 = vadd.f32 3.0, %v10069_v61  ;;  %v10081_v47 = vadd.f32 %v9735_v6, %v6639_v39  ;;  %v6503_v32 = vld [vmem:[#allocation3 + $0x120] sm:$0xff] }
 0x287   : > { %6598 = vst.msk [vmem:[#allocation3 + $0x118] sm:$0xff] %vm889_vm5, %v6550_v38  ;;  %6596 = vst.msk [vmem:[#allocation3 + $0x108] sm:$0xff] %vm889_vm5, %v6548_v26  ;;  %v6553_v0 = vadd.f32 %v10029_v19, %v6505_v33  ;;  %v6551_v51 = vadd.f32 %v6503_v32, %v10040_v27  ;;  %v6506_v13 = vld [vmem:[#allocation3 + $0x138] sm:$0xff]  ;;  %v5891_v3 = vadd.f32 %v8186_v9, %v5843_v12  ;;  %v5772_v14 = vpop.f32.mrf.mxu1  ;;  %v10100_v40 = vld [vmem:[%s10189_s3] ss:$0 sm:$0xff] }
 0x288   : > { %5936 = vst.msk [vmem:[#allocation3 + $0x140] sm:$0xff] %vm889_vm5, %v5888_v58  ;;  %6981 = vst.msk [vmem:[%s9770_s27 + $0xd8] sm:$0xff] %vm889_vm5, %v6933_v10  ;;  %v6931_v6 = vmul.f32 %v6883_v8, %v10045_v7  ;;  %v6792_v20 = vmax.f32 %v6744_v15, 0.0  ;;  %v6742_v1 = vadd.f32 3.0, %v10081_v47  ;;  %v6554_v21 = vadd.f32 %v8232_v54, %v6506_v13  ;;  %v5844_v53 = vld [vmem:[#allocation3 + $0x160] sm:$0xff]  ;;  %v8236_v8 = vpop.f32.mrf.mxu0 }
 0x289   : > { %v6642_v44 = vld [vmem:[#allocation3 + $0xf8] sm:$0xff]  ;;  %6601 = vst.msk [vmem:[#allocation3 + $0x130] sm:$0xff] %vm889_vm5, %v6553_v0  ;;  %6599 = vst.msk [vmem:[#allocation3 + $0x120] sm:$0xff] %vm889_vm5, %v6551_v51  ;;  %v5889_v27 = vadd.f32 %v5841_v2, %v5772_v14  ;;  %v8189_v45 = vpop.f32.mrf.mxu1 }
 0x28a   : > { %v6504_v19 = vld [vmem:[#allocation3 + $0x128] sm:$0xff]  ;;  %5939 = vst.msk [vmem:[#allocation3 + $0x158] sm:$0xff] %vm889_vm5, %v5891_v3  ;;  %6979 = vst.msk [vmem:[%s9770_s27 + $0xc8] sm:$0xff] %vm889_vm5, %v6931_v6  ;;  %v6840_v31 = vmin.f32 %v6792_v20, 6.0  ;;  %v6790_v7 = vmax.f32 %v6742_v1, 0.0  ;;  %v6697_v36 = vadd.f32 %v10100_v40, %v6642_v44  ;;  %v5894_v34 = vadd.f32 %v8189_v45, %v5846_v16  ;;  %v6439_v45 = vpop.f32.mrf.mxu0 }
 0x28b   : > { %v6640_v17 = vld [vmem:[#allocation3 + $0xe8] sm:$0xff]  ;;  %6602 = vst.msk [vmem:[#allocation3 + $0x138] sm:$0xff] %vm889_vm5, %v6554_v21  ;;  %v6552_v23 = vadd.f32 %v6504_v19, %v6423_v60  ;;  %v6645_v52 = vld [vmem:[#allocation3 + $0x110] sm:$0xff]  ;;  %5937 = vst.msk [vmem:[#allocation3 + $0x148] sm:$0xff] %vm889_vm5, %v5889_v27  ;;  %v5785_v25 = vpop.f32.mrf.mxu1 }
 0x28c   : > { %v6695_v24 = vadd.f32 %v10100_v40, %v6640_v17  ;;  %v6643_v37 = vld [vmem:[#allocation3 + $0x100] sm:$0xff]  ;;  %v6888_v30 = vmul.f32 0.16666667, %v6840_v31  ;;  %v6838_v11 = vmin.f32 %v6790_v7, 6.0  ;;  %v6745_v28 = vadd.f32 3.0, %v6697_v36  ;;  %v6509_v43 = vld [vmem:[#allocation3 + $0x150] sm:$0xff] }
 0x28d   : > { %v6700_v50 = vadd.f32 %v10100_v40, %v6645_v52  ;;  %6600 = vst.msk [vmem:[#allocation3 + $0x128] sm:$0xff] %vm889_vm5, %v6552_v23  ;;  %v6698_v35 = vadd.f32 %v10100_v40, %v6643_v37  ;;  %v6557_v46 = vadd.f32 %v8235_v22, %v6509_v43  ;;  %5942 = vst.msk [vmem:[#allocation3 + $0x170] sm:$0xff] %vm889_vm5, %v5894_v34  ;;  %v8190_v52 = vpop.f32.mrf.mxu1 }
 0x28e   : > { %v6743_v42 = vadd.f32 3.0, %v6695_v24  ;;  %v6646_v54 = vld [vmem:[#allocation3 + $0x118] sm:$0xff]  ;;  %v5892_v29 = vadd.f32 %v5844_v53, %v5785_v25  ;;  %v6936_v49 = vmul.f32 %v6888_v30, %v10069_v61  ;;  %v6886_v56 = vmul.f32 0.16666667, %v6838_v11  ;;  %v6644_v62 = vld [vmem:[#allocation3 + $0x108] sm:$0xff] }
 0x28f   : > { %v6793_v59 = vmax.f32 %v6745_v28, 0.0  ;;  %v6748_v41 = vadd.f32 3.0, %v6700_v50  ;;  %v6507_v63 = vld [vmem:[#allocation3 + $0x140] sm:$0xff]  ;;  %v6746_v18 = vadd.f32 3.0, %v6698_v35  ;;  %v6701_v57 = vadd.f32 %v10100_v40, %v6646_v54  ;;  %6605 = vst.msk [vmem:[#allocation3 + $0x150] sm:$0xff] %vm889_vm5, %v6557_v46 }
 0x290   : > { %v6791_v48 = vmax.f32 %v6743_v42, 0.0  ;;  %v6699_v4 = vadd.f32 %v10100_v40, %v6644_v62  ;;  %5940 = vst.msk [vmem:[#allocation3 + $0x160] sm:$0xff] %vm889_vm5, %v5892_v29  ;;  %6984 = vst.msk [vmem:[%s9770_s27 + $0xf0] sm:$0xff] %vm889_vm5, %v6936_v49  ;;  %v6934_v61 = vmul.f32 %v6886_v56, %v10081_v47  ;;  %v6649_v39 = vld [vmem:[#allocation3 + $0x130] sm:$0xff]  ;;  %v6647_v26 = vld [vmem:[#allocation3 + $0x120] sm:$0xff]  ;;  %v6555_v33 = vadd.f32 %v6507_v63, %v6436_v55  ;;  %v8239_v29 = vpop.f32.mrf.mxu0  ;;  %v5788_v63 = vpop.f32.mrf.mxu1 }
 0x291   : > { %v6841_v38 = vmin.f32 %v6793_v59, 6.0  ;;  %v6796_v5 = vmax.f32 %v6748_v41, 0.0  ;;  %v6794_v60 = vmax.f32 %v6746_v18, 0.0  ;;  %v6749_v9 = vadd.f32 3.0, %v6701_v57  ;;  %v6510_v16 = vld [vmem:[#allocation3 + $0x158] sm:$0xff] }
 0x292   : > { %v6839_v58 = vmin.f32 %v6791_v48, 6.0  ;;  %v6747_v10 = vadd.f32 3.0, %v6699_v4  ;;  %6982 = vst.msk [vmem:[%s9770_s27 + $0xe0] sm:$0xff] %vm889_vm5, %v6934_v61  ;;  %v6704_v12 = vadd.f32 %v10100_v40, %v6649_v39  ;;  %v6702_v0 = vadd.f32 %v10100_v40, %v6647_v26  ;;  %6603 = vst.msk [vmem:[#allocation3 + $0x140] sm:$0xff] %vm889_vm5, %v6555_v33  ;;  %v6650_v14 = vld [vmem:[#allocation3 + $0x138] sm:$0xff]  ;;  %v6508_v43 = vld [vmem:[#allocation3 + $0x148] sm:$0xff] }
 0x293   : > { %v6889_v15 = vmul.f32 0.16666667, %v6841_v38  ;;  %v6844_v32 = vmin.f32 %v6796_v5, 6.0  ;;  %v6842_v51 = vmin.f32 %v6794_v60, 6.0  ;;  %v6797_v13 = vmax.f32 %v6749_v9, 0.0  ;;  %v5847_v55 = vld [vmem:[#allocation3 + $0x178] sm:$0xff] }
 0x294   : > { %v6887_v47 = vmul.f32 0.16666667, %v6839_v58  ;;  %v6795_v3 = vmax.f32 %v6747_v10, 0.0  ;;  %v6752_v1 = vadd.f32 3.0, %v6704_v12  ;;  %v6750_v21 = vadd.f32 3.0, %v6702_v0  ;;  %v6648_v2 = vld [vmem:[#allocation3 + $0x128] sm:$0xff] }
 0x295   : > { %v6937_v6 = vmul.f32 %v6889_v15, %v6697_v36  ;;  %v6892_v20 = vmul.f32 0.16666667, %v6844_v32  ;;  %v6890_v19 = vmul.f32 0.16666667, %v6842_v51  ;;  %v6845_v22 = vmin.f32 %v6797_v13, 6.0  ;;  %v6513_v49 = vld [vmem:[#allocation3 + $0x170] sm:$0xff] }
 0x296   : > { %v6935_v44 = vmul.f32 %v6887_v47, %v6695_v24  ;;  %v6843_v27 = vmin.f32 %v6795_v3, 6.0  ;;  %v6800_v7 = vmax.f32 %v6752_v1, 0.0  ;;  %v6798_v17 = vmax.f32 %v6750_v21, 0.0  ;;  %v6653_v36 = vld [vmem:[#allocation3 + $0x150] sm:$0xff]  ;;  %v5845_v33 = vld [vmem:[#allocation3 + $0x168] sm:$0xff] }
 0x297   : > { %6985 = vst.msk [vmem:[%s9770_s27 + $0xf8] sm:$0xff] %vm889_vm5, %v6937_v6  ;;  %v6940_v31 = vmul.f32 %v6892_v20, %v6700_v50  ;;  %v6705_v23 = vadd.f32 %v10100_v40, %v6650_v14  ;;  %v6938_v37 = vmul.f32 %v6890_v19, %v6698_v35  ;;  %v6893_v24 = vmul.f32 0.16666667, %v6845_v22  ;;  %v6511_v61 = vld [vmem:[#allocation3 + $0x160] sm:$0xff] }
 0x298   : > { %6983 = vst.msk [vmem:[%s9770_s27 + $0xe8] sm:$0xff] %vm889_vm5, %v6935_v44  ;;  %v6891_v34 = vmul.f32 0.16666667, %v6843_v27  ;;  %v6703_v25 = vadd.f32 %v10100_v40, %v6648_v2  ;;  %v6848_v30 = vmin.f32 %v6800_v7, 6.0  ;;  %v6846_v11 = vmin.f32 %v6798_v17, 6.0 }
 0x299   : > { %6988 = vst.msk [vmem:[%s9770_s27 + $0x110] sm:$0xff] %vm889_vm5, %v6940_v31  ;;  %v6753_v28 = vadd.f32 3.0, %v6705_v23  ;;  %v6708_v50 = vadd.f32 %v10100_v40, %v6653_v36  ;;  %6986 = vst.msk [vmem:[%s9770_s27 + $0x100] sm:$0xff] %vm889_vm5, %v6938_v37  ;;  %v6941_v53 = vmul.f32 %v6893_v24, %v6701_v57  ;;  %v6651_v35 = vld [vmem:[#allocation3 + $0x140] sm:$0xff]  ;;  %v6558_v46 = vadd.f32 %v8236_v8, %v6510_v16  ;;  %v6452_v8 = vpop.f32.mrf.mxu0 }
 0x29a   : > { %v6939_v42 = vmul.f32 %v6891_v34, %v6699_v4  ;;  %v6751_v54 = vadd.f32 3.0, %v6703_v25  ;;  %v6896_v56 = vmul.f32 0.16666667, %v6848_v30  ;;  %v6894_v59 = vmul.f32 0.16666667, %v6846_v11 }
 0x29b   : > { %v6801_v41 = vmax.f32 %v6753_v28, 0.0  ;;  %v6756_v62 = vadd.f32 3.0, %v6708_v50  ;;  %6989 = vst.msk [vmem:[%s9770_s27 + $0x118] sm:$0xff] %vm889_vm5, %v6941_v53  ;;  %v6706_v18 = vadd.f32 %v10100_v40, %v6651_v35  ;;  %6606 = vst.msk [vmem:[#allocation3 + $0x158] sm:$0xff] %vm889_vm5, %v6558_v46  ;;  %v6556_v57 = vadd.f32 %v6508_v43, %v6439_v45  ;;  %v8240_v1 = vpop.f32.mrf.mxu0 }
 0x29c   : > { %6987 = vst.msk [vmem:[%s9770_s27 + $0x108] sm:$0xff] %vm889_vm5, %v6939_v42  ;;  %v6799_v48 = vmax.f32 %v6751_v54, 0.0  ;;  %v5895_v4 = vadd.f32 %v8190_v52, %v5847_v55  ;;  %v6944_v38 = vmul.f32 %v6896_v56, %v6704_v12  ;;  %v6942_v5 = vmul.f32 %v6894_v59, %v6702_v0 }
 0x29d   : > { %v6849_v39 = vmin.f32 %v6801_v41, 6.0  ;;  %v6804_v26 = vmax.f32 %v6756_v62, 0.0  ;;  %v6754_v60 = vadd.f32 3.0, %v6706_v18  ;;  %6604 = vst.msk [vmem:[#allocation3 + $0x148] sm:$0xff] %vm889_vm5, %v6556_v57  ;;  %v6561_v9 = vadd.f32 %v8239_v29, %v6513_v49  ;;  %v6455_v17 = vpop.f32.mrf.mxu0 }
 0x29e   : > { %v6847_v58 = vmin.f32 %v6799_v48, 6.0  ;;  %5943 = vst.msk [vmem:[#allocation3 + $0x178] sm:$0xff] %vm889_vm5, %v5895_v4  ;;  %v5893_v10 = vadd.f32 %v5845_v33, %v5788_v63  ;;  %6992 = vst.msk [vmem:[%s9770_s27 + $0x130] sm:$0xff] %vm889_vm5, %v6944_v38  ;;  %v6559_v12 = vadd.f32 %v6511_v61, %v6452_v8 }
 0x29f   : > { %6990 = vst.msk [vmem:[%s9770_s27 + $0x120] sm:$0xff] %vm889_vm5, %v6942_v5  ;;  %v6897_v15 = vmul.f32 0.16666667, %v6849_v39  ;;  %v6852_v32 = vmin.f32 %v6804_v26, 6.0  ;;  %v6802_v47 = vmax.f32 %v6754_v60, 0.0  ;;  %6609 = vst.msk [vmem:[#allocation3 + $0x170] sm:$0xff] %vm889_vm5, %v6561_v9 }
 0x2a0   : > { %v6895_v0 = vmul.f32 0.16666667, %v6847_v58  ;;  %5941 = vst.msk [vmem:[#allocation3 + $0x168] sm:$0xff] %vm889_vm5, %v5893_v10  ;;  %6607 = vst.msk [vmem:[#allocation3 + $0x160] sm:$0xff] %vm889_vm5, %v6559_v12 }
 0x2a1   : > { %v6945_v51 = vmul.f32 %v6897_v15, %v6705_v23  ;;  %v6900_v13 = vmul.f32 0.16666667, %v6852_v32  ;;  %v6850_v14 = vmin.f32 %v6802_v47, 6.0 }
 0x2a2   : > { %v6943_v3 = vmul.f32 %v6895_v0, %v6703_v25  ;;  %v6654_v20 = vld [vmem:[#allocation3 + $0x158] sm:$0xff] }
 0x2a3   : > { %6993 = vst.msk [vmem:[%s9770_s27 + $0x138] sm:$0xff] %vm889_vm5, %v6945_v51  ;;  %v6948_v6 = vmul.f32 %v6900_v13, %v6708_v50  ;;  %v6898_v21 = vmul.f32 0.16666667, %v6850_v14  ;;  %v6709_v2 = vadd.f32 %v10100_v40, %v6654_v20 }
 0x2a4   : > { %6991 = vst.msk [vmem:[%s9770_s27 + $0x128] sm:$0xff] %vm889_vm5, %v6943_v3  ;;  %v6652_v44 = vld [vmem:[#allocation3 + $0x148] sm:$0xff] }
 0x2a5   : > { %6996 = vst.msk [vmem:[%s9770_s27 + $0x150] sm:$0xff] %vm889_vm5, %v6948_v6  ;;  %v6514_v19 = vld [vmem:[#allocation3 + $0x178] sm:$0xff]  ;;  %v6946_v22 = vmul.f32 %v6898_v21, %v6706_v18  ;;  %v6757_v27 = vadd.f32 3.0, %v6709_v2  ;;  %v6707_v45 = vadd.f32 %v10100_v40, %v6652_v44 }
 0x2a6   : > { %v6562_v31 = vadd.f32 %v8240_v1, %v6514_v19  ;;  %v6657_v7 = vld [vmem:[#allocation3 + $0x170] sm:$0xff] }
 0x2a7   : > { %v6512_v23 = vld [vmem:[#allocation3 + $0x168] sm:$0xff]  ;;  %6994 = vst.msk [vmem:[%s9770_s27 + $0x140] sm:$0xff] %vm889_vm5, %v6946_v22  ;;  %v6805_v36 = vmax.f32 %v6757_v27, 0.0  ;;  %v6755_v16 = vadd.f32 3.0, %v6707_v45  ;;  %v6712_v52 = vadd.f32 %v10100_v40, %v6657_v7  ;;  %v6655_v37 = vld [vmem:[#allocation3 + $0x160] sm:$0xff] }
 0x2a8   : > { %6610 = vst.msk [vmem:[#allocation3 + $0x178] sm:$0xff] %vm889_vm5, %v6562_v31  ;;  %v6560_v24 = vadd.f32 %v6512_v23, %v6455_v17  ;;  %v6710_v34 = vadd.f32 %v10100_v40, %v6655_v37 }
 0x2a9   : > { %v6853_v25 = vmin.f32 %v6805_v36, 6.0  ;;  %v6803_v30 = vmax.f32 %v6755_v16, 0.0  ;;  %v6760_v11 = vadd.f32 3.0, %v6712_v52 }
 0x2aa   : > { %6608 = vst.msk [vmem:[#allocation3 + $0x168] sm:$0xff] %vm889_vm5, %v6560_v24  ;;  %v6758_v28 = vadd.f32 3.0, %v6710_v34 }
 0x2ab   : > { %v6901_v50 = vmul.f32 0.16666667, %v6853_v25  ;;  %v6851_v43 = vmin.f32 %v6803_v30, 6.0  ;;  %v6808_v53 = vmax.f32 %v6760_v11, 0.0 }
 0x2ac   : > { %v6806_v42 = vmax.f32 %v6758_v28, 0.0 }
 0x2ad   : > { %v6949_v54 = vmul.f32 %v6901_v50, %v6709_v2  ;;  %v6899_v35 = vmul.f32 0.16666667, %v6851_v43  ;;  %v6856_v46 = vmin.f32 %v6808_v53, 6.0 }
 0x2ae   : > { %v6854_v55 = vmin.f32 %v6806_v42, 6.0 }
 0x2af   : > { %v6658_v29 = vld [vmem:[#allocation3 + $0x178] sm:$0xff]  ;;  %6997 = vst.msk [vmem:[%s9770_s27 + $0x158] sm:$0xff] %vm889_vm5, %v6949_v54  ;;  %v6947_v49 = vmul.f32 %v6899_v35, %v6707_v45  ;;  %v6904_v56 = vmul.f32 0.16666667, %v6856_v46 }
 0x2b0   : > { %v6713_v59 = vadd.f32 %v10100_v40, %v6658_v29  ;;  %v6902_v41 = vmul.f32 0.16666667, %v6854_v55 }
 0x2b1   : > { %v6656_v62 = vld [vmem:[#allocation3 + $0x168] sm:$0xff]  ;;  %6995 = vst.msk [vmem:[%s9770_s27 + $0x148] sm:$0xff] %vm889_vm5, %v6947_v49  ;;  %v6952_v63 = vmul.f32 %v6904_v56, %v6712_v52 }
 0x2b2   : > { %v6761_v48 = vadd.f32 3.0, %v6713_v59  ;;  %v6711_v18 = vadd.f32 %v10100_v40, %v6656_v62  ;;  %v6950_v57 = vmul.f32 %v6902_v41, %v6710_v34 }
 0x2b3   : > { %7000 = vst.msk [vmem:[%s9770_s27 + $0x170] sm:$0xff] %vm889_vm5, %v6952_v63 }
 0x2b4   : > { %v6809_v4 = vmax.f32 %v6761_v48, 0.0  ;;  %v6759_v61 = vadd.f32 3.0, %v6711_v18  ;;  %6998 = vst.msk [vmem:[%s9770_s27 + $0x160] sm:$0xff] %vm889_vm5, %v6950_v57 }
 0x2b6   : > { %v6857_v38 = vmin.f32 %v6809_v4, 6.0  ;;  %v6807_v5 = vmax.f32 %v6759_v61, 0.0 }
 0x2b8   : > { %v6905_v39 = vmul.f32 0.16666667, %v6857_v38  ;;  %v6855_v26 = vmin.f32 %v6807_v5, 6.0 }
 0x2ba   : > { %v6953_v33 = vmul.f32 %v6905_v39, %v6713_v59  ;;  %v6903_v58 = vmul.f32 0.16666667, %v6855_v26 }
 0x2bc   : > { %7001 = vst.msk [vmem:[%s9770_s27 + $0x178] sm:$0xff] %vm889_vm5, %v6953_v33  ;;  %v6951_v60 = vmul.f32 %v6903_v58, %v6711_v18 }
 0x2be   : > { %6999 = vst.msk [vmem:[%s9770_s27 + $0x168] sm:$0xff] %vm889_vm5, %v6951_v60 }
 0x2bf PF: > { %s14_s17 = sadd.s32 1, %s8527_s17   ;;  %s10191_s15 = smov %s8523_s16 }
 0x2c0   : > { %p11_p5 = scmp.ge.s32.totalorder %s14_s17, 4   ;;  %s10192_s16 = smov %s10194_s18 }
 0x2c2   :  { %13 = sbr.rel (!%p11_p5) target bundleno = 2 (0x2), region = 77 }

</bundles_post_ra>
